<compile_context>
chip_gen: v6e
topology: v6e:2x2x1
jax: 0.10.0
libtpu: 0.0.40
codegen_flags: <defaults>
</compile_context>

<pallas_src>
import jax
import jax.numpy as jnp
from jax.experimental import pallas as pl
from jax.experimental.pallas import tpu as pltpu

HIDDEN = 64
LANE_CHUNK = 256    # in-kernel lane sub-chunk (bounds vreg live ranges)
MAX_TILE_N = 2048   # max lanes (samples) per grid step; multiple of LANE_CHUNK


def _round_up(a, b):
    return ((a + b - 1) // b) * b


def _mlp_kernel(coords_ref,
                w1_ref, b1_ref,
                w2_ref, b2_ref,
                w3_ref, b3_ref,
                w4_ref, b4_ref,
                w5_ref, b5_ref,
                o_ref):
    """Fused 5-layer MLP on one lane-dense tile of samples.

    coords tile: (3, TILE_N) f32 (rows = x, y, t).
    Weights in torch layout (out, in); w2..w5 arrive pre-cast to bf16 for the
    MXU; biases are (out, 1) f32.  Output tile: (3, TILE_N) f32.
    """
    tile_n = coords_ref.shape[1]
    n_chunks = tile_n // LANE_CHUNK   # static python int (tile_n % LANE_CHUNK == 0)

    # Unrolled at trace time; all slice bounds are static -> zero-cost views
    # and short, independent live ranges per chunk.
    for c in range(n_chunks):
        lo, hi = c * LANE_CHUNK, (c + 1) * LANE_CHUNK
        xyz = coords_ref[:, lo:hi]                         # (3, chunk) f32
        x = xyz[0:1, :]
        y = xyz[1:2, :]
        t = xyz[2:3, :]

        # Layer 1 (in=3) as lane-broadcast VPU FMAs -- avoids a K=3 matmul.
        w1 = w1_ref[...]                                   # (64, 3) f32
        h = (w1[:, 0:1] * x + w1[:, 1:2] * y + w1[:, 2:3] * t
             + b1_ref[...])                                # (64, chunk) f32
        h = jnp.maximum(h, 0.0)

        # Layers 2-4: bf16 x bf16 MXU matmuls, f32 accumulation.
        # Bias-add / ReLU stay f32 (v5e VPU/EUP have no bf16 path).
        h = jnp.maximum(
            jnp.dot(w2_ref[...], h.astype(jnp.bfloat16),
                    preferred_element_type=jnp.float32) + b2_ref[...], 0.0)
        h = jnp.maximum(
            jnp.dot(w3_ref[...], h.astype(jnp.bfloat16),
                    preferred_element_type=jnp.float32) + b3_ref[...], 0.0)
        h = jnp.maximum(
            jnp.dot(w4_ref[...], h.astype(jnp.bfloat16),
                    preferred_element_type=jnp.float32) + b4_ref[...], 0.0)

        # Layer 5: (3, 64) @ (64, chunk) -> (3, chunk).
        out = jnp.dot(w5_ref[...], h.astype(jnp.bfloat16),
                      preferred_element_type=jnp.float32) + b5_ref[...]
        o_ref[:, lo:hi] = out.astype(o_ref.dtype)          # lane-dense store


def _resident_spec(shape):
    # Whole-array block with a constant index map: stays VMEM-resident across
    # all grid steps (DMA'd once).
    return pl.BlockSpec(shape, lambda i: (0, 0))


@jax.jit
def cfdpinn_forward(x, y, t, params):
    """Pallas implementation of CfdPinn.forward.

    x, y, t: arbitrary-shaped float arrays with the same number of elements.
    params:  dict of torch-layout f32 weights (out, in) and biases (out, 1).
    Returns (N, 3) float32 predictions (u, v, p), same as the torch module.
    """
    # Single lane-dense coord array (3, n): one pad, one DMA per grid step.
    coords = jnp.stack(
        [x.reshape(-1), y.reshape(-1), t.reshape(-1)], axis=0
    ).astype(jnp.float32)
    n = coords.shape[1]

    # Lane tile: multiple of LANE_CHUNK, capped at MAX_TILE_N, and sized so
    # the grid has >= 2 steps whenever n allows (v7x megacore sharding).
    tile_n = min(MAX_TILE_N,
                 max(LANE_CHUNK, _round_up(-(-n // 2), LANE_CHUNK)))
    n_pad = _round_up(n, tile_n)
    if n_pad != n:
        coords = jnp.pad(coords, ((0, 0), (0, n_pad - n)))

    grid = (n_pad // tile_n,)
    coord_spec = pl.BlockSpec((3, tile_n), lambda i: (0, i))
    out_spec = pl.BlockSpec((3, tile_n), lambda i: (0, i))   # lane-dense output

    # bf16 operands for the MXU layers (f32 masters kept in `params`).
    w2 = params["w2"].astype(jnp.bfloat16)
    w3 = params["w3"].astype(jnp.bfloat16)
    w4 = params["w4"].astype(jnp.bfloat16)
    w5 = params["w5"].astype(jnp.bfloat16)

    in_specs = [
        coord_spec,
        _resident_spec((HIDDEN, 3)),      _resident_spec((HIDDEN, 1)),
        _resident_spec((HIDDEN, HIDDEN)), _resident_spec((HIDDEN, 1)),
        _resident_spec((HIDDEN, HIDDEN)), _resident_spec((HIDDEN, 1)),
        _resident_spec((HIDDEN, HIDDEN)), _resident_spec((HIDDEN, 1)),
        _resident_spec((3, HIDDEN)),      _resident_spec((3, 1)),
    ]

    out_padded = pl.pallas_call(
        _mlp_kernel,
        out_shape=jax.ShapeDtypeStruct((3, n_pad), jnp.float32),
        grid=grid,
        in_specs=in_specs,
        out_specs=out_spec,
        compiler_params=pltpu.CompilerParams(
            dimension_semantics=("parallel",)),
    )(coords,
      params["w1"], params["b1"],
      w2, params["b2"],
      w3, params["b3"],
      w4, params["b4"],
      w5, params["b5"])

    # Torch output convention is (N, 3).  This transpose is a single small
    # relayout inside the same jit; callers that can consume (3, N) directly
    # should take out_padded[:, :n] instead.
    return out_padded[:, :n].T


def init_params(key):
    """Deterministic init matching torch.nn.Linear default:
    U(-1/sqrt(fan_in), 1/sqrt(fan_in)) for both weight and bias.
    Weights stored in torch layout (out_features, in_features); biases (out, 1)."""
    dims = [(3, HIDDEN), (HIDDEN, HIDDEN), (HIDDEN, HIDDEN), (HIDDEN, HIDDEN), (HIDDEN, 3)]
    params = {}
    keys = jax.random.split(key, 2 * len(dims))
    for layer, (fan_in, fan_out) in enumerate(dims, start=1):
        bound = 1.0 / jnp.sqrt(float(fan_in))
        wk, bk = keys[2 * (layer - 1)], keys[2 * (layer - 1) + 1]
        params[f"w{layer}"] = jax.random.uniform(
            wk, (fan_out, fan_in), jnp.float32, -bound, bound)
        params[f"b{layer}"] = jax.random.uniform(
            bk, (fan_out, 1), jnp.float32, -bound, bound)
    return params


def _reference_forward_f32(x, y, t, params):
    """Plain-JAX full-f32 reference (torch semantics)."""
    h = jnp.concatenate(
        [x.reshape(-1, 1), y.reshape(-1, 1), t.reshape(-1, 1)], axis=1
    ).astype(jnp.float32)
    for layer in range(1, 5):
        h = jnp.maximum(h @ params[f"w{layer}"].T + params[f"b{layer}"].T, 0.0)
    return h @ params["w5"].T + params["b5"].T


def _reference_forward_bf16(x, y, t, params):
    """Precision-matched reference: f32 first layer, bf16 MXU operands with
    f32 accumulation for layers 2-5 (mirrors the kernel's numerics)."""
    h = jnp.concatenate(
        [x.reshape(-1, 1), y.reshape(-1, 1), t.reshape(-1, 1)], axis=1
    ).astype(jnp.float32)
    h = jnp.maximum(h @ params["w1"].T + params["b1"].T, 0.0)
    for layer in range(2, 5):
        w = params[f"w{layer}"].T.astype(jnp.bfloat16)
        h = jnp.maximum(
            jnp.dot(h.astype(jnp.bfloat16), w,
                    preferred_element_type=jnp.float32) + params[f"b{layer}"].T,
            0.0)
    w5 = params["w5"].T.astype(jnp.bfloat16)
    return jnp.dot(h.astype(jnp.bfloat16), w5,
                   preferred_element_type=jnp.float32) + params["b5"].T


if __name__ == "__main__":
    key = jax.random.PRNGKey(0)
    pkey, xkey, ykey, tkey = jax.random.split(key, 4)

    params = init_params(pkey)

    # Small spatio-temporal coordinate grids: x, y, t each (32, 64) -> N = 2048
    # points.  tile_n becomes 1024 -> a 2-step "parallel" grid (both v7x cores
    # get work) with 4 lane sub-chunks per step inside the kernel.
    x = jax.random.uniform(xkey, (32, 64), jnp.float32)
    y = jax.random.uniform(ykey, (32, 64), jnp.float32)
    t = jax.random.uniform(tkey, (32, 64), jnp.float32)

    out = cfdpinn_forward(x, y, t, params)
    jax.block_until_ready(out)
    assert out.shape == (2048, 3), out.shape

    # Precision-matched check (validates the kernel itself).
    ref_bf16 = _reference_forward_bf16(x, y, t, params)
    assert jnp.allclose(out, ref_bf16, atol=2e-3, rtol=2e-3), \
        "mismatch vs bf16-matched reference"

    # Sanity check vs the full-f32 torch-semantics reference (bf16 MXU error).
    ref_f32 = _reference_forward_f32(x, y, t, params)
    assert jnp.allclose(out, ref_f32, atol=5e-2, rtol=5e-2), \
        "excessive deviation vs f32 reference"

    print("KERNEL_OK")
</pallas_src>

<mosaic_0001>
module attributes {stable_mosaic.version = 11 : i64} {
  func.func @_mlp_kernel(%arg0: i32, %arg1: memref<3x1024xf32, #tpu.memory_space<vmem>>, %arg2: memref<64x3xf32, #tpu.memory_space<vmem>>, %arg3: memref<64x1xf32, #tpu.memory_space<vmem>>, %arg4: memref<64x64xbf16, #tpu.memory_space<vmem>>, %arg5: memref<64x1xf32, #tpu.memory_space<vmem>>, %arg6: memref<64x64xbf16, #tpu.memory_space<vmem>>, %arg7: memref<64x1xf32, #tpu.memory_space<vmem>>, %arg8: memref<64x64xbf16, #tpu.memory_space<vmem>>, %arg9: memref<64x1xf32, #tpu.memory_space<vmem>>, %arg10: memref<3x64xbf16, #tpu.memory_space<vmem>>, %arg11: memref<3x1xf32, #tpu.memory_space<vmem>>, %arg12: memref<3x1024xf32, #tpu.memory_space<vmem>>) attributes {dimension_semantics = [#tpu.dimension_semantics<parallel>], iteration_bounds = array<i64: 2>, scalar_prefetch = 0 : i64, scratch_operands = 0 : i64, tpu.core_type = #tpu.core_type<tc>, window_params = [{transform_indices = @transform_0, window_bounds = array<i64: 3, 1024>}, {pipeline_mode = #tpu.pipeline_mode<synchronous>, transform_indices = @transform_1, window_bounds = array<i64: 64, 3>}, {pipeline_mode = #tpu.pipeline_mode<synchronous>, transform_indices = @transform_2, window_bounds = array<i64: 64, 1>}, {pipeline_mode = #tpu.pipeline_mode<synchronous>, transform_indices = @transform_3, window_bounds = array<i64: 64, 64>}, {pipeline_mode = #tpu.pipeline_mode<synchronous>, transform_indices = @transform_4, window_bounds = array<i64: 64, 1>}, {pipeline_mode = #tpu.pipeline_mode<synchronous>, transform_indices = @transform_5, window_bounds = array<i64: 64, 64>}, {pipeline_mode = #tpu.pipeline_mode<synchronous>, transform_indices = @transform_6, window_bounds = array<i64: 64, 1>}, {pipeline_mode = #tpu.pipeline_mode<synchronous>, transform_indices = @transform_7, window_bounds = array<i64: 64, 64>}, {pipeline_mode = #tpu.pipeline_mode<synchronous>, transform_indices = @transform_8, window_bounds = array<i64: 64, 1>}, {pipeline_mode = #tpu.pipeline_mode<synchronous>, transform_indices = @transform_9, window_bounds = array<i64: 3, 64>}, {pipeline_mode = #tpu.pipeline_mode<synchronous>, transform_indices = @transform_10, window_bounds = array<i64: 3, 1>}, {transform_indices = @transform_11, window_bounds = array<i64: 3, 1024>}]} {
    %c0 = arith.constant 0 : index
    %c0_0 = arith.constant 0 : index
    %0 = vector.load %arg1[%c0, %c0_0] : memref<3x1024xf32, #tpu.memory_space<vmem>>, vector<3x256xf32>
    %1 = vector.extract_strided_slice %0 {offsets = [0, 0], sizes = [1, 256], strides = [1, 1]} : vector<3x256xf32> to vector<1x256xf32>
    %2 = vector.extract_strided_slice %0 {offsets = [1, 0], sizes = [1, 256], strides = [1, 1]} : vector<3x256xf32> to vector<1x256xf32>
    %3 = vector.extract_strided_slice %0 {offsets = [2, 0], sizes = [1, 256], strides = [1, 1]} : vector<3x256xf32> to vector<1x256xf32>
    %c0_1 = arith.constant 0 : index
    %c0_2 = arith.constant 0 : index
    %4 = vector.load %arg2[%c0_1, %c0_2] : memref<64x3xf32, #tpu.memory_space<vmem>>, vector<64x3xf32>
    %5 = vector.extract_strided_slice %4 {offsets = [0, 0], sizes = [64, 1], strides = [1, 1]} : vector<64x3xf32> to vector<64x1xf32>
    %6 = vector.broadcast %5 : vector<64x1xf32> to vector<64x256xf32>
    %7 = vector.broadcast %1 : vector<1x256xf32> to vector<64x256xf32>
    %8 = arith.mulf %6, %7 : vector<64x256xf32>
    %9 = vector.extract_strided_slice %4 {offsets = [0, 1], sizes = [64, 1], strides = [1, 1]} : vector<64x3xf32> to vector<64x1xf32>
    %10 = vector.broadcast %9 : vector<64x1xf32> to vector<64x256xf32>
    %11 = vector.broadcast %2 : vector<1x256xf32> to vector<64x256xf32>
    %12 = arith.mulf %10, %11 : vector<64x256xf32>
    %13 = arith.addf %8, %12 : vector<64x256xf32>
    %14 = vector.extract_strided_slice %4 {offsets = [0, 2], sizes = [64, 1], strides = [1, 1]} : vector<64x3xf32> to vector<64x1xf32>
    %15 = vector.broadcast %14 : vector<64x1xf32> to vector<64x256xf32>
    %16 = vector.broadcast %3 : vector<1x256xf32> to vector<64x256xf32>
    %17 = arith.mulf %15, %16 : vector<64x256xf32>
    %18 = arith.addf %13, %17 : vector<64x256xf32>
    %c0_3 = arith.constant 0 : index
    %c0_4 = arith.constant 0 : index
    %19 = vector.load %arg3[%c0_3, %c0_4] : memref<64x1xf32, #tpu.memory_space<vmem>>, vector<64x1xf32>
    %20 = vector.broadcast %19 : vector<64x1xf32> to vector<64x256xf32>
    %21 = arith.addf %18, %20 : vector<64x256xf32>
    %cst = arith.constant 0.000000e+00 : f32
    %22 = vector.broadcast %cst : f32 to vector<64x256xf32>
    %23 = arith.maximumf %21, %22 : vector<64x256xf32>
    %c0_5 = arith.constant 0 : index
    %c0_6 = arith.constant 0 : index
    %24 = vector.load %arg4[%c0_5, %c0_6] : memref<64x64xbf16, #tpu.memory_space<vmem>>, vector<64x64xbf16>
    %25 = arith.truncf %23 : vector<64x256xf32> to vector<64x256xbf16>
    %cst_7 = arith.constant dense<0.000000e+00> : vector<64x256xf32>
    %26 = tpu.matmul %24, %25, %cst_7 {dimension_numbers = #tpu.dot_dimension_numbers<[1], [0], [0], [1], [0, 0, 1, 1], [], []>} : vector<64x64xbf16>, vector<64x256xbf16>, vector<64x256xf32> -> vector<64x256xf32>
    %c0_8 = arith.constant 0 : index
    %c0_9 = arith.constant 0 : index
    %27 = vector.load %arg5[%c0_8, %c0_9] : memref<64x1xf32, #tpu.memory_space<vmem>>, vector<64x1xf32>
    %28 = vector.broadcast %27 : vector<64x1xf32> to vector<64x256xf32>
    %29 = arith.addf %26, %28 : vector<64x256xf32>
    %cst_10 = arith.constant 0.000000e+00 : f32
    %30 = vector.broadcast %cst_10 : f32 to vector<64x256xf32>
    %31 = arith.maximumf %29, %30 : vector<64x256xf32>
    %c0_11 = arith.constant 0 : index
    %c0_12 = arith.constant 0 : index
    %32 = vector.load %arg6[%c0_11, %c0_12] : memref<64x64xbf16, #tpu.memory_space<vmem>>, vector<64x64xbf16>
    %33 = arith.truncf %31 : vector<64x256xf32> to vector<64x256xbf16>
    %cst_13 = arith.constant dense<0.000000e+00> : vector<64x256xf32>
    %34 = tpu.matmul %32, %33, %cst_13 {dimension_numbers = #tpu.dot_dimension_numbers<[1], [0], [0], [1], [0, 0, 1, 1], [], []>} : vector<64x64xbf16>, vector<64x256xbf16>, vector<64x256xf32> -> vector<64x256xf32>
    %c0_14 = arith.constant 0 : index
    %c0_15 = arith.constant 0 : index
    %35 = vector.load %arg7[%c0_14, %c0_15] : memref<64x1xf32, #tpu.memory_space<vmem>>, vector<64x1xf32>
    %36 = vector.broadcast %35 : vector<64x1xf32> to vector<64x256xf32>
    %37 = arith.addf %34, %36 : vector<64x256xf32>
    %cst_16 = arith.constant 0.000000e+00 : f32
    %38 = vector.broadcast %cst_16 : f32 to vector<64x256xf32>
    %39 = arith.maximumf %37, %38 : vector<64x256xf32>
    %c0_17 = arith.constant 0 : index
    %c0_18 = arith.constant 0 : index
    %40 = vector.load %arg8[%c0_17, %c0_18] : memref<64x64xbf16, #tpu.memory_space<vmem>>, vector<64x64xbf16>
    %41 = arith.truncf %39 : vector<64x256xf32> to vector<64x256xbf16>
    %cst_19 = arith.constant dense<0.000000e+00> : vector<64x256xf32>
    %42 = tpu.matmul %40, %41, %cst_19 {dimension_numbers = #tpu.dot_dimension_numbers<[1], [0], [0], [1], [0, 0, 1, 1], [], []>} : vector<64x64xbf16>, vector<64x256xbf16>, vector<64x256xf32> -> vector<64x256xf32>
    %c0_20 = arith.constant 0 : index
    %c0_21 = arith.constant 0 : index
    %43 = vector.load %arg9[%c0_20, %c0_21] : memref<64x1xf32, #tpu.memory_space<vmem>>, vector<64x1xf32>
    %44 = vector.broadcast %43 : vector<64x1xf32> to vector<64x256xf32>
    %45 = arith.addf %42, %44 : vector<64x256xf32>
    %cst_22 = arith.constant 0.000000e+00 : f32
    %46 = vector.broadcast %cst_22 : f32 to vector<64x256xf32>
    %47 = arith.maximumf %45, %46 : vector<64x256xf32>
    %c0_23 = arith.constant 0 : index
    %c0_24 = arith.constant 0 : index
    %48 = vector.load %arg10[%c0_23, %c0_24] : memref<3x64xbf16, #tpu.memory_space<vmem>>, vector<3x64xbf16>
    %49 = arith.truncf %47 : vector<64x256xf32> to vector<64x256xbf16>
    %cst_25 = arith.constant dense<0.000000e+00> : vector<3x256xf32>
    %50 = tpu.matmul %48, %49, %cst_25 {dimension_numbers = #tpu.dot_dimension_numbers<[1], [0], [0], [1], [0, 0, 1, 1], [], []>} : vector<3x64xbf16>, vector<64x256xbf16>, vector<3x256xf32> -> vector<3x256xf32>
    %c0_26 = arith.constant 0 : index
    %c0_27 = arith.constant 0 : index
    %51 = vector.load %arg11[%c0_26, %c0_27] : memref<3x1xf32, #tpu.memory_space<vmem>>, vector<3x1xf32>
    %52 = vector.broadcast %51 : vector<3x1xf32> to vector<3x256xf32>
    %53 = arith.addf %50, %52 : vector<3x256xf32>
    %c0_28 = arith.constant 0 : index
    %c0_29 = arith.constant 0 : index
    %54 = vector.load %arg12[%c0_28, %c0_29] : memref<3x1024xf32, #tpu.memory_space<vmem>>, vector<3x256xf32>
    tpu.vector_store %arg12[%c0_28, %c0_29], %53 {strides = array<i32>} : memref<3x1024xf32, #tpu.memory_space<vmem>>, vector<3x256xf32>,
    %c0_30 = arith.constant 0 : index
    %c256 = arith.constant 256 : index
    %55 = vector.load %arg1[%c0_30, %c256] : memref<3x1024xf32, #tpu.memory_space<vmem>>, vector<3x256xf32>
    %56 = vector.extract_strided_slice %55 {offsets = [0, 0], sizes = [1, 256], strides = [1, 1]} : vector<3x256xf32> to vector<1x256xf32>
    %57 = vector.extract_strided_slice %55 {offsets = [1, 0], sizes = [1, 256], strides = [1, 1]} : vector<3x256xf32> to vector<1x256xf32>
    %58 = vector.extract_strided_slice %55 {offsets = [2, 0], sizes = [1, 256], strides = [1, 1]} : vector<3x256xf32> to vector<1x256xf32>
    %c0_31 = arith.constant 0 : index
    %c0_32 = arith.constant 0 : index
    %59 = vector.load %arg2[%c0_31, %c0_32] : memref<64x3xf32, #tpu.memory_space<vmem>>, vector<64x3xf32>
    %60 = vector.extract_strided_slice %59 {offsets = [0, 0], sizes = [64, 1], strides = [1, 1]} : vector<64x3xf32> to vector<64x1xf32>
    %61 = vector.broadcast %60 : vector<64x1xf32> to vector<64x256xf32>
    %62 = vector.broadcast %56 : vector<1x256xf32> to vector<64x256xf32>
    %63 = arith.mulf %61, %62 : vector<64x256xf32>
    %64 = vector.extract_strided_slice %59 {offsets = [0, 1], sizes = [64, 1], strides = [1, 1]} : vector<64x3xf32> to vector<64x1xf32>
    %65 = vector.broadcast %64 : vector<64x1xf32> to vector<64x256xf32>
    %66 = vector.broadcast %57 : vector<1x256xf32> to vector<64x256xf32>
    %67 = arith.mulf %65, %66 : vector<64x256xf32>
    %68 = arith.addf %63, %67 : vector<64x256xf32>
    %69 = vector.extract_strided_slice %59 {offsets = [0, 2], sizes = [64, 1], strides = [1, 1]} : vector<64x3xf32> to vector<64x1xf32>
    %70 = vector.broadcast %69 : vector<64x1xf32> to vector<64x256xf32>
    %71 = vector.broadcast %58 : vector<1x256xf32> to vector<64x256xf32>
    %72 = arith.mulf %70, %71 : vector<64x256xf32>
    %73 = arith.addf %68, %72 : vector<64x256xf32>
    %c0_33 = arith.constant 0 : index
    %c0_34 = arith.constant 0 : index
    %74 = vector.load %arg3[%c0_33, %c0_34] : memref<64x1xf32, #tpu.memory_space<vmem>>, vector<64x1xf32>
    %75 = vector.broadcast %74 : vector<64x1xf32> to vector<64x256xf32>
    %76 = arith.addf %73, %75 : vector<64x256xf32>
    %cst_35 = arith.constant 0.000000e+00 : f32
    %77 = vector.broadcast %cst_35 : f32 to vector<64x256xf32>
    %78 = arith.maximumf %76, %77 : vector<64x256xf32>
    %c0_36 = arith.constant 0 : index
    %c0_37 = arith.constant 0 : index
    %79 = vector.load %arg4[%c0_36, %c0_37] : memref<64x64xbf16, #tpu.memory_space<vmem>>, vector<64x64xbf16>
    %80 = arith.truncf %78 : vector<64x256xf32> to vector<64x256xbf16>
    %cst_38 = arith.constant dense<0.000000e+00> : vector<64x256xf32>
    %81 = tpu.matmul %79, %80, %cst_38 {dimension_numbers = #tpu.dot_dimension_numbers<[1], [0], [0], [1], [0, 0, 1, 1], [], []>} : vector<64x64xbf16>, vector<64x256xbf16>, vector<64x256xf32> -> vector<64x256xf32>
    %c0_39 = arith.constant 0 : index
    %c0_40 = arith.constant 0 : index
    %82 = vector.load %arg5[%c0_39, %c0_40] : memref<64x1xf32, #tpu.memory_space<vmem>>, vector<64x1xf32>
    %83 = vector.broadcast %82 : vector<64x1xf32> to vector<64x256xf32>
    %84 = arith.addf %81, %83 : vector<64x256xf32>
    %cst_41 = arith.constant 0.000000e+00 : f32
    %85 = vector.broadcast %cst_41 : f32 to vector<64x256xf32>
    %86 = arith.maximumf %84, %85 : vector<64x256xf32>
    %c0_42 = arith.constant 0 : index
    %c0_43 = arith.constant 0 : index
    %87 = vector.load %arg6[%c0_42, %c0_43] : memref<64x64xbf16, #tpu.memory_space<vmem>>, vector<64x64xbf16>
    %88 = arith.truncf %86 : vector<64x256xf32> to vector<64x256xbf16>
    %cst_44 = arith.constant dense<0.000000e+00> : vector<64x256xf32>
    %89 = tpu.matmul %87, %88, %cst_44 {dimension_numbers = #tpu.dot_dimension_numbers<[1], [0], [0], [1], [0, 0, 1, 1], [], []>} : vector<64x64xbf16>, vector<64x256xbf16>, vector<64x256xf32> -> vector<64x256xf32>
    %c0_45 = arith.constant 0 : index
    %c0_46 = arith.constant 0 : index
    %90 = vector.load %arg7[%c0_45, %c0_46] : memref<64x1xf32, #tpu.memory_space<vmem>>, vector<64x1xf32>
    %91 = vector.broadcast %90 : vector<64x1xf32> to vector<64x256xf32>
    %92 = arith.addf %89, %91 : vector<64x256xf32>
    %cst_47 = arith.constant 0.000000e+00 : f32
    %93 = vector.broadcast %cst_47 : f32 to vector<64x256xf32>
    %94 = arith.maximumf %92, %93 : vector<64x256xf32>
    %c0_48 = arith.constant 0 : index
    %c0_49 = arith.constant 0 : index
    %95 = vector.load %arg8[%c0_48, %c0_49] : memref<64x64xbf16, #tpu.memory_space<vmem>>, vector<64x64xbf16>
    %96 = arith.truncf %94 : vector<64x256xf32> to vector<64x256xbf16>
    %cst_50 = arith.constant dense<0.000000e+00> : vector<64x256xf32>
    %97 = tpu.matmul %95, %96, %cst_50 {dimension_numbers = #tpu.dot_dimension_numbers<[1], [0], [0], [1], [0, 0, 1, 1], [], []>} : vector<64x64xbf16>, vector<64x256xbf16>, vector<64x256xf32> -> vector<64x256xf32>
    %c0_51 = arith.constant 0 : index
    %c0_52 = arith.constant 0 : index
    %98 = vector.load %arg9[%c0_51, %c0_52] : memref<64x1xf32, #tpu.memory_space<vmem>>, vector<64x1xf32>
    %99 = vector.broadcast %98 : vector<64x1xf32> to vector<64x256xf32>
    %100 = arith.addf %97, %99 : vector<64x256xf32>
    %cst_53 = arith.constant 0.000000e+00 : f32
    %101 = vector.broadcast %cst_53 : f32 to vector<64x256xf32>
    %102 = arith.maximumf %100, %101 : vector<64x256xf32>
    %c0_54 = arith.constant 0 : index
    %c0_55 = arith.constant 0 : index
    %103 = vector.load %arg10[%c0_54, %c0_55] : memref<3x64xbf16, #tpu.memory_space<vmem>>, vector<3x64xbf16>
    %104 = arith.truncf %102 : vector<64x256xf32> to vector<64x256xbf16>
    %cst_56 = arith.constant dense<0.000000e+00> : vector<3x256xf32>
    %105 = tpu.matmul %103, %104, %cst_56 {dimension_numbers = #tpu.dot_dimension_numbers<[1], [0], [0], [1], [0, 0, 1, 1], [], []>} : vector<3x64xbf16>, vector<64x256xbf16>, vector<3x256xf32> -> vector<3x256xf32>
    %c0_57 = arith.constant 0 : index
    %c0_58 = arith.constant 0 : index
    %106 = vector.load %arg11[%c0_57, %c0_58] : memref<3x1xf32, #tpu.memory_space<vmem>>, vector<3x1xf32>
    %107 = vector.broadcast %106 : vector<3x1xf32> to vector<3x256xf32>
    %108 = arith.addf %105, %107 : vector<3x256xf32>
    %c0_59 = arith.constant 0 : index
    %c256_60 = arith.constant 256 : index
    %109 = vector.load %arg12[%c0_59, %c256_60] : memref<3x1024xf32, #tpu.memory_space<vmem>>, vector<3x256xf32>
    tpu.vector_store %arg12[%c0_59, %c256_60], %108 {strides = array<i32>} : memref<3x1024xf32, #tpu.memory_space<vmem>>, vector<3x256xf32>,
    %c0_61 = arith.constant 0 : index
    %c512 = arith.constant 512 : index
    %110 = vector.load %arg1[%c0_61, %c512] : memref<3x1024xf32, #tpu.memory_space<vmem>>, vector<3x256xf32>
    %111 = vector.extract_strided_slice %110 {offsets = [0, 0], sizes = [1, 256], strides = [1, 1]} : vector<3x256xf32> to vector<1x256xf32>
    %112 = vector.extract_strided_slice %110 {offsets = [1, 0], sizes = [1, 256], strides = [1, 1]} : vector<3x256xf32> to vector<1x256xf32>
    %113 = vector.extract_strided_slice %110 {offsets = [2, 0], sizes = [1, 256], strides = [1, 1]} : vector<3x256xf32> to vector<1x256xf32>
    %c0_62 = arith.constant 0 : index
    %c0_63 = arith.constant 0 : index
    %114 = vector.load %arg2[%c0_62, %c0_63] : memref<64x3xf32, #tpu.memory_space<vmem>>, vector<64x3xf32>
    %115 = vector.extract_strided_slice %114 {offsets = [0, 0], sizes = [64, 1], strides = [1, 1]} : vector<64x3xf32> to vector<64x1xf32>
    %116 = vector.broadcast %115 : vector<64x1xf32> to vector<64x256xf32>
    %117 = vector.broadcast %111 : vector<1x256xf32> to vector<64x256xf32>
    %118 = arith.mulf %116, %117 : vector<64x256xf32>
    %119 = vector.extract_strided_slice %114 {offsets = [0, 1], sizes = [64, 1], strides = [1, 1]} : vector<64x3xf32> to vector<64x1xf32>
    %120 = vector.broadcast %119 : vector<64x1xf32> to vector<64x256xf32>
    %121 = vector.broadcast %112 : vector<1x256xf32> to vector<64x256xf32>
    %122 = arith.mulf %120, %121 : vector<64x256xf32>
    %123 = arith.addf %118, %122 : vector<64x256xf32>
    %124 = vector.extract_strided_slice %114 {offsets = [0, 2], sizes = [64, 1], strides = [1, 1]} : vector<64x3xf32> to vector<64x1xf32>
    %125 = vector.broadcast %124 : vector<64x1xf32> to vector<64x256xf32>
    %126 = vector.broadcast %113 : vector<1x256xf32> to vector<64x256xf32>
    %127 = arith.mulf %125, %126 : vector<64x256xf32>
    %128 = arith.addf %123, %127 : vector<64x256xf32>
    %c0_64 = arith.constant 0 : index
    %c0_65 = arith.constant 0 : index
    %129 = vector.load %arg3[%c0_64, %c0_65] : memref<64x1xf32, #tpu.memory_space<vmem>>, vector<64x1xf32>
    %130 = vector.broadcast %129 : vector<64x1xf32> to vector<64x256xf32>
    %131 = arith.addf %128, %130 : vector<64x256xf32>
    %cst_66 = arith.constant 0.000000e+00 : f32
    %132 = vector.broadcast %cst_66 : f32 to vector<64x256xf32>
    %133 = arith.maximumf %131, %132 : vector<64x256xf32>
    %c0_67 = arith.constant 0 : index
    %c0_68 = arith.constant 0 : index
    %134 = vector.load %arg4[%c0_67, %c0_68] : memref<64x64xbf16, #tpu.memory_space<vmem>>, vector<64x64xbf16>
    %135 = arith.truncf %133 : vector<64x256xf32> to vector<64x256xbf16>
    %cst_69 = arith.constant dense<0.000000e+00> : vector<64x256xf32>
    %136 = tpu.matmul %134, %135, %cst_69 {dimension_numbers = #tpu.dot_dimension_numbers<[1], [0], [0], [1], [0, 0, 1, 1], [], []>} : vector<64x64xbf16>, vector<64x256xbf16>, vector<64x256xf32> -> vector<64x256xf32>
    %c0_70 = arith.constant 0 : index
    %c0_71 = arith.constant 0 : index
    %137 = vector.load %arg5[%c0_70, %c0_71] : memref<64x1xf32, #tpu.memory_space<vmem>>, vector<64x1xf32>
    %138 = vector.broadcast %137 : vector<64x1xf32> to vector<64x256xf32>
    %139 = arith.addf %136, %138 : vector<64x256xf32>
    %cst_72 = arith.constant 0.000000e+00 : f32
    %140 = vector.broadcast %cst_72 : f32 to vector<64x256xf32>
    %141 = arith.maximumf %139, %140 : vector<64x256xf32>
    %c0_73 = arith.constant 0 : index
    %c0_74 = arith.constant 0 : index
    %142 = vector.load %arg6[%c0_73, %c0_74] : memref<64x64xbf16, #tpu.memory_space<vmem>>, vector<64x64xbf16>
    %143 = arith.truncf %141 : vector<64x256xf32> to vector<64x256xbf16>
    %cst_75 = arith.constant dense<0.000000e+00> : vector<64x256xf32>
    %144 = tpu.matmul %142, %143, %cst_75 {dimension_numbers = #tpu.dot_dimension_numbers<[1], [0], [0], [1], [0, 0, 1, 1], [], []>} : vector<64x64xbf16>, vector<64x256xbf16>, vector<64x256xf32> -> vector<64x256xf32>
    %c0_76 = arith.constant 0 : index
    %c0_77 = arith.constant 0 : index
    %145 = vector.load %arg7[%c0_76, %c0_77] : memref<64x1xf32, #tpu.memory_space<vmem>>, vector<64x1xf32>
    %146 = vector.broadcast %145 : vector<64x1xf32> to vector<64x256xf32>
    %147 = arith.addf %144, %146 : vector<64x256xf32>
    %cst_78 = arith.constant 0.000000e+00 : f32
    %148 = vector.broadcast %cst_78 : f32 to vector<64x256xf32>
    %149 = arith.maximumf %147, %148 : vector<64x256xf32>
    %c0_79 = arith.constant 0 : index
    %c0_80 = arith.constant 0 : index
    %150 = vector.load %arg8[%c0_79, %c0_80] : memref<64x64xbf16, #tpu.memory_space<vmem>>, vector<64x64xbf16>
    %151 = arith.truncf %149 : vector<64x256xf32> to vector<64x256xbf16>
    %cst_81 = arith.constant dense<0.000000e+00> : vector<64x256xf32>
    %152 = tpu.matmul %150, %151, %cst_81 {dimension_numbers = #tpu.dot_dimension_numbers<[1], [0], [0], [1], [0, 0, 1, 1], [], []>} : vector<64x64xbf16>, vector<64x256xbf16>, vector<64x256xf32> -> vector<64x256xf32>
    %c0_82 = arith.constant 0 : index
    %c0_83 = arith.constant 0 : index
    %153 = vector.load %arg9[%c0_82, %c0_83] : memref<64x1xf32, #tpu.memory_space<vmem>>, vector<64x1xf32>
    %154 = vector.broadcast %153 : vector<64x1xf32> to vector<64x256xf32>
    %155 = arith.addf %152, %154 : vector<64x256xf32>
    %cst_84 = arith.constant 0.000000e+00 : f32
    %156 = vector.broadcast %cst_84 : f32 to vector<64x256xf32>
    %157 = arith.maximumf %155, %156 : vector<64x256xf32>
    %c0_85 = arith.constant 0 : index
    %c0_86 = arith.constant 0 : index
    %158 = vector.load %arg10[%c0_85, %c0_86] : memref<3x64xbf16, #tpu.memory_space<vmem>>, vector<3x64xbf16>
    %159 = arith.truncf %157 : vector<64x256xf32> to vector<64x256xbf16>
    %cst_87 = arith.constant dense<0.000000e+00> : vector<3x256xf32>
    %160 = tpu.matmul %158, %159, %cst_87 {dimension_numbers = #tpu.dot_dimension_numbers<[1], [0], [0], [1], [0, 0, 1, 1], [], []>} : vector<3x64xbf16>, vector<64x256xbf16>, vector<3x256xf32> -> vector<3x256xf32>
    %c0_88 = arith.constant 0 : index
    %c0_89 = arith.constant 0 : index
    %161 = vector.load %arg11[%c0_88, %c0_89] : memref<3x1xf32, #tpu.memory_space<vmem>>, vector<3x1xf32>
    %162 = vector.broadcast %161 : vector<3x1xf32> to vector<3x256xf32>
    %163 = arith.addf %160, %162 : vector<3x256xf32>
    %c0_90 = arith.constant 0 : index
    %c512_91 = arith.constant 512 : index
    %164 = vector.load %arg12[%c0_90, %c512_91] : memref<3x1024xf32, #tpu.memory_space<vmem>>, vector<3x256xf32>
    tpu.vector_store %arg12[%c0_90, %c512_91], %163 {strides = array<i32>} : memref<3x1024xf32, #tpu.memory_space<vmem>>, vector<3x256xf32>,
    %c0_92 = arith.constant 0 : index
    %c768 = arith.constant 768 : index
    %165 = vector.load %arg1[%c0_92, %c768] : memref<3x1024xf32, #tpu.memory_space<vmem>>, vector<3x256xf32>
    %166 = vector.extract_strided_slice %165 {offsets = [0, 0], sizes = [1, 256], strides = [1, 1]} : vector<3x256xf32> to vector<1x256xf32>
    %167 = vector.extract_strided_slice %165 {offsets = [1, 0], sizes = [1, 256], strides = [1, 1]} : vector<3x256xf32> to vector<1x256xf32>
    %168 = vector.extract_strided_slice %165 {offsets = [2, 0], sizes = [1, 256], strides = [1, 1]} : vector<3x256xf32> to vector<1x256xf32>
    %c0_93 = arith.constant 0 : index
    %c0_94 = arith.constant 0 : index
    %169 = vector.load %arg2[%c0_93, %c0_94] : memref<64x3xf32, #tpu.memory_space<vmem>>, vector<64x3xf32>
    %170 = vector.extract_strided_slice %169 {offsets = [0, 0], sizes = [64, 1], strides = [1, 1]} : vector<64x3xf32> to vector<64x1xf32>
    %171 = vector.broadcast %170 : vector<64x1xf32> to vector<64x256xf32>
    %172 = vector.broadcast %166 : vector<1x256xf32> to vector<64x256xf32>
    %173 = arith.mulf %171, %172 : vector<64x256xf32>
    %174 = vector.extract_strided_slice %169 {offsets = [0, 1], sizes = [64, 1], strides = [1, 1]} : vector<64x3xf32> to vector<64x1xf32>
    %175 = vector.broadcast %174 : vector<64x1xf32> to vector<64x256xf32>
    %176 = vector.broadcast %167 : vector<1x256xf32> to vector<64x256xf32>
    %177 = arith.mulf %175, %176 : vector<64x256xf32>
    %178 = arith.addf %173, %177 : vector<64x256xf32>
    %179 = vector.extract_strided_slice %169 {offsets = [0, 2], sizes = [64, 1], strides = [1, 1]} : vector<64x3xf32> to vector<64x1xf32>
    %180 = vector.broadcast %179 : vector<64x1xf32> to vector<64x256xf32>
    %181 = vector.broadcast %168 : vector<1x256xf32> to vector<64x256xf32>
    %182 = arith.mulf %180, %181 : vector<64x256xf32>
    %183 = arith.addf %178, %182 : vector<64x256xf32>
    %c0_95 = arith.constant 0 : index
    %c0_96 = arith.constant 0 : index
    %184 = vector.load %arg3[%c0_95, %c0_96] : memref<64x1xf32, #tpu.memory_space<vmem>>, vector<64x1xf32>
    %185 = vector.broadcast %184 : vector<64x1xf32> to vector<64x256xf32>
    %186 = arith.addf %183, %185 : vector<64x256xf32>
    %cst_97 = arith.constant 0.000000e+00 : f32
    %187 = vector.broadcast %cst_97 : f32 to vector<64x256xf32>
    %188 = arith.maximumf %186, %187 : vector<64x256xf32>
    %c0_98 = arith.constant 0 : index
    %c0_99 = arith.constant 0 : index
    %189 = vector.load %arg4[%c0_98, %c0_99] : memref<64x64xbf16, #tpu.memory_space<vmem>>, vector<64x64xbf16>
    %190 = arith.truncf %188 : vector<64x256xf32> to vector<64x256xbf16>
    %cst_100 = arith.constant dense<0.000000e+00> : vector<64x256xf32>
    %191 = tpu.matmul %189, %190, %cst_100 {dimension_numbers = #tpu.dot_dimension_numbers<[1], [0], [0], [1], [0, 0, 1, 1], [], []>} : vector<64x64xbf16>, vector<64x256xbf16>, vector<64x256xf32> -> vector<64x256xf32>
    %c0_101 = arith.constant 0 : index
    %c0_102 = arith.constant 0 : index
    %192 = vector.load %arg5[%c0_101, %c0_102] : memref<64x1xf32, #tpu.memory_space<vmem>>, vector<64x1xf32>
    %193 = vector.broadcast %192 : vector<64x1xf32> to vector<64x256xf32>
    %194 = arith.addf %191, %193 : vector<64x256xf32>
    %cst_103 = arith.constant 0.000000e+00 : f32
    %195 = vector.broadcast %cst_103 : f32 to vector<64x256xf32>
    %196 = arith.maximumf %194, %195 : vector<64x256xf32>
    %c0_104 = arith.constant 0 : index
    %c0_105 = arith.constant 0 : index
    %197 = vector.load %arg6[%c0_104, %c0_105] : memref<64x64xbf16, #tpu.memory_space<vmem>>, vector<64x64xbf16>
    %198 = arith.truncf %196 : vector<64x256xf32> to vector<64x256xbf16>
    %cst_106 = arith.constant dense<0.000000e+00> : vector<64x256xf32>
    %199 = tpu.matmul %197, %198, %cst_106 {dimension_numbers = #tpu.dot_dimension_numbers<[1], [0], [0], [1], [0, 0, 1, 1], [], []>} : vector<64x64xbf16>, vector<64x256xbf16>, vector<64x256xf32> -> vector<64x256xf32>
    %c0_107 = arith.constant 0 : index
    %c0_108 = arith.constant 0 : index
    %200 = vector.load %arg7[%c0_107, %c0_108] : memref<64x1xf32, #tpu.memory_space<vmem>>, vector<64x1xf32>
    %201 = vector.broadcast %200 : vector<64x1xf32> to vector<64x256xf32>
    %202 = arith.addf %199, %201 : vector<64x256xf32>
    %cst_109 = arith.constant 0.000000e+00 : f32
    %203 = vector.broadcast %cst_109 : f32 to vector<64x256xf32>
    %204 = arith.maximumf %202, %203 : vector<64x256xf32>
    %c0_110 = arith.constant 0 : index
    %c0_111 = arith.constant 0 : index
    %205 = vector.load %arg8[%c0_110, %c0_111] : memref<64x64xbf16, #tpu.memory_space<vmem>>, vector<64x64xbf16>
    %206 = arith.truncf %204 : vector<64x256xf32> to vector<64x256xbf16>
    %cst_112 = arith.constant dense<0.000000e+00> : vector<64x256xf32>
    %207 = tpu.matmul %205, %206, %cst_112 {dimension_numbers = #tpu.dot_dimension_numbers<[1], [0], [0], [1], [0, 0, 1, 1], [], []>} : vector<64x64xbf16>, vector<64x256xbf16>, vector<64x256xf32> -> vector<64x256xf32>
    %c0_113 = arith.constant 0 : index
    %c0_114 = arith.constant 0 : index
    %208 = vector.load %arg9[%c0_113, %c0_114] : memref<64x1xf32, #tpu.memory_space<vmem>>, vector<64x1xf32>
    %209 = vector.broadcast %208 : vector<64x1xf32> to vector<64x256xf32>
    %210 = arith.addf %207, %209 : vector<64x256xf32>
    %cst_115 = arith.constant 0.000000e+00 : f32
    %211 = vector.broadcast %cst_115 : f32 to vector<64x256xf32>
    %212 = arith.maximumf %210, %211 : vector<64x256xf32>
    %c0_116 = arith.constant 0 : index
    %c0_117 = arith.constant 0 : index
    %213 = vector.load %arg10[%c0_116, %c0_117] : memref<3x64xbf16, #tpu.memory_space<vmem>>, vector<3x64xbf16>
    %214 = arith.truncf %212 : vector<64x256xf32> to vector<64x256xbf16>
    %cst_118 = arith.constant dense<0.000000e+00> : vector<3x256xf32>
    %215 = tpu.matmul %213, %214, %cst_118 {dimension_numbers = #tpu.dot_dimension_numbers<[1], [0], [0], [1], [0, 0, 1, 1], [], []>} : vector<3x64xbf16>, vector<64x256xbf16>, vector<3x256xf32> -> vector<3x256xf32>
    %c0_119 = arith.constant 0 : index
    %c0_120 = arith.constant 0 : index
    %216 = vector.load %arg11[%c0_119, %c0_120] : memref<3x1xf32, #tpu.memory_space<vmem>>, vector<3x1xf32>
    %217 = vector.broadcast %216 : vector<3x1xf32> to vector<3x256xf32>
    %218 = arith.addf %215, %217 : vector<3x256xf32>
    %c0_121 = arith.constant 0 : index
    %c768_122 = arith.constant 768 : index
    %219 = vector.load %arg12[%c0_121, %c768_122] : memref<3x1024xf32, #tpu.memory_space<vmem>>, vector<3x256xf32>
    tpu.vector_store %arg12[%c0_121, %c768_122], %218 {strides = array<i32>} : memref<3x1024xf32, #tpu.memory_space<vmem>>, vector<3x256xf32>,
    return
  }
  func.func @transform_0(%arg0: i32) -> (i32, i32) {
    %c0_i32 = arith.constant 0 : i32
    %c0_i32_0 = arith.constant 0 : i32
    return %c0_i32, %arg0 : i32, i32
  }
  func.func @transform_1(%arg0: i32) -> (i32, i32) {
    %c0_i32 = arith.constant 0 : i32
    %c0_i32_0 = arith.constant 0 : i32
    %c0_i32_1 = arith.constant 0 : i32
    return %c0_i32, %c0_i32_0 : i32, i32
  }
  func.func @transform_2(%arg0: i32) -> (i32, i32) {
    %c0_i32 = arith.constant 0 : i32
    %c0_i32_0 = arith.constant 0 : i32
    %c0_i32_1 = arith.constant 0 : i32
    return %c0_i32, %c0_i32_0 : i32, i32
  }
  func.func @transform_3(%arg0: i32) -> (i32, i32) {
    %c0_i32 = arith.constant 0 : i32
    %c0_i32_0 = arith.constant 0 : i32
    %c0_i32_1 = arith.constant 0 : i32
    return %c0_i32, %c0_i32_0 : i32, i32
  }
  func.func @transform_4(%arg0: i32) -> (i32, i32) {
    %c0_i32 = arith.constant 0 : i32
    %c0_i32_0 = arith.constant 0 : i32
    %c0_i32_1 = arith.constant 0 : i32
    return %c0_i32, %c0_i32_0 : i32, i32
  }
  func.func @transform_5(%arg0: i32) -> (i32, i32) {
    %c0_i32 = arith.constant 0 : i32
    %c0_i32_0 = arith.constant 0 : i32
    %c0_i32_1 = arith.constant 0 : i32
    return %c0_i32, %c0_i32_0 : i32, i32
  }
  func.func @transform_6(%arg0: i32) -> (i32, i32) {
    %c0_i32 = arith.constant 0 : i32
    %c0_i32_0 = arith.constant 0 : i32
    %c0_i32_1 = arith.constant 0 : i32
    return %c0_i32, %c0_i32_0 : i32, i32
  }
  func.func @transform_7(%arg0: i32) -> (i32, i32) {
    %c0_i32 = arith.constant 0 : i32
    %c0_i32_0 = arith.constant 0 : i32
    %c0_i32_1 = arith.constant 0 : i32
    return %c0_i32, %c0_i32_0 : i32, i32
  }
  func.func @transform_8(%arg0: i32) -> (i32, i32) {
    %c0_i32 = arith.constant 0 : i32
    %c0_i32_0 = arith.constant 0 : i32
    %c0_i32_1 = arith.constant 0 : i32
    return %c0_i32, %c0_i32_0 : i32, i32
  }
  func.func @transform_9(%arg0: i32) -> (i32, i32) {
    %c0_i32 = arith.constant 0 : i32
    %c0_i32_0 = arith.constant 0 : i32
    %c0_i32_1 = arith.constant 0 : i32
    return %c0_i32, %c0_i32_0 : i32, i32
  }
  func.func @transform_10(%arg0: i32) -> (i32, i32) {
    %c0_i32 = arith.constant 0 : i32
    %c0_i32_0 = arith.constant 0 : i32
    %c0_i32_1 = arith.constant 0 : i32
    return %c0_i32, %c0_i32_0 : i32, i32
  }
  func.func @transform_11(%arg0: i32) -> (i32, i32) {
    %c0_i32 = arith.constant 0 : i32
    %c0_i32_0 = arith.constant 0 : i32
    return %c0_i32, %arg0 : i32, i32
  }
}

</mosaic_0001>

<bundles_post_ra>
// kernel: cfdpinn_forward.1
= control target key start
LH: loop header
LB: loop body
LE: loop exit
PB: predicated region body
PF: predicated region fallthrough
CT: control target
= control target key end

     0   :  { %s6883_s0 = inlined_call_operand.vmem [shape: f32[3,2048], index: 0, kind: input, shape index: {}]   ;;  %s6884_s1 = inlined_call_operand.vmem [shape: f32[64,3], index: 1, kind: input, shape index: {}]   ;;  %s6885_s2 = inlined_call_operand.vmem [shape: f32[64,1], index: 2, kind: input, shape index: {}]   ;;  %s6886_s3 = inlined_call_operand.vmem [shape: bf16[64,64], index: 3, kind: input, shape index: {}]   ;;  %s6887_s4 = inlined_call_operand.vmem [shape: f32[64,1], index: 4, kind: input, shape index: {}]   ;;  %s6888_s5 = inlined_call_operand.vmem [shape: bf16[64,64], index: 5, kind: input, shape index: {}]   ;;  %s6889_s6 = inlined_call_operand.vmem [shape: f32[64,1], index: 6, kind: input, shape index: {}]   ;;  %s6890_s7 = inlined_call_operand.vmem [shape: bf16[64,64], index: 7, kind: input, shape index: {}]   ;;  %s6891_s8 = inlined_call_operand.vmem [shape: f32[64,1], index: 8, kind: input, shape index: {}]   ;;  %s6892_s9 = inlined_call_operand.vmem [shape: bf16[3,64], index: 9, kind: input, shape index: {}]   ;;  %s6893_s10 = inlined_call_operand.vmem [shape: f32[3,1], index: 10, kind: input, shape index: {}]   ;;  %s6894_s11 = inlined_call_operand.hbm [shape: f32[3,2048], index: 11, kind: output, shape index: {}]  }
   0x1   :  { %7029 = sst [smem:[#allocation89_spill]] %s6883_s0 }
   0x2   :  { %16 = vsyncpa [#allocation3], 0 }
   0x3   :  { %18 = vsyncpa [#allocation3 + $0x1], 0  ;;  %s4654_s17 = smov 0   ;;  %s4656_s18 = smov 0  }
   0x4   :  { %s4658_s19 = smov 0   ;;  %s4660_s20 = smov 0  }
   0x5 LB: > { %s4675_s21 = sadd.s32 4294967295, %s4588_s20   ;;  %s4252_s22 = sadd.s32 4294967294, %s4588_s20   ;;  %s4588_s20 = sphi %s4660_s20, %s7313_s20   ;;  %s4584_s19 = sphi %s4658_s19, %s7312_s19   ;;  %s4580_s18 = sphi %s4656_s18, %s7311_s18   ;;  %s4576_s17 = sphi %s4654_s17, %s7310_s17  }
   0x6   : > { %s4679_s23 = sadd.s32 1, %s4588_s20   ;;  %s267_s24 = sadd.s32 1, %s4584_s19 }
   0x7   : > { %s264_s25 = ssub.s32 %s4588_s20, %s4679_s23  ;;  %p277_p0 = scmp.ne.s32.totalorder %s4584_s19, %s4580_s18 }
   0x8   : > { %p265_p1 = scmp.eq.s32.totalorder %s264_s25, 0  ;;  %p278_p2 = scmp.eq.s32.totalorder %s4675_s21, 1 }
   0x9   : > { %p283_p3 = scmp.ne.s32.totalorder %s4580_s18, %s4576_s17  ;;  %p284_p4 = scmp.eq.s32.totalorder %s4252_s22, 1 }
   0xa   : > { %s4690_s26 = scalar_select %p265_p1, %s4584_s19, %s267_s24  }
   0xb   : > { %p4692_p5 = por %p278_p2, %p277_p0  ;;  %p4696_p6 = por %p284_p4, %p283_p3 }
   0xc   : > { %p4255_p7 = scmp.ge.s32.totalorder %s4588_s20, 1  ;;  %p341_p8 = scmp.lt.s32.totalorder %s4588_s20, 3 }
   0xe   : > { %p342_p9 = pnand %p4255_p7, %p341_p8 }
  0x10   : > { %345 = sbr.rel (%p342_p9) target bundleno = 3444 (0xd74), region = 64 }
  0x15   : > { %v4705_v0 = vld [vmem:[%s6884_s1 + $0x30] sm:$0xff]  ;;  %v6895_v1 = vmov 2   ;;  %v6897_v2 = vmov 1   ;;  %v4714_v3 = vld [vmem:[%s6884_s1 + $0x38] sm:$0xff]  ;;  %v4719_v4 = vld [vmem:[%s6884_s1 + $0x20] sm:$0xff]  ;;  %v6901_v5 = vmov 0   ;;  %v439_v45 = vlaneseq }
  0x16   : > { %4408 = vset.pattern.permute.xlu0 %v6895_v1  ;;  %4407 = vset.pattern.permute.xlu1 %v6897_v2  ;;  %v4728_v6 = vld [vmem:[%s6884_s1 + $0x18] sm:$0xff]  ;;  %v4736_v7 = vld [vmem:[%s6884_s1 + $0x10] sm:$0xff]  ;;  %v4742_v8 = vld [vmem:[%s6884_s1 + $0x8] sm:$0xff]  ;;  %s4257_s12 = sshll.u32 %s4675_s21, 3  ;;  %s7032_s0 = sld [smem:[#allocation89_spill]]  ;;  %vm801_vm0 = vcmask 523264  }
  0x17   : > { %580 = vperm.xlu0 %4408, %v4705_v0   ;;  %498 = vperm.xlu1 %4407, %v4705_v0   ;;  %v4753_v9 = vld [vmem:[%s6884_s1 + $0x28] sm:$0xff]  ;;  %v4764_v10 = vld [vmem:[%s6885_s2 + $0x30] sm:$0xff]  ;;  %v4769_v11 = vld [vmem:[%s6885_s2 + $0x38] sm:$0xff]  ;;  %p382_p10 = scmp.lt.s32.totalorder %s4257_s12, 15  ;;  %v440_v48 = vshrl.u32 %v439_v45, 7  ;;  %s4364_s13 = sshll.u32 %s4675_s21, 9 }
  0x18   : > { %846 = vmatprep.mubr.bf16.mxu0 %v6901_v5  ;;  %1031 = vmatprep.mubr.bf16.mxu1 %v6901_v5  ;;  %v390_v12 = vld [vmem:[%s6884_s1] sm:$0xff]  ;;  %v639_v13 = vld [vmem:[%s6885_s2 + $0x10] sm:$0xff]  ;;  %v638_v14 = vld [vmem:[%s6885_s2 + $0x8] sm:$0xff]  ;;  %s4593_s21 = smov [#allocation2]  }
  0x19   : > { %v740_v15 = vld [vmem:[%s6887_s4 + $0x38] sm:$0xff]  ;;  %v738_v16 = vld [vmem:[%s6887_s4 + $0x28] sm:$0xff]  ;;  %v4799_v17 = vld [vmem:[%s6885_s2 + $0x20] sm:$0xff]  ;;  %s7315_s12 = smov (!%p382_p10, %s4257_s12), 15  ;;  %v4905_v50 = vsub.s32 0, %v440_v48  ;;  %v4907_v51 = vsub.s32 1, %v440_v48 }
  0x1a   : > { %v736_v18 = vld [vmem:[%s6887_s4 + $0x18] sm:$0xff]  ;;  %v4809_v19 = vld [vmem:[%s6885_s2 + $0x28] sm:$0xff]  ;;  %v637_v26 = vld [vmem:[%s6885_s2] sm:$0xff]  ;;  %s4258_s22 = sshll.u32 %s7315_s12, 2  ;;  %v4909_v52 = vsub.s32 5, %v440_v48  ;;  %v4911_v53 = vsub.s32 4, %v440_v48 }
  0x1b   : > { %502 = vperm.xlu1 %4407, %v4714_v3   ;;  %572 = vperm.xlu0 %4408, %v4719_v4   ;;  %v734_v20 = vld [vmem:[%s6887_s4 + $0x8] sm:$0xff]  ;;  %v926_v21 = vld [vmem:[%s6889_s6 + $0x38] sm:$0xff]  ;;  %v739_v27 = vld [vmem:[%s6887_s4 + $0x30] sm:$0xff]  ;;  %7033 = vst [vmem:[#allocation5_spill] sm:$0xff] %v4905_v50  ;;  %v4917_v56 = vsub.s32 2, %v440_v48  ;;  %v4919_v57 = vsub.s32 6, %v440_v48 }
  0x1c   : > { %v924_v22 = vld [vmem:[%s6889_s6 + $0x28] sm:$0xff]  ;;  %v922_v23 = vld [vmem:[%s6889_s6 + $0x18] sm:$0xff]  ;;  %v737_v28 = vld [vmem:[%s6887_s4 + $0x20] sm:$0xff]  ;;  %s4900_s29 = scalar_lea.vmem %s7032_s0, %s4258_s22  ;;  %7034 = vst [vmem:[#allocation6_spill] sm:$0xff] %v4907_v51  ;;  %s378_s22 = sand.u32 1, %s4580_s18  }
  0x1d   : > { %v920_v24 = vld [vmem:[%s6889_s6 + $0x8] sm:$0xff]  ;;  %v640_v25 = vld [vmem:[%s6885_s2 + $0x18] sm:$0xff]  ;;  %v735_v29 = vld [vmem:[%s6887_s4 + $0x10] sm:$0xff]  ;;  %7035 = vst [vmem:[#allocation7_spill] sm:$0xff] %v4909_v52  ;;  %s4256_s24 = sshll.u32 %s378_s22, 5  ;;  %s4179_s30 = scalar_lea.sflag [#allocation3], %s378_s22 }
  0x1e   : > { %v733_v30 = vld [vmem:[%s6887_s4] sm:$0xff]  ;;  %v925_v31 = vld [vmem:[%s6889_s6 + $0x30] sm:$0xff]  ;;  %v1111_v32 = vld [vmem:[%s6891_s8 + $0x38] sm:$0xff]  ;;  %7036 = vst [vmem:[#allocation8_spill] sm:$0xff] %v4911_v53  ;;  %s5952_s25 = scalar_lea.vmem [#allocation2], %s4256_s24  ;;  %s6845_s24 = scalar_lea.hbm %s6894_s11, %s4364_s13 }
  0x1f   : > { %4409 = vset.pattern.permute.xlu1 %v6895_v1  ;;  %568 = vperm.xlu0 %4408, %v4728_v6   ;;  %v923_v33 = vld [vmem:[%s6889_s6 + $0x20] sm:$0xff]  ;;  %v1109_v34 = vld [vmem:[%s6891_s8 + $0x28] sm:$0xff]  ;;  %v921_v35 = vld [vmem:[%s6889_s6 + $0x10] sm:$0xff]  ;;  %7037 = vst [vmem:[#allocation9_spill] sm:$0xff] %v4917_v56  ;;  %s4193_s14 = sshll.u32 %s5952_s25, 4  ;;  %s4532_s12 = sshll.u32 %s4593_s21, 4  ;;  %s4194_s14 = int_to_ptr.vmem [resolvable:$true] %s4193_s14  ;;  %s4533_s12 = int_to_ptr.vmem [resolvable:$false] %s4532_s12 }
  0x20   : > { %584 = vperm.xlu1 %4409, %v4714_v3   ;;  %v1107_v36 = vld [vmem:[%s6891_s8 + $0x18] sm:$0xff]  ;;  %v919_v37 = vld [vmem:[%s6889_s6] sm:$0xff]  ;;  %v1110_v38 = vld [vmem:[%s6891_s8 + $0x30] sm:$0xff]  ;;  %7038 = vst [vmem:[#allocation10_spill] sm:$0xff] %v4919_v57  ;;  %s4534_s0 = scalar_lea.vmem %s4533_s12, 1024  ;;  %p4535_p0 = scmp.lt.s32.totalorder %s4194_s14, %s4533_s12 }
  0x21   : > { %v1108_v41 = vld [vmem:[%s6891_s8 + $0x20] sm:$0xff]  ;;  %v1106_v44 = vld [vmem:[%s6891_s8 + $0x10] sm:$0xff] }
  0x22   : > { %v389_v55 = vld [vmem:[%s4900_s29] sm:$0x77] }
  0x23   : > { %4416 = vset.pattern.permute.xlu0 %v6897_v2  ;;  %v508_v59 = vrot.slane %v389_v55, %v4907_v51  ;;  %v512_v60 = vrot.slane %v389_v55, %v4909_v52  ;;  %v442_v61 = vrot.slane %v389_v55, %v4905_v50  ;;  %v446_v62 = vrot.slane %v389_v55, %v4911_v53 }
  0x24   : > { %4410 = vset.pattern.permute.xlu1 %v6901_v5  ;;  %482 = vperm.xlu0 %4416, %v4736_v7  }
  0x25   : > { %420 = vperm.xlu1 %4410, %v4719_v4  }
  0x28   : > { %478 = vperm.xlu0 %4416, %v4742_v8  }
  0x29   : > { %4411 = vset.pattern.permute.xlu1 %v6897_v2 }
  0x2a   : > { %490 = vperm.xlu1 %4411, %v4719_v4  }
  0x2c   : > { %4419 = vset.pattern.permute.xlu0 %v6901_v5 }
  0x2d   : > { %430 = vperm.xlu0 %4419, %v4705_v0  }
  0x2e   : > { %494 = vperm.xlu1 %4411, %v4753_v9  }
  0x31   : > { %435 = vperm.xlu0 %4419, %v4714_v3  }
  0x32   : > { %4412 = vset.pattern.permute.xlu1 %v6895_v1 }
  0x33   : > { %576 = vperm.xlu1 %4412, %v4753_v9  }
  0x35   : > { %425 = vperm.xlu0 %4419, %v4753_v9  }
  0x37   : > { %4413 = vset.pattern.permute.xlu1 %v6901_v5 }
  0x38   : > { %677 = vperm.xlu1 %4413, %v4764_v10  }
  0x39   : > { %682 = vperm.xlu0 %4419, %v4769_v11  }
  0x3c   : > { %410 = vperm.xlu1 %4413, %v4736_v7  }
  0x3d   : > { %400 = vperm.xlu0 %4419, %v390_v12  }
  0x40   : > { %415 = vperm.xlu1 %4413, %v4728_v6  }
  0x41   : > { %657 = vperm.xlu0 %4419, %v639_v13   ;;  %v4939_v13 = vrot.slane %v508_v59, %v4907_v51 }
  0x44   : > { %4414 = vset.pattern.permute.xlu1 %v6897_v2 }
  0x45   : > { %486 = vperm.xlu1 %4414, %v4728_v6   ;;  %652 = vperm.xlu0 %4419, %v638_v14   ;;  %v4942_v14 = vrot.slane %v512_v60, %v4907_v51 }
  0x49   : > { %4415 = vset.pattern.permute.xlu1 %v6895_v1  ;;  %778 = vperm.xlu0 %4419, %v740_v15   ;;  %v4945_v15 = vrot.slane %v442_v61, %v4905_v50 }
  0x4a   : > { %564 = vperm.xlu1 %4415, %v4736_v7  }
  0x4d   : > { %768 = vperm.xlu0 %4419, %v738_v16   ;;  %v4948_v16 = vrot.slane %v446_v62, %v4905_v50 }
  0x4e   : > { %4417 = vset.pattern.permute.xlu1 %v6901_v5 }
  0x4f   : > { %667 = vperm.xlu1 %4417, %v4799_v17  }
  0x51   : > { %758 = vperm.xlu0 %4419, %v736_v18  }
  0x53   : > { %672 = vperm.xlu1 %4417, %v4809_v19  }
  0x55   : > { %748 = vperm.xlu0 %4419, %v734_v20  }
  0x57   : > { %405 = vperm.xlu1 %4417, %v4742_v8  }
  0x59   : > { %964 = vperm.xlu0 %4419, %v926_v21   ;;  %v4956_v21 = vld [vmem:[%s6891_s8 + $0x8] sm:$0xff] }
  0x5b   : > { %4418 = vset.pattern.permute.xlu1 %v6897_v2 }
  0x5c   : > { %474 = vperm.xlu1 %4418, %v390_v12  }
  0x5d   : > { %954 = vperm.xlu0 %4419, %v924_v22  }
  0x60   : > { %4420 = vset.pattern.permute.xlu1 %v6895_v1 }
  0x61   : > { %944 = vperm.xlu0 %4419, %v922_v23   ;;  %556 = vperm.xlu1 %4420, %v390_v12   ;;  %v590_v12 = vrot.slane %v389_v55, %v4917_v56 }
  0x65   : > { %934 = vperm.xlu0 %4419, %v920_v24   ;;  %560 = vperm.xlu1 %4420, %v4742_v8  }
  0x69   : > { %4421 = vset.pattern.permute.xlu1 %v6901_v5  ;;  %4424 = vset.pattern.permute.xlu0 %v6895_v1 }
  0x6a   : > { %662 = vperm.xlu1 %4421, %v640_v25   ;;  %1528 = vperm.xlu0 %4424, %v4705_v0  }
  0x6e   : > { %647 = vperm.xlu1 %4421, %v637_v26   ;;  %1520 = vperm.xlu0 %4424, %v4719_v4   ;;  %v4963_v26 = vrot.slane %v590_v12, %v4917_v56 }
  0x72   : > { %773 = vperm.xlu1 %4421, %v739_v27   ;;  %1516 = vperm.xlu0 %4424, %v4728_v6  }
  0x76   : > { %763 = vperm.xlu1 %4421, %v737_v28   ;;  %4432 = vset.pattern.permute.xlu0 %v6897_v2 }
  0x77   : > { %1450 = vperm.xlu0 %4432, %v4714_v3  }
  0x7a   : > { %753 = vperm.xlu1 %4421, %v735_v29  }
  0x7b   : > { %1430 = vperm.xlu0 %4432, %v4736_v7  }
  0x7e   : > { %743 = vperm.xlu1 %4421, %v733_v30  }
  0x7f   : > { %1426 = vperm.xlu0 %4432, %v4742_v8  }
  0x82   : > { %959 = vperm.xlu1 %4421, %v925_v31  }
  0x83   : > { %4435 = vset.pattern.permute.xlu0 %v6901_v5 }
  0x84   : > { %1149 = vperm.xlu0 %4435, %v1111_v32  }
  0x86   : > { %949 = vperm.xlu1 %4421, %v923_v33  }
  0x88   : > { %1139 = vperm.xlu0 %4435, %v1109_v34  }
  0x8a   : > { %939 = vperm.xlu1 %4421, %v921_v35  }
  0x8c   : > { %1129 = vperm.xlu0 %4435, %v1107_v36  }
  0x8e   : > { %929 = vperm.xlu1 %4421, %v919_v37  }
  0x90   : > { %1383 = vperm.xlu0 %4435, %v4714_v3  }
  0x92   : > { %v499_v39 = vpop.permute.xlu1 %498  ;;  %1144 = vperm.xlu1 %4421, %v1110_v38   ;;  %v581_v40 = vpop.permute.xlu0 %580 }
  0x93   : > { %v535_v24 = vmul.f32 %v4939_v13, %v499_v39  ;;  %v536_v25 = vmul.f32 %v4942_v14, %v499_v39  ;;  %v617_v33 = vmul.f32 %v4963_v26, %v581_v40 }
  0x94   : > { %1373 = vperm.xlu0 %4435, %v4753_v9  }
  0x96   : > { %v503_v42 = vpop.permute.xlu1 %502  ;;  %1134 = vperm.xlu1 %4421, %v1108_v41   ;;  %v4889_v43 = vpop.permute.xlu0 %572 }
  0x97   : > { %v537_v29 = vmul.f32 %v4939_v13, %v503_v42  ;;  %v538_v30 = vmul.f32 %v4942_v14, %v503_v42 }
  0x98   : > { %1630 = vperm.xlu0 %4435, %v4769_v11   ;;  %v4933_v11 = vld [vmem:[%s6891_s8] sm:$0xff] }
  0x9a   : > { %1124 = vperm.xlu1 %4421, %v1106_v44   ;;  %v4895_v46 = vpop.permute.xlu0 %568 }
  0x9b   : > { %v585_v47 = vpop.permute.xlu1 %584 }
  0x9c   : > { %v619_v44 = vmul.f32 %v4963_v26, %v585_v47 }
  0x9e   : > { %1378 = vperm.xlu1 %4421, %v4705_v0  }
  0x9f   : > { %v4903_v49 = vpop.permute.xlu0 %482 }
  0xa0   : > { %v4913_v54 = vpop.permute.xlu1 %420 }
  0xa2   : > { %4422 = vset.pattern.permute.xlu1 %v6897_v2 }
  0xa3   : > { %1446 = vperm.xlu1 %4422, %v4705_v0   ;;  %v4922_v58 = vpop.permute.xlu0 %478  ;;  %v594_v0 = vrot.slane %v389_v55, %v4919_v57 }
  0xa5   : > { %v4928_v63 = vpop.permute.xlu1 %490  ;;  %v4966_v27 = vrot.slane %v594_v0, %v4917_v56 }
  0xa7   : > { %4423 = vset.pattern.permute.xlu1 %v6901_v5  ;;  %v618_v34 = vmul.f32 %v4966_v27, %v581_v40  ;;  %v620_v42 = vmul.f32 %v4966_v27, %v585_v47 }
  0xa8   : > { %v431_v18 = vpop.permute.xlu0 %430  ;;  %1114 = vperm.xlu1 %4423, %v4933_v11  }
  0xa9   : > { %v4951_v20 = vpop.permute.xlu1 %494  ;;  %v469_v22 = vmul.f32 %v4945_v15, %v431_v18  ;;  %v470_v23 = vmul.f32 %v4948_v16, %v431_v18 }
  0xab   : > { %v551_v35 = vadd.f32 %v535_v24, %v469_v22  ;;  %v552_v36 = vadd.f32 %v536_v25, %v470_v23 }
  0xac   : > { %v436_v28 = vpop.permute.xlu0 %435  ;;  %1119 = vperm.xlu1 %4423, %v4956_v21  }
  0xad   : > { %v471_v31 = vmul.f32 %v4945_v15, %v436_v28  ;;  %v472_v32 = vmul.f32 %v4948_v16, %v436_v28  ;;  %v633_v45 = vadd.f32 %v617_v33, %v551_v35  ;;  %v634_v48 = vadd.f32 %v618_v34, %v552_v36 }
  0xae   : > { %v577_v37 = vpop.permute.xlu1 %576  ;;  %v613_v36 = vmul.f32 %v4963_v26, %v4889_v43 }
  0xaf   : > { %v553_v38 = vadd.f32 %v537_v29, %v471_v31  ;;  %v554_v39 = vadd.f32 %v538_v30, %v472_v32  ;;  %v531_v30 = vmul.f32 %v4939_v13, %v4928_v63  ;;  %v532_v31 = vmul.f32 %v4942_v14, %v4928_v63 }
  0xb0   : > { %v426_v41 = vpop.permute.xlu0 %425  ;;  %4425 = vset.pattern.permute.xlu1 %v6895_v1  ;;  %v465_v32 = vmul.f32 %v4945_v15, %v4913_v54  ;;  %v614_v63 = vmul.f32 %v4966_v27, %v4889_v43 }
  0xb1   : > { %1532 = vperm.xlu1 %4425, %v4714_v3   ;;  %v635_v59 = vadd.f32 %v619_v44, %v553_v38  ;;  %v636_v60 = vadd.f32 %v620_v42, %v554_v39  ;;  %v467_v33 = vmul.f32 %v4945_v15, %v426_v41  ;;  %v468_v34 = vmul.f32 %v4948_v16, %v426_v41 }
  0xb2   : > { %v547_v38 = vadd.f32 %v531_v30, %v465_v32  ;;  %v534_v44 = vmul.f32 %v4942_v14, %v4951_v20  ;;  %v528_v30 = vmul.f32 %v4942_v14, %v4903_v49 }
  0xb3   : > { %v678_v55 = vpop.permute.xlu1 %677 }
  0xb4   : > { %v697_v40 = vadd.f32 %v678_v55, %v633_v45  ;;  %v683_v61 = vpop.permute.xlu0 %682  ;;  %v698_v62 = vadd.f32 %v678_v55, %v634_v48  ;;  %v550_v42 = vadd.f32 %v534_v44, %v468_v34  ;;  %v615_v45 = vmul.f32 %v4963_v26, %v577_v37 }
  0xb5   : > { %v699_v12 = vadd.f32 %v683_v61, %v635_v59  ;;  %4426 = vset.pattern.permute.xlu1 %v6901_v5  ;;  %v700_v0 = vadd.f32 %v683_v61, %v636_v60  ;;  %v616_v48 = vmul.f32 %v4966_v27, %v577_v37  ;;  %v629_v43 = vadd.f32 %v613_v36, %v547_v38 }
  0xb6   : > { %1368 = vperm.xlu1 %4426, %v4719_v4   ;;  %v714_v18 = vmax.f32 %v698_v62, 0.0  ;;  %v713_v22 = vmax.f32 %v697_v40, 0.0 }
  0xb7   : > { %v411_v23 = vpop.permute.xlu1 %410  ;;  %v716_v47 = vmax.f32 %v700_v0, 0.0  ;;  %v715_v24 = vmax.f32 %v699_v12, 0.0  ;;  %v632_v61 = vadd.f32 %v616_v48, %v550_v42  ;;  %v525_v42 = vmul.f32 %v4939_v13, %v4922_v58 }
  0xb8   : > { %v462_v32 = vmul.f32 %v4948_v16, %v411_v23 }
  0xb9   : > { %v732_v3 = vpack.c.bf16 %v716_v47, %v714_v18  ;;  %v731_v25 = vpack.c.bf16 %v715_v24, %v713_v22 }
  0xba   : > { %4427 = vset.pattern.permute.xlu1 %v6897_v2 }
  0xbb   : > { %v4982_v28 = vpop.permute.xlu1 %415  ;;  %1438 = vperm.xlu1 %4427, %v4719_v4   ;;  %822 = vmatprep.subr.bf16.mxu0 %v732_v3  ;;  %v466_v4 = vmul.f32 %v4948_v16, %v4913_v54 }
  0xbc   : > { %823 = vmatpush1.bf16.msra.mxu0 %v731_v25  ;;  %v527_v25 = vmul.f32 %v4939_v13, %v4903_v49  ;;  %v544_v49 = vadd.f32 %v528_v30, %v462_v32 }
  0xbd   : > { %v548_v39 = vadd.f32 %v532_v31, %v466_v4  ;;  %v461_v31 = vmul.f32 %v4945_v15, %v411_v23  ;;  %v401_v4 = vpop.permute.xlu0 %400  ;;  %v464_v23 = vmul.f32 %v4948_v16, %v4982_v28 }
  0xbf   : > { %1442 = vperm.xlu1 %4427, %v4753_v9   ;;  %v630_v55 = vadd.f32 %v614_v63, %v548_v39  ;;  %v543_v38 = vadd.f32 %v527_v25, %v461_v31  ;;  %v463_v39 = vmul.f32 %v4945_v15, %v4982_v28  ;;  %v526_v28 = vmul.f32 %v4942_v14, %v4922_v58 }
  0xc0   : > { %v487_v29 = vpop.permute.xlu1 %486 }
  0xc1   : > { %v530_v36 = vmul.f32 %v4942_v14, %v487_v29 }
  0xc3   : > { %4428 = vset.pattern.permute.xlu1 %v6895_v1 }
  0xc4   : > { %1524 = vperm.xlu1 %4428, %v4753_v9   ;;  %v533_v9 = vmul.f32 %v4939_v13, %v4951_v20 }
  0xc5   : > { %v565_v35 = vpop.permute.xlu1 %564 }
  0xc6   : > { %v549_v54 = vadd.f32 %v533_v9, %v467_v33  ;;  %v609_v33 = vmul.f32 %v4963_v26, %v565_v35  ;;  %v610_v34 = vmul.f32 %v4966_v27, %v565_v35  ;;  %v612_v35 = vmul.f32 %v4966_v27, %v4895_v46 }
  0xc8   : > { %4429 = vset.pattern.permute.xlu1 %v6901_v5  ;;  %v631_v40 = vadd.f32 %v615_v45, %v549_v54  ;;  %v626_v54 = vadd.f32 %v610_v34, %v544_v49  ;;  %v546_v45 = vadd.f32 %v530_v36, %v464_v23 }
  0xc9   : > { %1625 = vperm.xlu1 %4429, %v4764_v10  }
  0xca   : > { %v668_v41 = vpop.permute.xlu1 %667 }
  0xcb   : > { %v693_v59 = vadd.f32 %v668_v41, %v629_v43  ;;  %v694_v60 = vadd.f32 %v668_v41, %v630_v55  ;;  %v658_v43 = vpop.permute.xlu0 %657 }
  0xcd   : > { %1358 = vperm.xlu1 %4429, %v4736_v7   ;;  %v709_v0 = vmax.f32 %v693_v59, 0.0  ;;  %v710_v18 = vmax.f32 %v694_v60, 0.0 }
  0xce   : > { %v673_v20 = vpop.permute.xlu1 %672 }
  0xcf   : > { %v695_v62 = vadd.f32 %v673_v20, %v631_v40  ;;  %v696_v12 = vadd.f32 %v673_v20, %v632_v61  ;;  %v457_v40 = vmul.f32 %v4945_v15, %v401_v4  ;;  %v458_v61 = vmul.f32 %v4948_v16, %v401_v4 }
  0xd1   : > { %v711_v22 = vmax.f32 %v695_v62, 0.0  ;;  %v712_v10 = vmax.f32 %v696_v12, 0.0  ;;  %1363 = vperm.xlu1 %4429, %v4728_v6  }
  0xd2   : > { %v406_v47 = vpop.permute.xlu1 %405 }
  0xd3   : > { %v730_v24 = vpack.c.bf16 %v712_v10, %v710_v18  ;;  %v729_v37 = vpack.c.bf16 %v711_v22, %v709_v0  ;;  %v459_v9 = vmul.f32 %v4945_v15, %v406_v47  ;;  %v460_v44 = vmul.f32 %v4948_v16, %v406_v47  ;;  %v653_v16 = vpop.permute.xlu0 %652 }
  0xd5   : > { %824 = vmatprep.subr.bf16.mxu0 %v730_v24  ;;  %4430 = vset.pattern.permute.xlu1 %v6897_v2  ;;  %v541_v20 = vadd.f32 %v525_v42, %v459_v9  ;;  %v542_v58 = vadd.f32 %v526_v28, %v460_v44  ;;  %v4471_v44 = vld [vmem:[%s6886_s3 + $0x8] sm:$0xff]  }
  0xd6   : > { %825 = vmatpush1.bf16.msra.mxu0 %v729_v37  ;;  %1434 = vperm.xlu1 %4430, %v4728_v6   ;;  %v529_v6 = vmul.f32 %v4939_v13, %v487_v29  ;;  %v625_v29 = vadd.f32 %v609_v33, %v543_v38 }
  0xd7   : > { %v475_v3 = vpop.permute.xlu1 %474 }
  0xd8   : > { %v545_v41 = vadd.f32 %v529_v6, %v463_v39  ;;  %v523_v55 = vmul.f32 %v4939_v13, %v475_v3  ;;  %v689_v0 = vadd.f32 %v658_v43, %v625_v29 }
  0xda   : > { %4431 = vset.pattern.permute.xlu1 %v6895_v1  ;;  %v539_v10 = vadd.f32 %v523_v55, %v457_v40 }
  0xdb   : > { %1512 = vperm.xlu1 %4431, %v4736_v7   ;;  %v611_v7 = vmul.f32 %v4963_v26, %v4895_v46  ;;  %v524_v46 = vmul.f32 %v4942_v14, %v475_v3  ;;  %v628_v14 = vadd.f32 %v612_v35, %v546_v45  ;;  %v4473_v35 = vld [vmem:[%s6886_s3 + $0x18] sm:$0xff]  }
  0xdc   : > { %v557_v63 = vpop.permute.xlu1 %556 }
  0xdd   : > { %v605_v62 = vmul.f32 %v4963_v26, %v557_v63  ;;  %v606_v12 = vmul.f32 %v4966_v27, %v557_v63  ;;  %v627_v22 = vadd.f32 %v611_v7, %v545_v41  ;;  %v540_v47 = vadd.f32 %v524_v46, %v458_v61  ;;  %v4472_v7 = vld [vmem:[%s6886_s3 + $0x10] sm:$0xff]   ;;  %v779_v46 = vpop.permute.xlu0 %778 }
  0xdf   : > { %4433 = vset.pattern.permute.xlu1 %v6901_v5  ;;  %v621_v3 = vadd.f32 %v605_v62, %v539_v10  ;;  %v622_v25 = vadd.f32 %v606_v12, %v540_v47 }
  0xe0   : > { %v561_v48 = vpop.permute.xlu1 %560  ;;  %1615 = vperm.xlu1 %4433, %v4799_v17   ;;  %v690_v17 = vadd.f32 %v658_v43, %v626_v54 }
  0xe1   : > { %v607_v59 = vmul.f32 %v4963_v26, %v561_v48  ;;  %v608_v60 = vmul.f32 %v4966_v27, %v561_v48  ;;  %v705_v26 = vmax.f32 %v689_v0, 0.0 }
  0xe2   : > { %v706_v30 = vmax.f32 %v690_v17, 0.0 }
  0xe3   : > { %v623_v18 = vadd.f32 %v607_v59, %v541_v20  ;;  %v624_v13 = vadd.f32 %v608_v60, %v542_v58  ;;  %v769_v20 = vpop.permute.xlu0 %768 }
  0xe4   : > { %1620 = vperm.xlu1 %4433, %v4809_v19  }
  0xe5   : > { %v663_v24 = vpop.permute.xlu1 %662  ;;  %v688_v32 = vadd.f32 %v653_v16, %v624_v13  ;;  %v687_v4 = vadd.f32 %v653_v16, %v623_v18 }
  0xe6   : > { %v691_v15 = vadd.f32 %v663_v24, %v627_v22  ;;  %v692_v37 = vadd.f32 %v663_v24, %v628_v14 }
  0xe7   : > { %v704_v49 = vmax.f32 %v688_v32, 0.0  ;;  %v703_v39 = vmax.f32 %v687_v4, 0.0  ;;  %v759_v22 = vpop.permute.xlu0 %758 }
  0xe8   : > { %v707_v31 = vmax.f32 %v691_v15, 0.0  ;;  %v708_v27 = vmax.f32 %v692_v37, 0.0  ;;  %1353 = vperm.xlu1 %4433, %v4742_v8   ;;  %v4470_v8 = vld [vmem:[%s6886_s3] sm:$0xff]  }
  0xe9   : > { %v648_v33 = vpop.permute.xlu1 %647 }
  0xea   : > { %v685_v34 = vadd.f32 %v648_v33, %v621_v3  ;;  %v686_v6 = vadd.f32 %v648_v33, %v622_v25  ;;  %v728_v19 = vpack.c.bf16 %v708_v27, %v706_v30  ;;  %v727_v36 = vpack.c.bf16 %v707_v31, %v705_v26 }
  0xec   : > { %v701_v63 = vmax.f32 %v685_v34, 0.0  ;;  %v702_v38 = vmax.f32 %v686_v6, 0.0  ;;  %826 = vmatprep.subr.bf16.mxu0 %v728_v19  ;;  %4434 = vset.pattern.permute.xlu1 %v6897_v2  ;;  %v749_v34 = vpop.permute.xlu0 %748 }
  0xed   : > { %827 = vmatpush1.bf16.msra.mxu0 %v727_v36  ;;  %v774_v60 = vpop.permute.xlu1 %773 }
  0xee   : > { %v726_v23 = vpack.c.bf16 %v704_v49, %v702_v38  ;;  %v725_v9 = vpack.c.bf16 %v703_v39, %v701_v63 }
  0xf0   : > { %828 = vmatprep.subr.bf16.mxu0 %v726_v23 }
  0xf1   : > { %829 = vmatpush1.bf16.msra.mxu0 %v725_v9  ;;  %v764_v62 = vpop.permute.xlu1 %763 }
  0xf4   : > { %4263 = vmatmul.mubr.msk.bf16.vlgmr.msra.gmra.mxu0 %vm801_vm0, %v4470_v8 }
  0xf5   : > { %856 = vmatprep.mubr.bf16.mxu0 %v6901_v5  ;;  %v754_v15 = vpop.permute.xlu1 %753 }
  0xf9   : > { %v744_v39 = vpop.permute.xlu1 %743 }
  0xfc   : > { %4264 = vmatmul.mubr.msk.bf16.gmra.mxu0 %vm801_vm0, %v4471_v44 }
  0xfd   : > { %866 = vmatprep.mubr.bf16.mxu0 %v6901_v5 }
 0x104   : > { %4265 = vmatmul.mubr.msk.bf16.gmra.mxu0 %vm801_vm0, %v4472_v7 }
 0x105   : > { %876 = vmatprep.mubr.bf16.mxu0 %v6901_v5 }
 0x10c   : > { %4266 = vmatmul.mubr.msk.bf16.gmra.mxu0 %vm801_vm0, %v4473_v35 }
 0x10d   : > { %1216 = vmatprep.mubr.bf16.mxu0 %v6901_v5 }
 0x1b4   : > { %v848_v29 = vpop.f32.mrf.mxu0 }
 0x1b6   : > { %v850_v54 = vpop.f32.mrf.mxu0 }
 0x1b7   : > { %v851_v8 = vadd.f32 %v850_v54, %v744_v39  ;;  %v4474_v54 = vld [vmem:[%s6888_s5] sm:$0xff]  }
 0x1b8   : > { %v852_v42 = vpop.f32.mrf.mxu0 }
 0x1b9   : > { %v853_v7 = vadd.f32 %v852_v42, %v749_v34  ;;  %v4476_v42 = vld [vmem:[%s6888_s5 + $0x10] sm:$0xff]  }
 0x1ba   : > { %v854_v28 = vpop.f32.mrf.mxu0 }
 0x1bb   : > { %v855_v63 = vadd.f32 %v854_v28, %v749_v34  ;;  %v889_v28 = vmax.f32 %v853_v7, 0.0  ;;  %v1686_v7 = vld [vmem:[%s6887_s4 + $0x28] sm:$0xff] }
 0x1bc   : > { %v858_v41 = vpop.f32.mrf.mxu0 }
 0x1bd   : > { %v859_v23 = vadd.f32 %v858_v41, %v754_v15 }
 0x1be   : > { %v860_v45 = vpop.f32.mrf.mxu0 }
 0x1bf   : > { %v861_v32 = vadd.f32 %v860_v45, %v754_v15 }
 0x1c0   : > { %v862_v48 = vpop.f32.mrf.mxu0 }
 0x1c1   : > { %v863_v6 = vadd.f32 %v862_v48, %v759_v22  ;;  %v892_v44 = vmax.f32 %v861_v32, 0.0  ;;  %v891_v48 = vmax.f32 %v859_v23, 0.0  ;;  %v5179_v32 = vld [vmem:[%s6889_s6 + $0x10] sm:$0xff] }
 0x1c2   : > { %v864_v43 = vpop.f32.mrf.mxu0 }
 0x1c3   : > { %v865_v3 = vadd.f32 %v864_v43, %v759_v22  ;;  %v893_v35 = vmax.f32 %v863_v6, 0.0  ;;  %v890_v43 = vmax.f32 %v855_v63, 0.0  ;;  %v5195_v6 = vld [vmem:[%s6891_s8 + $0x30] sm:$0xff] }
 0x1c4   : > { %v868_v55 = vpop.f32.mrf.mxu0  ;;  %v5209_v63 = vld [vmem:[%s6891_s8 + $0x10] sm:$0xff] }
 0x1c5   : > { %v869_v31 = vadd.f32 %v868_v55, %v764_v62  ;;  %v894_v38 = vmax.f32 %v865_v3, 0.0 }
 0x1c6   : > { %v870_v59 = vpop.f32.mrf.mxu0 }
 0x1c7   : > { %v871_v47 = vadd.f32 %v870_v59, %v764_v62  ;;  %v895_v9 = vmax.f32 %v869_v31, 0.0  ;;  %v914_v55 = vpack.c.bf16 %v894_v38, %v892_v44  ;;  %v888_v59 = vmax.f32 %v851_v8, 0.0  ;;  %v5171_v31 = vld [vmem:[%s6889_s6 + $0x20] sm:$0xff]  ;;  %v5215_v38 = vld [vmem:[%s6884_s1 + $0x30] sm:$0xff]  ;;  %v1688_v8 = vld [vmem:[%s6887_s4 + $0x38] sm:$0xff] }
 0x1c8   : > { %v872_v40 = vpop.f32.mrf.mxu0 }
 0x1c9   : > { %v873_v37 = vadd.f32 %v872_v40, %v769_v20  ;;  %v896_v4 = vmax.f32 %v871_v47, 0.0  ;;  %v912_v40 = vpack.c.bf16 %v890_v43, %v888_v59  ;;  %v1682_v43 = vld [vmem:[%s6887_s4 + $0x8] sm:$0xff] }
 0x1ca   : > { %v874_v61 = vpop.f32.mrf.mxu0  ;;  %v1871_v59 = vld [vmem:[%s6889_s6 + $0x28] sm:$0xff] }
 0x1cb   : > { %v875_v0 = vadd.f32 %v874_v61, %v769_v20  ;;  %v897_v19 = vmax.f32 %v873_v37, 0.0  ;;  %v4477_v20 = vld [vmem:[%s6888_s5 + $0x18] sm:$0xff]   ;;  %v5143_v37 = vld [vmem:[%s6887_s4 + $0x20] sm:$0xff] }
 0x1cc   : > { %v878_v58 = vpop.f32.mrf.mxu0 }
 0x1cd   : > { %v879_v14 = vadd.f32 %v878_v58, %v774_v60  ;;  %v898_v25 = vmax.f32 %v875_v0, 0.0  ;;  %v915_v45 = vpack.c.bf16 %v897_v19, %v895_v9  ;;  %v5093_v58 = vpop.permute.xlu1 %959  ;;  %v5201_v19 = vld [vmem:[%s6891_s8 + $0x20] sm:$0xff]  ;;  %v1586_v9 = vld [vmem:[%s6885_s2 + $0x8] sm:$0xff] }
 0x1ce   : > { %v880_v12 = vpop.f32.mrf.mxu0 }
 0x1cf   : > { %v881_v18 = vadd.f32 %v880_v12, %v774_v60  ;;  %v899_v27 = vmax.f32 %v879_v14, 0.0  ;;  %v916_v49 = vpack.c.bf16 %v898_v25, %v896_v4  ;;  %v913_v60 = vpack.c.bf16 %v893_v35, %v891_v48  ;;  %v5121_v14 = vld [vmem:[%s6885_s2 + $0x18] sm:$0xff]  ;;  %v5157_v25 = vld [vmem:[%s6887_s4] sm:$0xff] }
 0x1d0   : > { %v882_v17 = vpop.f32.mrf.mxu0 }
 0x1d1   : > { %v883_v13 = vadd.f32 %v882_v17, %v779_v46  ;;  %v900_v30 = vmax.f32 %v881_v18, 0.0  ;;  %v5095_v62 = vpop.permute.xlu1 %949  ;;  %v5102_v17 = vld [vmem:[%s6884_s1] sm:$0xff] }
 0x1d2   : > { %v884_v10 = vpop.f32.mrf.mxu0  ;;  %1422 = vperm.xlu1 %4434, %v5102_v17   ;;  %1348 = vperm.xlu0 %4435, %v5102_v17  }
 0x1d3   : > { %v885_v24 = vadd.f32 %v884_v10, %v779_v46  ;;  %v901_v16 = vmax.f32 %v883_v13, 0.0  ;;  %v849_v46 = vadd.f32 %v848_v29, %v744_v39  ;;  %v4475_v29 = vld [vmem:[%s6888_s5 + $0x8] sm:$0xff]   ;;  %v5127_v10 = vld [vmem:[%s6885_s2] sm:$0xff]  ;;  %v1587_v39 = vld [vmem:[%s6885_s2 + $0x10] sm:$0xff] }
 0x1d4   : > { %v4518_v13 = vld [vmem:[%s6884_s1 + $0x8] sm:$0xff] }
 0x1d5   : > { %v902_v26 = vmax.f32 %v885_v24, 0.0  ;;  %v917_v36 = vpack.c.bf16 %v901_v16, %v899_v27  ;;  %v887_v61 = vmax.f32 %v849_v46, 0.0  ;;  %v5097_v12 = vpop.permute.xlu1 %939  ;;  %v5135_v24 = vld [vmem:[%s6887_s4 + $0x30] sm:$0xff]  ;;  %v1873_v46 = vld [vmem:[%s6889_s6 + $0x38] sm:$0xff] }
 0x1d6   : > { %4436 = vset.pattern.permute.xlu1 %v6895_v1  ;;  %v5149_v16 = vld [vmem:[%s6887_s4 + $0x10] sm:$0xff]  ;;  %1605 = vperm.xlu0 %4435, %v1587_v39  }
 0x1d7   : > { %v918_v33 = vpack.c.bf16 %v902_v26, %v900_v30  ;;  %v911_v41 = vpack.c.bf16 %v889_v28, %v887_v61  ;;  %1504 = vperm.xlu1 %4436, %v5102_v17   ;;  %v5165_v26 = vld [vmem:[%s6889_s6 + $0x30] sm:$0xff]  ;;  %v5278_v28 = vld [vmem:[%s6884_s1 + $0x28] sm:$0xff] }
 0x1d8   : > { %v1867_v61 = vld [vmem:[%s6889_s6 + $0x8] sm:$0xff] }
 0x1d9   : > { %1007 = vmatprep.subr.bf16.mxu1 %v918_v33  ;;  %v5106_v0 = vpop.permute.xlu1 %929  ;;  %v5187_v33 = vld [vmem:[%s6889_s6] sm:$0xff] }
 0x1da   : > { %1008 = vmatpush1.bf16.msra.mxu1 %v917_v36  ;;  %1600 = vperm.xlu0 %4435, %v1586_v9  }
 0x1db   : > { %1009 = vmatprep.subr.bf16.mxu1 %v916_v49  ;;  %1508 = vperm.xlu1 %4436, %v4518_v13  }
 0x1dd   : > { %v5110_v18 = vpop.permute.xlu1 %1144 }
 0x1de   : > { %1010 = vmatpush1.bf16.msra.mxu1 %v915_v45  ;;  %7039 = vst [vmem:[#allocation11_spill] sm:$0xff] %v5110_v18  ;;  %1726 = vperm.xlu0 %4435, %v1688_v8   ;;  %v5246_v45 = vld [vmem:[%s6884_s1 + $0x38] sm:$0xff] }
 0x1df   : > { %1011 = vmatprep.subr.bf16.mxu1 %v914_v55  ;;  %4437 = vset.pattern.permute.xlu1 %v6901_v5 }
 0x1e0   : > { %1610 = vperm.xlu1 %4437, %v5121_v14  }
 0x1e1   : > { %v5115_v22 = vpop.permute.xlu1 %1134 }
 0x1e2   : > { %1012 = vmatpush1.bf16.msra.mxu1 %v913_v60  ;;  %7040 = vst [vmem:[#allocation12_spill] sm:$0xff] %v5115_v22  ;;  %1716 = vperm.xlu0 %4435, %v1686_v7   ;;  %v1869_v60 = vld [vmem:[%s6889_s6 + $0x18] sm:$0xff] }
 0x1e3   : > { %1013 = vmatprep.subr.bf16.mxu1 %v912_v40 }
 0x1e4   : > { %1595 = vperm.xlu1 %4437, %v5127_v10  }
 0x1e5   : > { %v5130_v47 = vpop.permute.xlu1 %1124 }
 0x1e6   : > { %1014 = vmatpush1.bf16.msra.mxu1 %v911_v41  ;;  %7041 = vst [vmem:[#allocation13_spill] sm:$0xff] %v5130_v47 }
 0x1e8   : > { %1721 = vperm.xlu1 %4437, %v5135_v24  }
 0x1e9   : > { %4271 = vmatmul.mubr.msk.bf16.vlgmr.msra.gmra.mxu1 %vm801_vm0, %v4474_v54  ;;  %v5138_v15 = vpop.permute.xlu1 %1378  ;;  %v5296_v54 = vld [vmem:[%s6885_s2 + $0x30] sm:$0xff] }
 0x1ea   : > { %1041 = vmatprep.mubr.bf16.mxu1 %v6901_v5  ;;  %7042 = vst [vmem:[#allocation14_spill] sm:$0xff] %v5138_v15 }
 0x1ec   : > { %1711 = vperm.xlu1 %4437, %v5143_v37  }
 0x1ed   : > { %v5152_v3 = vpop.permute.xlu1 %1446 }
 0x1ee   : > { %7043 = vst [vmem:[#allocation15_spill] sm:$0xff] %v5152_v3 }
 0x1f0   : > { %1701 = vperm.xlu1 %4437, %v5149_v16  }
 0x1f1   : > { %4272 = vmatmul.mubr.msk.bf16.gmra.mxu1 %vm801_vm0, %v4475_v29  ;;  %v5160_v30 = vpop.permute.xlu1 %1114  ;;  %v5303_v29 = vld [vmem:[%s6884_s1 + $0x10] sm:$0xff] }
 0x1f2   : > { %1051 = vmatprep.mubr.bf16.mxu1 %v6901_v5  ;;  %7044 = vst [vmem:[#allocation16_spill] sm:$0xff] %v5160_v30  ;;  %v965_v30 = vpop.permute.xlu0 %964 }
 0x1f4   : > { %1691 = vperm.xlu1 %4437, %v5157_v25  }
 0x1f5   : > { %v5173_v27 = vpop.permute.xlu1 %1119 }
 0x1f6   : > { %7045 = vst [vmem:[#allocation17_spill] sm:$0xff] %v5173_v27 }
 0x1f8   : > { %1906 = vperm.xlu1 %4437, %v5165_v26  }
 0x1f9   : > { %4273 = vmatmul.mubr.msk.bf16.gmra.mxu1 %vm801_vm0, %v4476_v42  ;;  %v5182_v4 = vpop.permute.xlu1 %1532 }
 0x1fa   : > { %1061 = vmatprep.mubr.bf16.mxu1 %v6901_v5  ;;  %7046 = vst [vmem:[#allocation18_spill] sm:$0xff] %v5182_v4 }
 0x1fc   : > { %1896 = vperm.xlu1 %4437, %v5171_v31  }
 0x1fd   : > { %v5190_v34 = vpop.permute.xlu1 %1368 }
 0x1fe   : > { %7047 = vst [vmem:[#allocation19_spill] sm:$0xff] %v5190_v34 }
 0x200   : > { %1886 = vperm.xlu1 %4437, %v5179_v32  }
 0x201   : > { %4274 = vmatmul.mubr.msk.bf16.gmra.mxu1 %vm801_vm0, %v4477_v20  ;;  %v5204_v36 = vpop.permute.xlu1 %1438  ;;  %v5313_v20 = vld [vmem:[%s6884_s1 + $0x18] sm:$0xff] }
 0x202   : > { %1323 = vmatprep.mubr.bf16.mxu1 %v6901_v5  ;;  %7048 = vst [vmem:[#allocation20_spill] sm:$0xff] %v5204_v36 }
 0x204   : > { %1876 = vperm.xlu1 %4437, %v5187_v33  }
 0x205   : > { %v5217_v49 = vpop.permute.xlu1 %1442 }
 0x206   : > { %7049 = vst [vmem:[#allocation21_spill] sm:$0xff] %v5217_v49 }
 0x208   : > { %2091 = vperm.xlu1 %4437, %v5195_v6  }
 0x209   : > { %v5224_v23 = vpop.permute.xlu1 %1524 }
 0x20a   : > { %7050 = vst [vmem:[#allocation22_spill] sm:$0xff] %v5224_v23 }
 0x20c   : > { %2081 = vperm.xlu1 %4437, %v5201_v19  }
 0x20d   : > { %v5235_v44 = vpop.permute.xlu1 %1625 }
 0x20e   : > { %7051 = vst [vmem:[#allocation23_spill] sm:$0xff] %v5235_v44  ;;  %v7067_v44 = vmov 2  }
 0x210   : > { %2071 = vperm.xlu1 %4437, %v5209_v63  }
 0x211   : > { %v5241_v35 = vpop.permute.xlu1 %1358 }
 0x212   : > { %7052 = vst [vmem:[#allocation24_spill] sm:$0xff] %v5241_v35 }
 0x214   : > { %2325 = vperm.xlu1 %4437, %v5215_v38  }
 0x215   : > { %v5261_v55 = vpop.permute.xlu1 %1363 }
 0x216   : > { %7053 = vst [vmem:[#allocation25_spill] sm:$0xff] %v5261_v55 }
 0x218   : > { %4438 = vset.pattern.permute.xlu1 %v6897_v2 }
 0x219   : > { %2393 = vperm.xlu1 %4438, %v5215_v38   ;;  %v5268_v48 = vpop.permute.xlu1 %1434 }
 0x21a   : > { %7054 = vst [vmem:[#allocation26_spill] sm:$0xff] %v5268_v48  ;;  %v2054_v48 = vld [vmem:[%s6891_s8 + $0x18] sm:$0xff] }
 0x21d   : > { %4439 = vset.pattern.permute.xlu1 %v6901_v5  ;;  %v5284_v40 = vpop.permute.xlu1 %1512 }
 0x21e   : > { %2061 = vperm.xlu1 %4439, %v4933_v11   ;;  %v1684_v11 = vld [vmem:[%s6887_s4 + $0x18] sm:$0xff]  ;;  %7055 = vst [vmem:[#allocation27_spill] sm:$0xff] %v5284_v40  ;;  %v2056_v40 = vld [vmem:[%s6891_s8 + $0x28] sm:$0xff] }
 0x21f   : > { %1706 = vperm.xlu0 %4435, %v1684_v11  }
 0x221   : > { %v5291_v41 = vpop.permute.xlu1 %1615 }
 0x222   : > { %2066 = vperm.xlu1 %4439, %v4956_v21   ;;  %v5256_v21 = vld [vmem:[%s6884_s1 + $0x20] sm:$0xff]  ;;  %7056 = vst [vmem:[#allocation28_spill] sm:$0xff] %v5291_v41 }
 0x223   : > { %1696 = vperm.xlu0 %4435, %v1682_v43  }
 0x225   : > { %v5307_v42 = vpop.permute.xlu1 %1620 }
 0x226   : > { %4441 = vset.pattern.permute.xlu1 %v6895_v1  ;;  %7057 = vst [vmem:[#allocation29_spill] sm:$0xff] %v5307_v42 }
 0x227   : > { %2479 = vperm.xlu1 %4441, %v5246_v45   ;;  %1911 = vperm.xlu0 %4435, %v1873_v46  }
 0x229   : > { %v5317_v13 = vpop.permute.xlu1 %1353 }
 0x22a   : > { %7058 = vst [vmem:[#allocation30_spill] sm:$0xff] %v5317_v13 }
 0x22b   : > { %4442 = vset.pattern.permute.xlu1 %v6901_v5  ;;  %1901 = vperm.xlu0 %4435, %v1871_v59   ;;  %v5344_v59 = vld [vmem:[%s6885_s2 + $0x20] sm:$0xff] }
 0x22c   : > { %2315 = vperm.xlu1 %4442, %v5256_v21  }
 0x22f   : > { %1891 = vperm.xlu0 %4435, %v1869_v60  }
 0x230   : > { %4443 = vset.pattern.permute.xlu1 %v6897_v2 }
 0x231   : > { %2385 = vperm.xlu1 %4443, %v5256_v21  }
 0x233   : > { %1881 = vperm.xlu0 %4435, %v1867_v61   ;;  %v5350_v61 = vld [vmem:[%s6884_s1 + $0x8] sm:$0xff] }
 0x235   : > { %2389 = vperm.xlu1 %4443, %v5278_v28  }
 0x237   : > { %4440 = vset.pattern.permute.xlu0 %v6895_v1 }
 0x238   : > { %2475 = vperm.xlu0 %4440, %v5215_v38  }
 0x239   : > { %4444 = vset.pattern.permute.xlu1 %v6895_v1 }
 0x23a   : > { %2471 = vperm.xlu1 %4444, %v5278_v28  }
 0x23c   : > { %2467 = vperm.xlu0 %4440, %v5256_v21  }
 0x23e   : > { %4445 = vset.pattern.permute.xlu1 %v6901_v5 }
 0x23f   : > { %2572 = vperm.xlu1 %4445, %v5296_v54  }
 0x240   : > { %2463 = vperm.xlu0 %4440, %v5313_v20  }
 0x243   : > { %2305 = vperm.xlu1 %4445, %v5303_v29  }
 0x244   : > { %4448 = vset.pattern.permute.xlu0 %v6897_v2 }
 0x245   : > { %2397 = vperm.xlu0 %4448, %v5246_v45  }
 0x247   : > { %2310 = vperm.xlu1 %4445, %v5313_v20  }
 0x249   : > { %2377 = vperm.xlu0 %4448, %v5303_v29  }
 0x24b   : > { %4446 = vset.pattern.permute.xlu1 %v6897_v2 }
 0x24c   : > { %2381 = vperm.xlu1 %4446, %v5313_v20  }
 0x24d   : > { %v5327_v8 = vpop.permute.xlu1 %1422  ;;  %2373 = vperm.xlu0 %4448, %v5350_v61  }
 0x24e   : > { %7059 = vst [vmem:[#allocation31_spill] sm:$0xff] %v5327_v8  ;;  %v7062_v8 = vmov 0  }
 0x250   : > { %4447 = vset.pattern.permute.xlu1 %v6895_v1 }
 0x251   : > { %2459 = vperm.xlu1 %4447, %v5303_v29   ;;  %4451 = vset.pattern.permute.xlu0 %v7062_v8 }
 0x252   : > { %v5339_v46 = vpop.permute.xlu1 %1504 }
 0x253   : > { %7060 = vst [vmem:[#allocation32_spill] sm:$0xff] %v5339_v46  ;;  %v5359_v46 = vld [vmem:[%s6885_s2 + $0x28] sm:$0xff] }
 0x255   : > { %4449 = vset.pattern.permute.xlu1 %v6901_v5  ;;  %v2058_v5 = vld [vmem:[%s6891_s8 + $0x38] sm:$0xff] }
 0x256   : > { %2562 = vperm.xlu1 %4449, %v5344_v59   ;;  %v5354_v2 = vpop.permute.xlu1 %1508  ;;  %2096 = vperm.xlu0 %4451, %v2058_v5   ;;  %v955_v5 = vpop.permute.xlu0 %954 }
 0x257   : > { %7061 = vst [vmem:[#allocation33_spill] sm:$0xff] %v5354_v2 }
 0x25a   : > { %2567 = vperm.xlu1 %4449, %v5359_v46   ;;  %2086 = vperm.xlu0 %4451, %v2056_v40   ;;  %v945_v34 = vpop.permute.xlu0 %944 }
 0x25b   : > { %v5366_v13 = vpop.permute.xlu1 %1610 }
 0x25c   : > { %7063 = vst [vmem:[#allocation34_spill] sm:$0xff] %v5366_v13  ;;  %v7065_v13 = vmov 1  }
 0x25e   : > { %2300 = vperm.xlu1 %4449, %v5350_v61   ;;  %2076 = vperm.xlu0 %4451, %v2054_v48  }
 0x25f   : > { %v5372_v47 = vpop.permute.xlu1 %1595 }
 0x260   : > { %7064 = vst [vmem:[#allocation35_spill] sm:$0xff] %v5372_v47 }
 0x262   : > { %4450 = vset.pattern.permute.xlu1 %v7065_v13  ;;  %2330 = vperm.xlu0 %4451, %v5246_v45  }
 0x263   : > { %2369 = vperm.xlu1 %4450, %v5102_v17   ;;  %v5379_v18 = vpop.permute.xlu1 %1721 }
 0x264   : > { %7066 = vst [vmem:[#allocation36_spill] sm:$0xff] %v5379_v18 }
 0x266   : > { %2320 = vperm.xlu0 %4451, %v5278_v28  }
 0x267   : > { %4452 = vset.pattern.permute.xlu1 %v7067_v44  ;;  %v5384_v36 = vpop.permute.xlu1 %1711 }
 0x268   : > { %7068 = vst [vmem:[#allocation37_spill] sm:$0xff] %v5384_v36  ;;  %2451 = vperm.xlu1 %4452, %v5102_v17  }
 0x26b   : > { %v5390_v52 = vpop.permute.xlu1 %1701 }
 0x26c   : > { %2455 = vperm.xlu1 %4452, %v5350_v61  }
 0x270   : > { %4453 = vset.pattern.permute.xlu1 %v7062_v8 }
 0x271   : > { %2557 = vperm.xlu1 %4453, %v5121_v14  }
 0x275   : > { %2542 = vperm.xlu1 %4453, %v5127_v10  }
 0x279   : > { %2668 = vperm.xlu1 %4453, %v5135_v24   ;;  %v4479_v24 = vld [vmem:[%s6890_s7 + $0x8] sm:$0xff]  }
 0x27d   : > { %2658 = vperm.xlu1 %4453, %v5143_v37   ;;  %v4480_v37 = vld [vmem:[%s6890_s7 + $0x10] sm:$0xff]  }
 0x281   : > { %2648 = vperm.xlu1 %4453, %v5149_v16  }
 0x285   : > { %2638 = vperm.xlu1 %4453, %v5157_v25   ;;  %v4481_v25 = vld [vmem:[%s6890_s7 + $0x18] sm:$0xff]  }
 0x289   : > { %2853 = vperm.xlu1 %4453, %v5165_v26  }
 0x28d   : > { %2843 = vperm.xlu1 %4453, %v5171_v31  }
 0x291   : > { %2833 = vperm.xlu1 %4453, %v5179_v32  }
 0x295   : > { %2823 = vperm.xlu1 %4453, %v5187_v33  }
 0x299   : > { %3038 = vperm.xlu1 %4453, %v5195_v6   ;;  %v5469_v6 = vld [vmem:[%s6891_s8] sm:$0xff] }
 0x29d   : > { %3028 = vperm.xlu1 %4453, %v5201_v19  }
 0x2a1   : > { %3018 = vperm.xlu1 %4453, %v5209_v63   ;;  %v2999_v63 = vld [vmem:[%s6891_s8 + $0x8] sm:$0xff] }
 0x2a5   : > { %3272 = vperm.xlu1 %4453, %v5215_v38  }
 0x2a9   : > { %v5320_v39 = vpop.f32.mrf.mxu1  ;;  %4454 = vset.pattern.permute.xlu1 %v7065_v13 }
 0x2aa   : > { %3340 = vperm.xlu1 %4454, %v5215_v38  }
 0x2ab   : > { %v5323_v9 = vpop.f32.mrf.mxu1 }
 0x2ad   : > { %v5329_v7 = vpop.f32.mrf.mxu1 }
 0x2ae   : > { %4455 = vset.pattern.permute.xlu1 %v7062_v8 }
 0x2af   : > { %v5332_v11 = vpop.f32.mrf.mxu1  ;;  %3008 = vperm.xlu1 %4455, %v5469_v6  }
 0x2b1   : > { %v5336_v43 = vpop.f32.mrf.mxu1 }
 0x2b3   : > { %v1045_v60 = vpop.f32.mrf.mxu1  ;;  %3013 = vperm.xlu1 %4455, %v2999_v63   ;;  %v3231_v63 = vld [vmem:[%s4900_s29 + $0x18] sm:$0x77] }
 0x2b5   : > { %v1047_v1 = vpop.f32.mrf.mxu1 }
 0x2b7   : > { %v1049_v42 = vpop.f32.mrf.mxu1  ;;  %4457 = vset.pattern.permute.xlu1 %v7067_v44 }
 0x2b8   : > { %v1050_v56 = vadd.f32 %v1049_v42, %v945_v34  ;;  %3426 = vperm.xlu1 %4457, %v5246_v45  }
 0x2b9   : > { %v1053_v41 = vpop.f32.mrf.mxu1 }
 0x2ba   : > { %v1054_v36 = vadd.f32 %v1053_v41, %v5095_v62  ;;  %v1079_v42 = vmax.f32 %v1050_v56, 0.0 }
 0x2bb   : > { %v1055_v2 = vpop.f32.mrf.mxu1 }
 0x2bc   : > { %v1056_v48 = vadd.f32 %v1055_v2, %v5095_v62  ;;  %v2539_v2 = vld [vmem:[%s6885_s2 + $0x38] sm:$0xff]  ;;  %v5399_v62 = vpop.permute.xlu1 %1691  ;;  %v1080_v41 = vmax.f32 %v1054_v36, 0.0  ;;  %4458 = vset.pattern.permute.xlu1 %v7062_v8 }
 0x2bd   : > { %v1057_v27 = vpop.f32.mrf.mxu1  ;;  %2577 = vperm.xlu0 %4451, %v2539_v2   ;;  %7069 = vst [vmem:[#allocation38_spill] sm:$0xff] %v5399_v62  ;;  %3262 = vperm.xlu1 %4458, %v5256_v21  }
 0x2be   : > { %v1058_v3 = vadd.f32 %v1057_v27, %v955_v5  ;;  %v935_v27 = vpop.permute.xlu0 %934 }
 0x2bf   : > { %v1059_v22 = vpop.f32.mrf.mxu1 }
 0x2c0   : > { %v1060_v49 = vadd.f32 %v1059_v22, %v955_v5 }
 0x2c1   : > { %v1063_v55 = vpop.f32.mrf.mxu1  ;;  %2295 = vperm.xlu0 %4451, %v5102_v17   ;;  %4459 = vset.pattern.permute.xlu1 %v7065_v13 }
 0x2c2   : > { %v1064_v15 = vadd.f32 %v1063_v55, %v5093_v58  ;;  %v1040_v55 = vadd.f32 %v5332_v11, %v935_v27  ;;  %3332 = vperm.xlu1 %4459, %v5256_v21  }
 0x2c3   : > { %v1065_v35 = vpop.f32.mrf.mxu1 }
 0x2c4   : > { %v1066_v40 = vadd.f32 %v1065_v35, %v5093_v58  ;;  %v1083_v35 = vmax.f32 %v1060_v49, 0.0  ;;  %v1084_v51 = vmax.f32 %v1064_v15, 0.0  ;;  %v1046_v58 = vadd.f32 %v1045_v60, %v5097_v12  ;;  %v5408_v60 = vpop.permute.xlu1 %1906 }
 0x2c5   : > { %v1067_v23 = vpop.f32.mrf.mxu1  ;;  %v1044_v15 = vadd.f32 %v5336_v43, %v5097_v12  ;;  %7070 = vst [vmem:[#allocation39_spill] sm:$0xff] %v5408_v60  ;;  %v1034_v12 = vadd.f32 %v5320_v39, %v5106_v0 }
 0x2c6   : > { %v1068_v47 = vadd.f32 %v1067_v23, %v965_v30  ;;  %v1085_v23 = vmax.f32 %v1066_v40, 0.0  ;;  %3336 = vperm.xlu1 %4459, %v5278_v28  }
 0x2c7   : > { %v1069_v4 = vpop.f32.mrf.mxu1  ;;  %v1076_v36 = vmax.f32 %v1044_v15, 0.0  ;;  %v1072_v40 = vmax.f32 %v1034_v12, 0.0 }
 0x2c8   : > { %v1070_v18 = vadd.f32 %v1069_v4, %v965_v30  ;;  %v1086_v22 = vmax.f32 %v1068_v47, 0.0  ;;  %v1081_v47 = vmax.f32 %v1056_v48, 0.0  ;;  %v1048_v4 = vadd.f32 %v1047_v1, %v945_v34  ;;  %v5415_v48 = vpop.permute.xlu1 %1896 }
 0x2c9   : > { %v1036_v1 = vadd.f32 %v5323_v9, %v5106_v0  ;;  %v1075_v34 = vmax.f32 %v1040_v55, 0.0  ;;  %7071 = vst [vmem:[#allocation40_spill] sm:$0xff] %v5415_v48  ;;  %v4478_v0 = vld [vmem:[%s6890_s7] sm:$0xff]  }
 0x2ca   : > { %v1087_v57 = vmax.f32 %v1070_v18, 0.0  ;;  %v1082_v18 = vmax.f32 %v1058_v3, 0.0  ;;  %v1102_v49 = vpack.c.bf16 %v1086_v22, %v1084_v51  ;;  %v1101_v5 = vpack.c.bf16 %v1083_v35, %v1081_v47  ;;  %4460 = vset.pattern.permute.xlu1 %v7067_v44 }
 0x2cb   : > { %v1038_v51 = vadd.f32 %v5329_v7, %v935_v27  ;;  %v1078_v56 = vmax.f32 %v1048_v4, 0.0  ;;  %v1073_v9 = vmax.f32 %v1036_v1, 0.0  ;;  %3418 = vperm.xlu1 %4460, %v5278_v28   ;;  %v5557_v1 = vpop.permute.xlu0 %1528 }
 0x2cc   : > { %v1103_v30 = vpack.c.bf16 %v1087_v57, %v1085_v23  ;;  %v1077_v57 = vmax.f32 %v1046_v58, 0.0  ;;  %v1100_v3 = vpack.c.bf16 %v1082_v18, %v1080_v41  ;;  %v5422_v10 = vpop.permute.xlu1 %1886 }
 0x2cd   : > { %v1074_v14 = vmax.f32 %v1038_v51, 0.0  ;;  %v1098_v43 = vpack.c.bf16 %v1078_v56, %v1076_v36  ;;  %v1097_v7 = vpack.c.bf16 %v1075_v34, %v1073_v9  ;;  %7072 = vst [vmem:[#allocation41_spill] sm:$0xff] %v5422_v10  ;;  %v3577_v56 = vld [vmem:[%s6887_s4 + $0x10] sm:$0xff] }
 0x2ce   : > { %1192 = vmatprep.subr.bf16.mxu0 %v1103_v30  ;;  %v1099_v11 = vpack.c.bf16 %v1079_v42, %v1077_v57  ;;  %v3482_v42 = vld [vmem:[%s6885_s2 + $0x18] sm:$0xff]  ;;  %v3579_v57 = vld [vmem:[%s6887_s4 + $0x20] sm:$0xff]  ;;  %v3766_v36 = vld [vmem:[%s6889_s6 + $0x30] sm:$0xff] }
 0x2cf   : > { %1193 = vmatpush1.bf16.msra.mxu0 %v1102_v49  ;;  %v1096_v17 = vpack.c.bf16 %v1074_v14, %v1072_v40  ;;  %4461 = vset.pattern.permute.xlu1 %v7062_v8  ;;  %v5569_v34 = vpop.permute.xlu0 %1520  ;;  %v7137_v10 = vld [vmem:[#allocation11_spill] sm:$0xff] }
 0x2d0   : > { %1194 = vmatprep.subr.bf16.mxu0 %v1101_v5  ;;  %v5430_v39 = vpop.permute.xlu1 %1876  ;;  %3519 = vperm.xlu1 %4461, %v5296_v54   ;;  %v3479_v5 = vld [vmem:[%s6885_s2] sm:$0xff] }
 0x2d1   : > { %7073 = vst [vmem:[#allocation42_spill] sm:$0xff] %v5430_v39 }
 0x2d3   : > { %1195 = vmatpush1.bf16.msra.mxu0 %v1100_v3  ;;  %v5579_v9 = vpop.permute.xlu0 %1516 }
 0x2d4   : > { %1196 = vmatprep.subr.bf16.mxu0 %v1099_v11  ;;  %v5438_v22 = vpop.permute.xlu1 %2091  ;;  %3252 = vperm.xlu1 %4461, %v5303_v29   ;;  %v3575_v11 = vld [vmem:[%s6887_s4] sm:$0xff] }
 0x2d5   : > { %7074 = vst [vmem:[#allocation43_spill] sm:$0xff] %v5438_v22  ;;  %v7121_v22 = vld [vmem:[#allocation9_spill] sm:$0xff] }
 0x2d7   : > { %1197 = vmatpush1.bf16.msra.mxu0 %v1098_v43  ;;  %v3764_v43 = vld [vmem:[%s6889_s6 + $0x20] sm:$0xff]  ;;  %v5588_v40 = vpop.permute.xlu0 %1450 }
 0x2d8   : > { %1198 = vmatprep.subr.bf16.mxu0 %v1097_v7  ;;  %v5444_v16 = vpop.permute.xlu1 %2081  ;;  %3257 = vperm.xlu1 %4461, %v5313_v20  }
 0x2d9   : > { %7075 = vst [vmem:[#allocation44_spill] sm:$0xff] %v5444_v16 }
 0x2db   : > { %1199 = vmatpush1.bf16.msra.mxu0 %v1096_v17  ;;  %v3762_v17 = vld [vmem:[%s6889_s6 + $0x10] sm:$0xff] }
 0x2dc   : > { %v5451_v26 = vpop.permute.xlu1 %2071  ;;  %4462 = vset.pattern.permute.xlu1 %v7065_v13 }
 0x2dd   : > { %7076 = vst [vmem:[#allocation45_spill] sm:$0xff] %v5451_v26  ;;  %3328 = vperm.xlu1 %4462, %v5313_v20  }
 0x2de   : > { %4279 = vmatmul.mubr.msk.bf16.vlgmr.msra.gmra.mxu0 %vm801_vm0, %v4478_v0 }
 0x2df   : > { %1226 = vmatprep.mubr.bf16.mxu0 %v7062_v8 }
 0x2e0   : > { %v5456_v31 = vpop.permute.xlu1 %2325 }
 0x2e1   : > { %7077 = vst [vmem:[#allocation46_spill] sm:$0xff] %v5456_v31  ;;  %4463 = vset.pattern.permute.xlu1 %v7067_v44  ;;  %v7127_v31 = vld [vmem:[#allocation14_spill] sm:$0xff] }
 0x2e2   : > { %3406 = vperm.xlu1 %4463, %v5303_v29   ;;  %v3232_v29 = vld [vmem:[%s6884_s1] sm:$0xff] }
 0x2e4   : > { %v5459_v32 = vpop.permute.xlu1 %2393 }
 0x2e5   : > { %7078 = vst [vmem:[#allocation47_spill] sm:$0xff] %v5459_v32 }
 0x2e6   : > { %4280 = vmatmul.mubr.msk.bf16.gmra.mxu0 %vm801_vm0, %v4479_v24  ;;  %4465 = vset.pattern.permute.xlu1 %v7062_v8  ;;  %v3760_v24 = vld [vmem:[%s6889_s6] sm:$0xff] }
 0x2e7   : > { %1236 = vmatprep.mubr.bf16.mxu0 %v7062_v8  ;;  %3509 = vperm.xlu1 %4465, %v5344_v59  }
 0x2e8   : > { %v5463_v33 = vpop.permute.xlu1 %2061 }
 0x2e9   : > { %7079 = vst [vmem:[#allocation48_spill] sm:$0xff] %v5463_v33 }
 0x2eb   : > { %3514 = vperm.xlu1 %4465, %v5359_v46  }
 0x2ec   : > { %v5473_v19 = vpop.permute.xlu1 %2066 }
 0x2ed   : > { %7080 = vst [vmem:[#allocation49_spill] sm:$0xff] %v5473_v19 }
 0x2ee   : > { %4281 = vmatmul.mubr.msk.bf16.gmra.mxu0 %vm801_vm0, %v4480_v37  ;;  %v5598_v37 = vpop.permute.xlu0 %1430 }
 0x2ef   : > { %1246 = vmatprep.mubr.bf16.mxu0 %v7062_v8  ;;  %3247 = vperm.xlu1 %4465, %v5350_v61  }
 0x2f0   : > { %v5478_v35 = vpop.permute.xlu1 %2479 }
 0x2f1   : > { %7081 = vst [vmem:[#allocation50_spill] sm:$0xff] %v5478_v35 }
 0x2f3   : > { %4466 = vset.pattern.permute.xlu1 %v7065_v13 }
 0x2f4   : > { %v5482_v38 = vpop.permute.xlu1 %2315  ;;  %3316 = vperm.xlu1 %4466, %v3232_v29  }
 0x2f5   : > { %7082 = vst [vmem:[#allocation51_spill] sm:$0xff] %v5482_v38 }
 0x2f6   : > { %4282 = vmatmul.mubr.msk.bf16.gmra.mxu0 %vm801_vm0, %v4481_v25 }
 0x2f7   : > { %1978 = vmatprep.mubr.bf16.mxu0 %v7062_v8 }
 0x2f8   : > { %v5487_v23 = vpop.permute.xlu1 %2385  ;;  %4468 = vset.pattern.permute.xlu1 %v7067_v44 }
 0x2f9   : > { %7083 = vst [vmem:[#allocation52_spill] sm:$0xff] %v5487_v23  ;;  %3398 = vperm.xlu1 %4468, %v3232_v29   ;;  %v3951_v29 = vld [vmem:[%s6891_s8 + $0x30] sm:$0xff] }
 0x2fc   : > { %v5490_v2 = vpop.permute.xlu1 %2389 }
 0x2fd   : > { %7084 = vst [vmem:[#allocation53_spill] sm:$0xff] %v5490_v2  ;;  %3402 = vperm.xlu1 %4468, %v5350_v61   ;;  %v3581_v61 = vld [vmem:[%s6887_s4 + $0x30] sm:$0xff] }
 0x300   : > { %v5493_v58 = vpop.permute.xlu1 %2471 }
 0x301   : > { %7085 = vst [vmem:[#allocation54_spill] sm:$0xff] %v5493_v58  ;;  %4469 = vset.pattern.permute.xlu1 %v7062_v8  ;;  %v7122_v58 = vld [vmem:[#allocation15_spill] sm:$0xff] }
 0x302   : > { %3504 = vperm.xlu1 %4469, %v3482_v42   ;;  %v3284_v42 = vrot.slane %v3231_v63, %v4905_v50 }
 0x304   : > { %v5497_v45 = vpop.permute.xlu1 %2572 }
 0x305   : > { %7086 = vst [vmem:[#allocation55_spill] sm:$0xff] %v5497_v45 }
 0x306   : > { %3489 = vperm.xlu1 %4469, %v3479_v5   ;;  %v3288_v5 = vrot.slane %v3231_v63, %v4911_v53 }
 0x308   : > { %v5501_v47 = vpop.permute.xlu1 %2305 }
 0x309   : > { %7087 = vst [vmem:[#allocation56_spill] sm:$0xff] %v5501_v47 }
 0x30a   : > { %3615 = vperm.xlu1 %4469, %v3581_v61  }
 0x30c   : > { %v5504_v21 = vpop.permute.xlu1 %2310 }
 0x30d   : > { %7088 = vst [vmem:[#allocation57_spill] sm:$0xff] %v5504_v21 }
 0x30e   : > { %3605 = vperm.xlu1 %4469, %v3579_v57   ;;  %v5610_v57 = vpop.permute.xlu0 %1426 }
 0x310   : > { %v5507_v30 = vpop.permute.xlu1 %2381 }
 0x311   : > { %7089 = vst [vmem:[#allocation58_spill] sm:$0xff] %v5507_v30 }
 0x312   : > { %3595 = vperm.xlu1 %4469, %v3577_v56   ;;  %v7110_v56 = vld [vmem:[#allocation6_spill] sm:$0xff] }
 0x314   : > { %v5511_v28 = vpop.permute.xlu1 %2459 }
 0x315   : > { %7090 = vst [vmem:[#allocation59_spill] sm:$0xff] %v5511_v28 }
 0x316   : > { %3585 = vperm.xlu1 %4469, %v3575_v11   ;;  %v3350_v11 = vrot.slane %v3231_v63, %v7110_v56 }
 0x318   : > { %v5514_v27 = vpop.permute.xlu1 %2562 }
 0x319   : > { %7091 = vst [vmem:[#allocation60_spill] sm:$0xff] %v5514_v27 }
 0x31a   : > { %3800 = vperm.xlu1 %4469, %v3766_v36   ;;  %v7111_v36 = vld [vmem:[#allocation7_spill] sm:$0xff] }
 0x31c   : > { %v5517_v54 = vpop.permute.xlu1 %2567 }
 0x31d   : > { %7092 = vst [vmem:[#allocation61_spill] sm:$0xff] %v5517_v54 }
 0x31e   : > { %3790 = vperm.xlu1 %4469, %v3764_v43   ;;  %v3354_v43 = vrot.slane %v3231_v63, %v7111_v36  ;;  %v3947_v63 = vld [vmem:[%s6891_s8 + $0x10] sm:$0xff] }
 0x320   : > { %v5521_v4 = vpop.permute.xlu1 %2300 }
 0x321   : > { %7093 = vst [vmem:[#allocation62_spill] sm:$0xff] %v5521_v4 }
 0x322   : > { %3780 = vperm.xlu1 %4469, %v3762_v17   ;;  %v3949_v17 = vld [vmem:[%s6891_s8 + $0x20] sm:$0xff] }
 0x324   : > { %v5524_v18 = vpop.permute.xlu1 %2369 }
 0x325   : > { %7094 = vst [vmem:[#allocation63_spill] sm:$0xff] %v5524_v18 }
 0x326   : > { %3770 = vperm.xlu1 %4469, %v3760_v24   ;;  %v5618_v24 = vrot.slane %v3284_v42, %v4905_v50 }
 0x328   : > { %v5527_v20 = vpop.permute.xlu1 %2451  ;;  %7112 = vst [vmem:[#allocation79_spill] sm:$0xff] %v5618_v24 }
 0x329   : > { %7095 = vst [vmem:[#allocation64_spill] sm:$0xff] %v5527_v20 }
 0x32a   : > { %3985 = vperm.xlu1 %4469, %v3951_v29   ;;  %v5627_v29 = vrot.slane %v3354_v43, %v7110_v56 }
 0x32c   : > { %v5533_v49 = vpop.permute.xlu1 %2455  ;;  %7114 = vst [vmem:[#allocation81_spill] sm:$0xff] %v5627_v29 }
 0x32d   : > { %7096 = vst [vmem:[#allocation65_spill] sm:$0xff] %v5533_v49 }
 0x32e   : > { %3975 = vperm.xlu1 %4469, %v3949_v17  }
 0x330   : > { %v5536_v59 = vpop.permute.xlu1 %2557 }
 0x331   : > { %7097 = vst [vmem:[#allocation66_spill] sm:$0xff] %v5536_v59 }
 0x332   : > { %3965 = vperm.xlu1 %4469, %v3947_v63  }
 0x334   : > { %v5539_v46 = vpop.permute.xlu1 %2542 }
 0x335   : > { %7098 = vst [vmem:[#allocation67_spill] sm:$0xff] %v5539_v46  ;;  %v7120_v46 = vld [vmem:[#allocation10_spill] sm:$0xff] }
 0x336   : > { %3955 = vperm.xlu1 %4469, %v5469_v6  }
 0x338   : > { %v5542_v55 = vpop.permute.xlu1 %2668 }
 0x339   : > { %7099 = vst [vmem:[#allocation68_spill] sm:$0xff] %v5542_v55 }
 0x33c   : > { %v5550_v15 = vpop.permute.xlu1 %2658 }
 0x33d   : > { %7100 = vst [vmem:[#allocation69_spill] sm:$0xff] %v5550_v15  ;;  %v1337_v15 = vld [vmem:[%s4900_s29 + $0x8] sm:$0x77] }
 0x33e   : > { %v1538_v28 = vrot.slane %v1337_v15, %v7121_v22 }
 0x340   : > { %v5555_v41 = vpop.permute.xlu1 %2648 }
 0x341   : > { %7101 = vst [vmem:[#allocation70_spill] sm:$0xff] %v5555_v41 }
 0x344   : > { %v5562_v51 = vpop.permute.xlu1 %2638 }
 0x345   : > { %7102 = vst [vmem:[#allocation71_spill] sm:$0xff] %v5562_v51 }
 0x348   : > { %v5567_v3 = vpop.permute.xlu1 %2853 }
 0x349   : > { %7103 = vst [vmem:[#allocation72_spill] sm:$0xff] %v5567_v3 }
 0x34c   : > { %v5574_v12 = vpop.permute.xlu1 %2843 }
 0x34d   : > { %7104 = vst [vmem:[#allocation73_spill] sm:$0xff] %v5574_v12 }
 0x350   : > { %v5581_v14 = vpop.permute.xlu1 %2833 }
 0x351   : > { %7105 = vst [vmem:[#allocation74_spill] sm:$0xff] %v5581_v14 }
 0x354   : > { %v5586_v7 = vpop.permute.xlu1 %2823 }
 0x355   : > { %7106 = vst [vmem:[#allocation75_spill] sm:$0xff] %v5586_v7  ;;  %v5632_v7 = vpop.permute.xlu0 %1149 }
 0x358   : > { %v5593_v0 = vpop.permute.xlu1 %3038 }
 0x359   : > { %7107 = vst [vmem:[#allocation76_spill] sm:$0xff] %v5593_v0  ;;  %v5644_v51 = vpop.permute.xlu0 %1139 }
 0x35c   : > { %v5600_v25 = vpop.permute.xlu1 %3028 }
 0x35d   : > { %7108 = vst [vmem:[#allocation77_spill] sm:$0xff] %v5600_v25  ;;  %v5621_v25 = vrot.slane %v3288_v5, %v4905_v50 }
 0x35f   : > { %7113 = vst [vmem:[#allocation80_spill] sm:$0xff] %v5621_v25 }
 0x360   : > { %v5608_v61 = vpop.permute.xlu1 %3018 }
 0x361   : > { %7109 = vst [vmem:[#allocation78_spill] sm:$0xff] %v5608_v61  ;;  %v5624_v61 = vrot.slane %v3350_v11, %v7110_v56 }
 0x364   : > { %v3273_v0 = vpop.permute.xlu1 %3272 }
 0x365   : > { %v3311_v42 = vmul.f32 %v5618_v24, %v3273_v0  ;;  %v3312_v5 = vmul.f32 %v5621_v25, %v3273_v0  ;;  %v1282_v0 = vld [vmem:[%s6893_s10] sm:$0x7] }
 0x366   : > { %1285 = vperm.xlu1 %4469, %v1282_v0   ;;  %v1390_v0 = vrot.slane %v1337_v15, %v4905_v50 }
 0x368   : > { %v3341_v14 = vpop.permute.xlu1 %3340  ;;  %v5691_v27 = vrot.slane %v1390_v0, %v4905_v50 }
 0x369   : > { %v3377_v17 = vmul.f32 %v5624_v61, %v3341_v14  ;;  %v3378_v11 = vmul.f32 %v5627_v29, %v3341_v14  ;;  %v5653_v14 = vpop.permute.xlu0 %1129 }
 0x36b   : > { %v5638_v12 = vadd.f32 %v3377_v17, %v3311_v42  ;;  %v5640_v43 = vadd.f32 %v3378_v11, %v3312_v5  ;;  %v1394_v42 = vrot.slane %v1337_v15, %v4911_v53  ;;  %v1460_v5 = vrot.slane %v1337_v15, %v7111_v36 }
 0x36c   : > { %v5642_v3 = vpop.permute.xlu1 %3008 }
 0x36d   : > { %7115 = vst [vmem:[#allocation82_spill] sm:$0xff] %v5638_v12  ;;  %7116 = vst [vmem:[#allocation83_spill] sm:$0xff] %v5640_v43  ;;  %v1384_v55 = vpop.permute.xlu0 %1383  ;;  %v5667_v59 = vrot.slane %v1394_v42, %v4905_v50  ;;  %v5670_v54 = vrot.slane %v1460_v5, %v7110_v56 }
 0x36e   : > { %7117 = vst [vmem:[#allocation84_spill] sm:$0xff] %v5642_v3  ;;  %v1456_v3 = vrot.slane %v1337_v15, %v7110_v56 }
 0x36f   : > { %v1486_v49 = vmul.f32 %v5670_v54, %v5588_v40  ;;  %v1420_v19 = vmul.f32 %v5667_v59, %v1384_v55  ;;  %v1418_v23 = vmul.f32 %v5667_v59, %v7127_v31 }
 0x370   : > { %v5650_v41 = vpop.permute.xlu1 %3013  ;;  %v5682_v42 = vrot.slane %v1456_v3, %v7110_v56 }
 0x371   : > { %7118 = vst [vmem:[#allocation85_spill] sm:$0xff] %v5650_v41  ;;  %v1542_v41 = vrot.slane %v1337_v15, %v7120_v46  ;;  %v1374_v2 = vpop.permute.xlu0 %1373  ;;  %v1502_v21 = vadd.f32 %v1486_v49, %v1420_v19 }
 0x372   : > { %v1485_v3 = vmul.f32 %v5682_v42, %v5588_v40  ;;  %v5713_v40 = vrot.slane %v1538_v28, %v7121_v22  ;;  %v1483_v19 = vmul.f32 %v5682_v42, %v7122_v58  ;;  %v1417_v28 = vmul.f32 %v5691_v27, %v7127_v31  ;;  %v7131_v31 = vld [vmem:[#allocation20_spill] sm:$0xff] }
 0x373   : > { %v5688_v4 = vrot.slane %v1542_v41, %v7121_v22  ;;  %v1419_v41 = vmul.f32 %v5691_v27, %v1384_v55 }
 0x374   : > { %v5655_v63 = vpop.permute.xlu1 %3426  ;;  %v1565_v50 = vmul.f32 %v5713_v40, %v5557_v1 }
 0x375   : > { %7119 = vst [vmem:[#allocation86_spill] sm:$0xff] %v5655_v63  ;;  %v1631_v53 = vpop.permute.xlu0 %1630  ;;  %v1480_v63 = vmul.f32 %v5670_v54, %v7131_v31 }
 0x378   : > { %v3263_v6 = vpop.permute.xlu1 %3262 }
 0x379   : > { %v3307_v33 = vmul.f32 %v5618_v24, %v3263_v6  ;;  %v3308_v26 = vmul.f32 %v5621_v25, %v3263_v6  ;;  %v1484_v6 = vmul.f32 %v5670_v54, %v7122_v58  ;;  %v1499_v58 = vadd.f32 %v1483_v19, %v1417_v28 }
 0x37b   : > { %v1500_v49 = vadd.f32 %v1484_v6, %v1418_v23  ;;  %v7129_v6 = vld [vmem:[#allocation19_spill] sm:$0xff] }
 0x37c   : > { %v3333_v16 = vpop.permute.xlu1 %3332 }
 0x37d   : > { %v3373_v5 = vmul.f32 %v5624_v61, %v3333_v16  ;;  %v3374_v18 = vmul.f32 %v5627_v29, %v3333_v16  ;;  %v7124_v16 = vld [vmem:[#allocation18_spill] sm:$0xff] }
 0x37e   : > { %v1568_v15 = vmul.f32 %v5688_v4, %v7124_v16 }
 0x37f   : > { %v5699_v30 = vadd.f32 %v3373_v5, %v3307_v33  ;;  %v5706_v0 = vadd.f32 %v3374_v18, %v3308_v26  ;;  %v1566_v5 = vmul.f32 %v5688_v4, %v5557_v1  ;;  %v1567_v26 = vmul.f32 %v5713_v40, %v7124_v16  ;;  %v7132_v1 = vld [vmem:[#allocation23_spill] sm:$0xff] }
 0x380   : > { %v5708_v32 = vpop.permute.xlu1 %3336  ;;  %v1501_v18 = vadd.f32 %v1485_v3, %v1419_v41  ;;  %v1584_v55 = vadd.f32 %v1568_v15, %v1502_v21  ;;  %v1413_v16 = vmul.f32 %v5691_v27, %v7129_v6 }
 0x381   : > { %7123 = vst [vmem:[#allocation15_spill] sm:$0xff] %v5699_v30  ;;  %7125 = vst [vmem:[#allocation18_spill] sm:$0xff] %v5706_v0  ;;  %v1582_v23 = vadd.f32 %v1566_v5, %v1500_v49  ;;  %v7133_v5 = vld [vmem:[#allocation21_spill] sm:$0xff] }
 0x382   : > { %7126 = vst [vmem:[#allocation87_spill] sm:$0xff] %v5708_v32  ;;  %v1583_v3 = vadd.f32 %v1567_v26, %v1501_v18  ;;  %v1648_v21 = vadd.f32 %v1631_v53, %v1584_v55  ;;  %v1479_v32 = vmul.f32 %v5682_v42, %v7131_v31  ;;  %v1481_v49 = vmul.f32 %v5682_v42, %v7133_v5 }
 0x383   : > { %v1646_v19 = vadd.f32 %v7132_v1, %v1582_v23  ;;  %v1482_v26 = vmul.f32 %v5670_v54, %v7133_v5  ;;  %v1415_v18 = vmul.f32 %v5691_v27, %v1374_v2  ;;  %v1416_v55 = vmul.f32 %v5667_v59, %v1374_v2 }
 0x384   : > { %v5725_v36 = vpop.permute.xlu1 %3418  ;;  %v1562_v31 = vmul.f32 %v5688_v4, %v5569_v34  ;;  %v5754_v0 = vadd.f32 %v1631_v53, %v1583_v3  ;;  %v1664_v23 = vmax.f32 %v1648_v21, 0.0  ;;  %v1495_v12 = vadd.f32 %v1479_v32, %v1413_v16 }
 0x385   : > { %7128 = vst [vmem:[#allocation14_spill] sm:$0xff] %v5725_v36  ;;  %v1414_v36 = vmul.f32 %v5667_v59, %v7129_v6  ;;  %v1581_v6 = vadd.f32 %v1565_v50, %v1499_v58  ;;  %v1662_v2 = vmax.f32 %v1646_v19, 0.0  ;;  %v1497_v22 = vadd.f32 %v1481_v49, %v1415_v18  ;;  %v7135_v58 = vld [vmem:[#allocation22_spill] sm:$0xff] }
 0x386   : > { %v1498_v50 = vadd.f32 %v1482_v26, %v1416_v55  ;;  %v1563_v39 = vmul.f32 %v5713_v40, %v7135_v58  ;;  %v5767_v3 = vmul.f32 %v5713_v40, %v5579_v9  ;;  %v1560_v32 = vmul.f32 %v5688_v4, %v5579_v9 }
 0x387   : > { %v1496_v5 = vadd.f32 %v1480_v63, %v1414_v36  ;;  %v5759_v46 = vadd.f32 %v7132_v1, %v1581_v6  ;;  %v1475_v36 = vmul.f32 %v5682_v42, %v5598_v37  ;;  %v1476_v63 = vmul.f32 %v5670_v54, %v5598_v37  ;;  %v7136_v37 = vld [vmem:[#allocation24_spill] sm:$0xff] }
 0x388   : > { %v5735_v41 = vpop.permute.xlu1 %3519  ;;  %v5777_v16 = vmul.f32 %v5682_v42, %v5610_v57  ;;  %v5781_v21 = vmul.f32 %v5670_v54, %v5610_v57  ;;  %v5789_v55 = vpack.c.bf16 %v1664_v23, %v1662_v2  ;;  %v1409_v6 = vmul.f32 %v5691_v27, %v7136_v37  ;;  %v7138_v23 = vld [vmem:[#allocation25_spill] sm:$0xff] }
 0x389   : > { %7130 = vst [vmem:[#allocation19_spill] sm:$0xff] %v5735_v41  ;;  %v1561_v41 = vmul.f32 %v5713_v40, %v5569_v34  ;;  %v1564_v34 = vmul.f32 %v5688_v4, %v7135_v58  ;;  %v5787_v18 = vadd.f32 %v1562_v31, %v1496_v5  ;;  %v5793_v58 = vadd.f32 %v1563_v39, %v1497_v22  ;;  %v7139_v22 = vld [vmem:[#allocation26_spill] sm:$0xff] }
 0x38a   : > { %v1410_v31 = vmul.f32 %v5667_v59, %v7136_v37  ;;  %v1412_v39 = vmul.f32 %v5667_v59, %v7138_v23  ;;  %v1478_v5 = vmul.f32 %v5670_v54, %v7139_v22 }
 0x38b   : > { %v5785_v26 = vadd.f32 %v1561_v41, %v1495_v12 }
 0x38c   : > { %v5756_v43 = vpop.permute.xlu1 %3252 }
 0x38d   : > { %7134 = vst [vmem:[#allocation20_spill] sm:$0xff] %v5756_v43  ;;  %v5795_v43 = vadd.f32 %v1564_v34, %v1498_v50  ;;  %v7140_v34 = vld [vmem:[#allocation12_spill] sm:$0xff] }
 0x390   : > { %v3258_v49 = vpop.permute.xlu1 %3257 }
 0x391   : > { %v3305_v12 = vmul.f32 %v5618_v24, %v3258_v49  ;;  %v3306_v41 = vmul.f32 %v5621_v25, %v3258_v49 }
 0x394   : > { %v3329_v50 = vpop.permute.xlu1 %3328 }
 0x395   : > { %v3371_v24 = vmul.f32 %v5624_v61, %v3329_v50  ;;  %v3372_v49 = vmul.f32 %v5627_v29, %v3329_v50  ;;  %v1494_v50 = vadd.f32 %v1478_v5, %v1412_v39  ;;  %v7143_v39 = vld [vmem:[#allocation27_spill] sm:$0xff] }
 0x396   : > { %v1558_v5 = vmul.f32 %v5688_v4, %v7143_v39 }
 0x39e   : > { %v5659_v17 = vpop.f32.mrf.mxu0 }
 0x3a0   : > { %v5661_v11 = vpop.f32.mrf.mxu0 }
 0x3a2   : > { %v5672_v45 = vpop.f32.mrf.mxu0 }
 0x3a4   : > { %v5678_v20 = vpop.f32.mrf.mxu0 }
 0x3a6   : > { %v5693_v47 = vpop.f32.mrf.mxu0 }
 0x3a8   : > { %v5704_v35 = vpop.f32.mrf.mxu0 }
 0x3aa   : > { %v5715_v33 = vpop.f32.mrf.mxu0 }
 0x3ac   : > { %v5723_v38 = vpop.f32.mrf.mxu0 }
 0x3ad   : > { %v1235_v37 = vadd.f32 %v5723_v38, %v5653_v14 }
 0x3ae   : > { %v5729_v56 = vpop.f32.mrf.mxu0 }
 0x3b0   : > { %v1240_v15 = vpop.f32.mrf.mxu0 }
 0x3b2   : > { %v1242_v28 = vpop.f32.mrf.mxu0 }
 0x3b3   : > { %v1243_v25 = vadd.f32 %v1242_v28, %v5644_v51 }
 0x3b4   : > { %v1244_v30 = vpop.f32.mrf.mxu0 }
 0x3b5   : > { %v1245_v57 = vadd.f32 %v1244_v30, %v5644_v51  ;;  %v7141_v51 = vld [vmem:[#allocation13_spill] sm:$0xff] }
 0x3b6   : > { %v1248_v53 = vpop.f32.mrf.mxu0  ;;  %v1231_v28 = vadd.f32 %v5704_v35, %v7141_v51  ;;  %v1557_v35 = vmul.f32 %v5713_v40, %v7143_v39 }
 0x3b7   : > { %v1249_v30 = vadd.f32 %v1248_v53, %v7137_v10  ;;  %v1268_v60 = vmax.f32 %v1245_v57, 0.0  ;;  %v5818_v53 = vadd.f32 %v3372_v49, %v3306_v41  ;;  %v1233_v57 = vadd.f32 %v5715_v33, %v5653_v14 }
 0x3b8   : > { %v1250_v19 = vpop.f32.mrf.mxu0  ;;  %v1264_v49 = vmax.f32 %v1235_v37, 0.0 }
 0x3b9   : > { %v1251_v48 = vadd.f32 %v1250_v19, %v7137_v10  ;;  %v1241_v19 = vadd.f32 %v1240_v15, %v7140_v34  ;;  %v5816_v10 = vadd.f32 %v3371_v24, %v3305_v12  ;;  %v1477_v15 = vmul.f32 %v5682_v42, %v7139_v22 }
 0x3ba   : > { %v1252_v1 = vpop.f32.mrf.mxu0  ;;  %v1269_v38 = vmax.f32 %v1249_v30, 0.0  ;;  %v1491_v24 = vadd.f32 %v1475_v36, %v1409_v6  ;;  %v1267_v12 = vmax.f32 %v1243_v25, 0.0  ;;  %v7144_v25 = vld [vmem:[#allocation16_spill] sm:$0xff]  ;;  %v1349_v36 = vpop.permute.xlu0 %1348  ;;  %v1263_v6 = vmax.f32 %v1233_v57, 0.0 }
 0x3bb   : > { %v1253_v9 = vadd.f32 %v1252_v1, %v5632_v7  ;;  %v1270_v44 = vmax.f32 %v1251_v48, 0.0  ;;  %v1266_v48 = vmax.f32 %v1241_v19, 0.0  ;;  %v1221_v14 = vadd.f32 %v5661_v11, %v7144_v25  ;;  %v7147_v11 = vld [vmem:[#allocation28_spill] sm:$0xff] }
 0x3bc   : > { %v1254_v2 = vpop.f32.mrf.mxu0  ;;  %v1642_v37 = vadd.f32 %v7147_v11, %v5787_v18 }
 0x3bd   : > { %v1255_v1 = vadd.f32 %v1254_v2, %v5632_v7  ;;  %v1271_v13 = vmax.f32 %v1253_v9, 0.0  ;;  %v1411_v7 = vmul.f32 %v5691_v27, %v7138_v23  ;;  %v1239_v2 = vadd.f32 %v5729_v56, %v7140_v34 }
 0x3be   : > { %v1492_v23 = vadd.f32 %v1476_v63, %v1410_v31  ;;  %v1279_v29 = vpack.c.bf16 %v1268_v60, %v1266_v48  ;;  %v7145_v60 = vld [vmem:[#allocation30_spill] sm:$0xff]  ;;  %v7146_v31 = vld [vmem:[#allocation31_spill] sm:$0xff]  ;;  %v1406_v34 = vmul.f32 %v5667_v59, %v1349_v36 }
 0x3bf   : > { %v1272_v62 = vmax.f32 %v1255_v1, 0.0  ;;  %v1280_v41 = vpack.c.bf16 %v1271_v13, %v1269_v38  ;;  %v7142_v1 = vld [vmem:[#allocation17_spill] sm:$0xff]  ;;  %v1493_v56 = vadd.f32 %v1477_v15, %v1411_v7  ;;  %v1576_v13 = vadd.f32 %v1560_v32, %v1494_v50 }
 0x3c0   : > { %v1225_v22 = vadd.f32 %v5678_v20, %v7142_v1  ;;  %v1262_v20 = vmax.f32 %v1231_v28, 0.0  ;;  %v1408_v33 = vmul.f32 %v5667_v59, %v7145_v60  ;;  %v1223_v63 = vadd.f32 %v5672_v45, %v7142_v1  ;;  %v7148_v45 = vld [vmem:[#allocation29_spill] sm:$0xff] }
 0x3c1   : > { %v1281_v9 = vpack.c.bf16 %v1272_v62, %v1270_v44  ;;  %v1229_v44 = vadd.f32 %v5693_v47, %v7141_v51  ;;  %v1265_v62 = vmax.f32 %v1239_v2, 0.0  ;;  %v1472_v30 = vmul.f32 %v5670_v54, %v7146_v31 }
 0x3c2   : > { %v1260_v32 = vmax.f32 %v1225_v22, 0.0  ;;  %v1277_v19 = vpack.c.bf16 %v1264_v49, %v1262_v20  ;;  %v1219_v7 = vadd.f32 %v5659_v17, %v7144_v25  ;;  %v1644_v2 = vadd.f32 %v7148_v45, %v5795_v43  ;;  %v7149_v17 = vld [vmem:[#allocation32_spill] sm:$0xff] }
 0x3c3   : > { %1299 = vmatprep.subr.bf16.mxu1 %v1281_v9  ;;  %v1278_v47 = vpack.c.bf16 %v1267_v12, %v1265_v62  ;;  %v1261_v15 = vmax.f32 %v1229_v44, 0.0  ;;  %v1471_v38 = vmul.f32 %v5682_v42, %v7146_v31  ;;  %v1405_v54 = vmul.f32 %v5691_v27, %v1349_v36  ;;  %v7150_v9 = vld [vmem:[#allocation33_spill] sm:$0xff] }
 0x3c4   : > { %1300 = vmatpush1.bf16.msra.mxu1 %v1280_v41  ;;  %v1258_v59 = vmax.f32 %v1221_v14, 0.0  ;;  %v1407_v50 = vmul.f32 %v5691_v27, %v7145_v60  ;;  %v1490_v18 = vadd.f32 %v5781_v21, %v1408_v33  ;;  %v1259_v51 = vmax.f32 %v1223_v63, 0.0 }
 0x3c5   : > { %1301 = vmatprep.subr.bf16.mxu1 %v1279_v29  ;;  %v1574_v29 = vadd.f32 %v1558_v5, %v1492_v23  ;;  %v1276_v28 = vpack.c.bf16 %v1263_v6, %v1261_v15  ;;  %v1554_v48 = vmul.f32 %v5688_v4, %v7149_v17  ;;  %v1556_v43 = vmul.f32 %v5688_v4, %v7150_v9  ;;  %v1606_v23 = vpop.permute.xlu0 %1605  ;;  %v7151_v5 = vld [vmem:[#allocation34_spill] sm:$0xff] }
 0x3c6   : > { %v1488_v57 = vadd.f32 %v1472_v30, %v1406_v34  ;;  %v1275_v12 = vpack.c.bf16 %v1260_v32, %v1258_v59  ;;  %v1641_v42 = vadd.f32 %v7147_v11, %v5785_v26  ;;  %v1575_v41 = vadd.f32 %v5767_v3, %v1493_v56  ;;  %v4482_v59 = vld [vmem:[%s6886_s3] sm:$0xff]  }
 0x3c7   : > { %v1573_v1 = vadd.f32 %v1557_v35, %v1491_v24  ;;  %v1257_v27 = vmax.f32 %v1219_v7, 0.0  ;;  %v1658_v21 = vmax.f32 %v1642_v37, 0.0  ;;  %v1643_v22 = vadd.f32 %v7148_v45, %v5793_v58  ;;  %v1273_v58 = vld [vmem:[%s6892_s9] sm:$0x3] }
 0x3c8   : > { %1302 = vmatpush1.bf16.msra.mxu1 %v1278_v47  ;;  %v1553_v49 = vmul.f32 %v5713_v40, %v7149_v17  ;;  %v1487_v39 = vadd.f32 %v1471_v38, %v1405_v54  ;;  %v1489_v4 = vadd.f32 %v5777_v16, %v1407_v50  ;;  %v1555_v26 = vmul.f32 %v5713_v40, %v7150_v9  ;;  %v4483_v50 = vld [vmem:[%s6886_s3 + $0x8] sm:$0xff]  }
 0x3c9   : > { %1303 = vmatprep.subr.bf16.mxu1 %v1277_v19  ;;  %v1640_v3 = vadd.f32 %v7151_v5, %v1576_v13  ;;  %v1274_v56 = vpack.c.bf16 %v1259_v51, %v1257_v27  ;;  %v1660_v24 = vmax.f32 %v1644_v2, 0.0  ;;  %v1570_v44 = vadd.f32 %v1554_v48, %v1488_v57  ;;  %v1601_v63 = vpop.permute.xlu0 %1600  ;;  %v4485_v51 = vld [vmem:[%s6886_s3 + $0x18] sm:$0xff]  }
 0x3ca   : > { %v1638_v62 = vadd.f32 %v1606_v23, %v1574_v29  ;;  %v1572_v35 = vadd.f32 %v1556_v43, %v1490_v18  ;;  %v7152_v25 = vmax.f32 %v5759_v46, 0.0  ;;  %v7153_v14 = vmax.f32 %v5754_v0, 0.0  ;;  %v7154_v46 = vld [vmem:[#allocation35_spill] sm:$0xff] }
 0x3cb   : > { %v1657_v20 = vmax.f32 %v1641_v42, 0.0  ;;  %v1659_v60 = vmax.f32 %v1643_v22, 0.0  ;;  %v1569_v40 = vadd.f32 %v1553_v49, %v1487_v39  ;;  %v1639_v13 = vadd.f32 %v7151_v5, %v1575_v41  ;;  %v4484_v18 = vld [vmem:[%s6886_s3 + $0x10] sm:$0xff]  }
 0x3cc   : > { %1304 = vmatpush1.bf16.msra.mxu1 %v1276_v28  ;;  %v1679_v16 = vpack.c.bf16 %v7153_v14, %v7152_v25  ;;  %v1656_v33 = vmax.f32 %v1640_v3, 0.0  ;;  %v1637_v36 = vadd.f32 %v1606_v23, %v1573_v1  ;;  %v1571_v6 = vadd.f32 %v1555_v26, %v1489_v4  ;;  %v5907_v28 = vpop.permute.xlu1 %3406 }
 0x3cd   : > { %1305 = vmatprep.subr.bf16.mxu1 %v1275_v12  ;;  %v1654_v47 = vmax.f32 %v1638_v62, 0.0  ;;  %v1636_v31 = vadd.f32 %v1601_v63, %v1572_v35  ;;  %v1678_v30 = vpack.c.bf16 %v1660_v24, %v1658_v21  ;;  %v1634_v34 = vadd.f32 %v7154_v46, %v1570_v44 }
 0x3ce   : > { %v1677_v0 = vpack.c.bf16 %v1659_v60, %v1657_v20  ;;  %v1655_v32 = vmax.f32 %v1639_v13, 0.0  ;;  %v1633_v19 = vadd.f32 %v7154_v46, %v1569_v40  ;;  %v1635_v11 = vadd.f32 %v1601_v63, %v1571_v6 }
 0x3cf   : > { %v1652_v37 = vmax.f32 %v1636_v31, 0.0  ;;  %v1676_v29 = vpack.c.bf16 %v1656_v33, %v1654_v47  ;;  %v1650_v7 = vmax.f32 %v1634_v34, 0.0  ;;  %v1727_v31 = vpop.permute.xlu0 %1726 }
 0x3d0   : > { %1306 = vmatpush1.bf16.msra.mxu1 %v1274_v56  ;;  %v1649_v45 = vmax.f32 %v1633_v19, 0.0  ;;  %v1651_v2 = vmax.f32 %v1635_v11, 0.0  ;;  %v5909_v17 = vpop.permute.xlu1 %3509 }
 0x3d1   : > { %1769 = vmatprep.subr.bf16.mxu1 %v5789_v55  ;;  %v1653_v55 = vmax.f32 %v1637_v36, 0.0  ;;  %v1674_v38 = vpack.c.bf16 %v1652_v37, %v1650_v7  ;;  %7155 = vst [vmem:[#allocation23_spill] sm:$0xff] %v5909_v17  ;;  %v7171_v37 = vld [vmem:[#allocation36_spill] sm:$0xff] }
 0x3d2   : > { %v1673_v54 = vpack.c.bf16 %v1651_v2, %v1649_v45 }
 0x3d3   : > { %4283 = vmatmul.mubr.msk.bf16.vlgmr.msra.gmra.mxu1 %vm801_vm0, %v1273_v58  ;;  %v1675_v15 = vpack.c.bf16 %v1655_v32, %v1653_v55 }
 0x3d4   : > { %1770 = vmatpush1.bf16.msra.mxu1 %v1679_v16  ;;  %1793 = vmatprep.mubr.bf16.mxu1 %v7062_v8  ;;  %v5911_v48 = vpop.permute.xlu1 %3514 }
 0x3d5   : > { %1771 = vmatprep.subr.bf16.mxu1 %v1678_v30  ;;  %7156 = vst [vmem:[#allocation21_spill] sm:$0xff] %v5911_v48 }
 0x3d8   : > { %1772 = vmatpush1.bf16.msra.mxu1 %v1677_v0  ;;  %v5913_v9 = vpop.permute.xlu1 %3247  ;;  %v1717_v0 = vpop.permute.xlu0 %1716 }
 0x3d9   : > { %1773 = vmatprep.subr.bf16.mxu1 %v1676_v29 }
 0x3dc   : > { %1774 = vmatpush1.bf16.msra.mxu1 %v1675_v15  ;;  %v5915_v43 = vpop.permute.xlu1 %3316  ;;  %v1707_v15 = vpop.permute.xlu0 %1706 }
 0x3dd   : > { %1775 = vmatprep.subr.bf16.mxu1 %v1674_v38  ;;  %v7172_v38 = vld [vmem:[#allocation37_spill] sm:$0xff] }
 0x3e0   : > { %1776 = vmatpush1.bf16.msra.mxu1 %v1673_v54  ;;  %v5917_v57 = vpop.permute.xlu1 %3398 }
 0x3e3   : > { %4288 = vmatmul.mubr.msk.bf16.vlgmr.msra.gmra.mxu1 %vm801_vm0, %v4482_v59 }
 0x3e4   : > { %1803 = vmatprep.mubr.bf16.mxu1 %v7062_v8  ;;  %v5919_v12 = vpop.permute.xlu1 %3402 }
 0x3e8   : > { %v5921_v42 = vpop.permute.xlu1 %3504 }
 0x3e9   : > { %7157 = vst [vmem:[#allocation22_spill] sm:$0xff] %v5921_v42 }
 0x3eb   : > { %4289 = vmatmul.mubr.msk.bf16.gmra.mxu1 %vm801_vm0, %v4483_v50 }
 0x3ec   : > { %1813 = vmatprep.mubr.bf16.mxu1 %v7062_v8  ;;  %v5923_v41 = vpop.permute.xlu1 %3489 }
 0x3ed   : > { %7158 = vst [vmem:[#allocation24_spill] sm:$0xff] %v5923_v41 }
 0x3f0   : > { %v5925_v23 = vpop.permute.xlu1 %3615 }
 0x3f1   : > { %7159 = vst [vmem:[#allocation11_spill] sm:$0xff] %v5925_v23 }
 0x3f3   : > { %4290 = vmatmul.mubr.msk.bf16.gmra.mxu1 %vm801_vm0, %v4484_v18 }
 0x3f4   : > { %1823 = vmatprep.mubr.bf16.mxu1 %v7062_v8  ;;  %v5927_v1 = vpop.permute.xlu1 %3605 }
 0x3f5   : > { %7160 = vst [vmem:[#allocation25_spill] sm:$0xff] %v5927_v1 }
 0x3f8   : > { %v5929_v27 = vpop.permute.xlu1 %3595 }
 0x3f9   : > { %7161 = vst [vmem:[#allocation26_spill] sm:$0xff] %v5929_v27 }
 0x3fb   : > { %4291 = vmatmul.mubr.msk.bf16.gmra.mxu1 %vm801_vm0, %v4485_v51 }
 0x3fc   : > { %2163 = vmatprep.mubr.bf16.mxu1 %v7062_v8  ;;  %v5931_v21 = vpop.permute.xlu1 %3585 }
 0x3fd   : > { %7162 = vst [vmem:[#allocation12_spill] sm:$0xff] %v5931_v21 }
 0x400   : > { %v5933_v22 = vpop.permute.xlu1 %3800 }
 0x401   : > { %7163 = vst [vmem:[#allocation13_spill] sm:$0xff] %v5933_v22 }
 0x404   : > { %v5935_v49 = vpop.permute.xlu1 %3790 }
 0x405   : > { %7164 = vst [vmem:[#allocation17_spill] sm:$0xff] %v5935_v49 }
 0x408   : > { %v5937_v39 = vpop.permute.xlu1 %3780 }
 0x409   : > { %7165 = vst [vmem:[#allocation27_spill] sm:$0xff] %v5937_v39  ;;  %v7178_v39 = vld [vmem:[#allocation40_spill] sm:$0xff] }
 0x40c   : > { %v5939_v4 = vpop.permute.xlu1 %3770 }
 0x40d   : > { %7166 = vst [vmem:[#allocation16_spill] sm:$0xff] %v5939_v4 }
 0x410   : > { %v5941_v26 = vpop.permute.xlu1 %3985 }
 0x411   : > { %7167 = vst [vmem:[#allocation30_spill] sm:$0xff] %v5941_v26 }
 0x414   : > { %v5943_v5 = vpop.permute.xlu1 %3975 }
 0x415   : > { %7168 = vst [vmem:[#allocation31_spill] sm:$0xff] %v5943_v5 }
 0x418   : > { %v5945_v3 = vpop.permute.xlu1 %3965 }
 0x419   : > { %7169 = vst [vmem:[#allocation28_spill] sm:$0xff] %v5945_v3 }
 0x41c   : > { %v5947_v56 = vpop.permute.xlu1 %3955 }
 0x41d   : > { %7170 = vst [vmem:[#allocation29_spill] sm:$0xff] %v5947_v56  ;;  %v7177_v56 = vld [vmem:[#allocation39_spill] sm:$0xff] }
 0x420   : > { %v1286_v24 = vpop.permute.xlu1 %1285 }
 0x493   : > { %v1325_v44 = vpop.f32.mrf.mxu1 }
 0x494   : > { %v1326_v62 = vadd.f32 %v1325_v44, %v1286_v24 }
 0x495   : > { %v1327_v35 = vpop.f32.mrf.mxu1 }
 0x496   : > { %v1328_v58 = vadd.f32 %v1327_v35, %v1286_v24 }
 0x497   : > { %v1329_v25 = vpop.f32.mrf.mxu1 }
 0x498   : > { %v1334_v14 = vcombine.low %v1326_v62, %v1328_v58 }
 0x499   : > { %v1330_v16 = vpop.f32.mrf.mxu1 }
 0x49a   : > { %1336 = vst [vmem:[%s5952_s25] sm:$0x77] %v1334_v14 }
 0x4a3   : > { %v1795_v20 = vpop.f32.mrf.mxu1 }
 0x4a5   : > { %v1797_v60 = vpop.f32.mrf.mxu1 }
 0x4a7   : > { %v1799_v40 = vpop.f32.mrf.mxu1 }
 0x4a9   : > { %v1801_v13 = vpop.f32.mrf.mxu1 }
 0x4ab   : > { %v1805_v33 = vpop.f32.mrf.mxu1 }
 0x4ad   : > { %v1807_v36 = vpop.f32.mrf.mxu1 }
 0x4ae   : > { %v1808_v25 = vadd.f32 %v1807_v36, %v5390_v52 }
 0x4af   : > { %v1809_v63 = vpop.f32.mrf.mxu1 }
 0x4b1   : > { %v1811_v6 = vpop.f32.mrf.mxu1 }
 0x4b2   : > { %v1812_v51 = vadd.f32 %v1811_v6, %v1707_v15  ;;  %v1806_v6 = vadd.f32 %v1805_v33, %v5390_v52 }
 0x4b3   : > { %v1815_v47 = vpop.f32.mrf.mxu1 }
 0x4b4   : > { %v1816_v35 = vadd.f32 %v1815_v47, %v7172_v38  ;;  %v1839_v47 = vmax.f32 %v1808_v25, 0.0  ;;  %v6028_v25 = vld [vmem:[%s6889_s6 + $0x28] sm:$0xff] }
 0x4b5   : > { %v1817_v30 = vpop.f32.mrf.mxu1 }
 0x4b6   : > { %v1818_v54 = vadd.f32 %v1817_v30, %v7172_v38  ;;  %v1841_v30 = vmax.f32 %v1812_v51, 0.0  ;;  %v5992_v51 = vld [vmem:[%s6885_s2 + $0x8] sm:$0xff] }
 0x4b7   : > { %v1819_v46 = vpop.f32.mrf.mxu1 }
 0x4b8   : > { %v1820_v50 = vadd.f32 %v1819_v46, %v1717_v0  ;;  %v1843_v14 = vmax.f32 %v1818_v54, 0.0  ;;  %v1842_v46 = vmax.f32 %v1816_v35, 0.0  ;;  %v6016_v35 = vld [vmem:[%s6887_s4 + $0x8] sm:$0xff] }
 0x4b9   : > { %v1821_v34 = vpop.f32.mrf.mxu1 }
 0x4ba   : > { %v1822_v11 = vadd.f32 %v1821_v34, %v1717_v0  ;;  %v1697_v34 = vpop.permute.xlu0 %1696  ;;  %v7173_v0 = vld [vmem:[#allocation38_spill] sm:$0xff] }
 0x4bb   : > { %v1825_v32 = vpop.f32.mrf.mxu1 }
 0x4bc   : > { %v1826_v45 = vadd.f32 %v1825_v32, %v7171_v37  ;;  %v1845_v24 = vmax.f32 %v1822_v11, 0.0  ;;  %v1844_v32 = vmax.f32 %v1820_v50, 0.0  ;;  %v1798_v11 = vadd.f32 %v1797_v60, %v7173_v0  ;;  %v4489_v50 = vld [vmem:[%s6888_s5 + $0x18] sm:$0xff]  }
 0x4bd   : > { %v1827_v55 = vpop.f32.mrf.mxu1 }
 0x4be   : > { %v1828_v29 = vadd.f32 %v1827_v55, %v7171_v37  ;;  %v1846_v58 = vmax.f32 %v1826_v45, 0.0  ;;  %v1810_v55 = vadd.f32 %v1809_v63, %v1707_v15  ;;  %v1802_v37 = vadd.f32 %v1801_v13, %v1697_v34 }
 0x4bf   : > { %v1829_v19 = vpop.f32.mrf.mxu1  ;;  %v1796_v63 = vadd.f32 %v1795_v20, %v7173_v0  ;;  %v1838_v15 = vmax.f32 %v1806_v6, 0.0  ;;  %v1835_v13 = vmax.f32 %v1798_v11, 0.0  ;;  %v4487_v20 = vld [vmem:[%s6888_s5 + $0x8] sm:$0xff]   ;;  %v4521_v6 = vld [vmem:[%s6884_s1 + $0x18] sm:$0xff] }
 0x4c0   : > { %v1830_v7 = vadd.f32 %v1829_v19, %v1727_v31  ;;  %v1847_v44 = vmax.f32 %v1828_v29, 0.0  ;;  %v1800_v29 = vadd.f32 %v1799_v40, %v1697_v34  ;;  %v1840_v36 = vmax.f32 %v1810_v55, 0.0  ;;  %v4486_v40 = vld [vmem:[%s6888_s5] sm:$0xff]   ;;  %v6040_v34 = vld [vmem:[%s6889_s6 + $0x8] sm:$0xff] }
 0x4c1   : > { %v1831_v2 = vpop.f32.mrf.mxu1  ;;  %v1837_v45 = vmax.f32 %v1802_v37, 0.0  ;;  %v1834_v33 = vmax.f32 %v1796_v63, 0.0  ;;  %v4519_v37 = vld [vmem:[%s6884_s1 + $0x30] sm:$0xff] }
 0x4c2   : > { %v1832_v59 = vadd.f32 %v1831_v2, %v1727_v31  ;;  %v1848_v18 = vmax.f32 %v1830_v7, 0.0  ;;  %v1863_v31 = vpack.c.bf16 %v1845_v24, %v1843_v14  ;;  %v1862_v7 = vpack.c.bf16 %v1844_v32, %v1842_v46  ;;  %v5998_v24 = vld [vmem:[%s6887_s4 + $0x38] sm:$0xff]  ;;  %v1912_v14 = vpop.permute.xlu0 %1911 }
 0x4c3   : > { %v1861_v2 = vpack.c.bf16 %v1841_v30, %v1839_v47  ;;  %v1836_v38 = vmax.f32 %v1800_v29, 0.0  ;;  %v1860_v54 = vpack.c.bf16 %v1840_v36, %v1838_v15  ;;  %v1859_v52 = vpack.c.bf16 %v1837_v45, %v1835_v13  ;;  %v4520_v30 = vld [vmem:[%s6884_s1 + $0x20] sm:$0xff]  ;;  %v4522_v36 = vld [vmem:[%s6884_s1 + $0x38] sm:$0xff] }
 0x4c4   : > { %v1849_v62 = vmax.f32 %v1832_v59, 0.0  ;;  %v1864_v19 = vpack.c.bf16 %v1848_v18, %v1846_v58  ;;  %v4488_v59 = vld [vmem:[%s6888_s5 + $0x10] sm:$0xff]   ;;  %v6022_v58 = vld [vmem:[%s6889_s6 + $0x38] sm:$0xff]  ;;  %v7174_v32 = vmov 2   ;;  %v7175_v47 = vmov 1  }
 0x4c5   : > { %v1858_v60 = vpack.c.bf16 %v1836_v38, %v1834_v33  ;;  %v5986_v18 = vld [vmem:[%s6885_s2 + $0x10] sm:$0xff]  ;;  %v4524_v38 = vld [vmem:[%s6884_s1 + $0x8] sm:$0xff] }
 0x4c6   : > { %v1865_v16 = vpack.c.bf16 %v1849_v62, %v1847_v44  ;;  %2552 = vperm.xlu0 %4451, %v5986_v18   ;;  %v6004_v44 = vld [vmem:[%s6887_s4 + $0x28] sm:$0xff]  ;;  %v6010_v62 = vld [vmem:[%s6887_s4 + $0x18] sm:$0xff]  ;;  %v1902_v55 = vpop.permute.xlu0 %1901 }
 0x4c8   : > { %1954 = vmatprep.subr.bf16.mxu0 %v1865_v16  ;;  %v6034_v16 = vld [vmem:[%s6889_s6 + $0x18] sm:$0xff] }
 0x4c9   : > { %1955 = vmatpush1.bf16.msra.mxu0 %v1864_v19 }
 0x4ca   : > { %1956 = vmatprep.subr.bf16.mxu0 %v1863_v31  ;;  %2547 = vperm.xlu0 %4451, %v5992_v51   ;;  %v6044_v19 = vpop.permute.xlu0 %1891 }
 0x4cd   : > { %1957 = vmatpush1.bf16.msra.mxu0 %v1862_v7 }
 0x4ce   : > { %1958 = vmatprep.subr.bf16.mxu0 %v1861_v2  ;;  %2673 = vperm.xlu0 %4451, %v5998_v24   ;;  %v6052_v31 = vpop.permute.xlu0 %1881  ;;  %v4523_v2 = vld [vmem:[%s6884_s1 + $0x10] sm:$0xff] }
 0x4d1   : > { %1959 = vmatpush1.bf16.msra.mxu0 %v1860_v54 }
 0x4d2   : > { %1960 = vmatprep.subr.bf16.mxu0 %v1859_v52  ;;  %2663 = vperm.xlu0 %4451, %v6004_v44   ;;  %v6061_v11 = vpop.permute.xlu0 %2475  ;;  %v6080_v52 = vld [vmem:[%s6891_s8 + $0x38] sm:$0xff] }
 0x4d5   : > { %1961 = vmatpush1.bf16.msra.mxu0 %v1858_v60 }
 0x4d6   : > { %2653 = vperm.xlu0 %4451, %v6010_v62   ;;  %v6072_v63 = vpop.permute.xlu0 %2467 }
 0x4d8   : > { %4296 = vmatmul.mubr.msk.bf16.vlgmr.msra.gmra.mxu0 %vm801_vm0, %v4486_v40 }
 0x4d9   : > { %1988 = vmatprep.mubr.bf16.mxu0 %v7062_v8 }
 0x4da   : > { %2643 = vperm.xlu0 %4451, %v6016_v35   ;;  %v6082_v33 = vpop.permute.xlu0 %2463 }
 0x4de   : > { %2858 = vperm.xlu0 %4451, %v6022_v58  }
 0x4e0   : > { %4297 = vmatmul.mubr.msk.bf16.gmra.mxu0 %vm801_vm0, %v4487_v20  ;;  %v6089_v20 = vld [vmem:[%s6891_s8 + $0x28] sm:$0xff] }
 0x4e1   : > { %1998 = vmatprep.mubr.bf16.mxu0 %v7062_v8 }
 0x4e2   : > { %2848 = vperm.xlu0 %4451, %v6028_v25  }
 0x4e6   : > { %2838 = vperm.xlu0 %4451, %v6034_v16  }
 0x4e8   : > { %4298 = vmatmul.mubr.msk.bf16.gmra.mxu0 %vm801_vm0, %v4488_v59 }
 0x4e9   : > { %2008 = vmatprep.mubr.bf16.mxu0 %v7062_v8 }
 0x4ea   : > { %2828 = vperm.xlu0 %4451, %v6040_v34  }
 0x4ee   : > { %4456 = vset.pattern.permute.xlu0 %v7174_v32 }
 0x4ef   : > { %3422 = vperm.xlu0 %4456, %v4519_v37   ;;  %v6097_v37 = vld [vmem:[%s6891_s8 + $0x18] sm:$0xff] }
 0x4f0   : > { %4299 = vmatmul.mubr.msk.bf16.gmra.mxu0 %vm801_vm0, %v4489_v50  ;;  %v6091_v50 = vpop.permute.xlu0 %2397 }
 0x4f1   : > { %2270 = vmatprep.mubr.bf16.mxu0 %v7062_v8  ;;  %7176 = vst [vmem:[#allocation32_spill] sm:$0xff] %v6091_v50 }
 0x4f3   : > { %3414 = vperm.xlu0 %4456, %v4520_v30  }
 0x4f7   : > { %3410 = vperm.xlu0 %4456, %v4521_v6  }
 0x4fb   : > { %4464 = vset.pattern.permute.xlu0 %v7175_v47  ;;  %v6100_v47 = vpop.permute.xlu0 %2377 }
 0x4fc   : > { %3344 = vperm.xlu0 %4464, %v4522_v36  }
 0x4ff   : > { %v6105_v1 = vpop.permute.xlu0 %2373 }
 0x500   : > { %3324 = vperm.xlu0 %4464, %v4523_v2  }
 0x504   : > { %3320 = vperm.xlu0 %4464, %v4524_v38  }
 0x508   : > { %4467 = vset.pattern.permute.xlu0 %v7062_v8 }
 0x509   : > { %3043 = vperm.xlu0 %4467, %v6080_v52  }
 0x50d   : > { %3033 = vperm.xlu0 %4467, %v6089_v20  }
 0x511   : > { %3023 = vperm.xlu0 %4467, %v6097_v37  }
 0x515   : > { %3277 = vperm.xlu0 %4467, %v4522_v36  }
 0x598   : > { %v6057_v46 = vpop.f32.mrf.mxu0 }
 0x59a   : > { %v6059_v0 = vpop.f32.mrf.mxu0 }
 0x59c   : > { %v6064_v29 = vpop.f32.mrf.mxu0 }
 0x59e   : > { %v1986_v7 = vpop.f32.mrf.mxu0 }
 0x5a0   : > { %v1990_v45 = vpop.f32.mrf.mxu0 }
 0x5a2   : > { %v1992_v15 = vpop.f32.mrf.mxu0 }
 0x5a4   : > { %v1994_v13 = vpop.f32.mrf.mxu0 }
 0x5a6   : > { %v1996_v54 = vpop.f32.mrf.mxu0 }
 0x5a7   : > { %v1997_v23 = vadd.f32 %v1996_v54, %v6044_v19  ;;  %v1995_v54 = vadd.f32 %v1994_v13, %v6044_v19 }
 0x5a8   : > { %v2000_v60 = vpop.f32.mrf.mxu0 }
 0x5aa   : > { %v2002_v40 = vpop.f32.mrf.mxu0 }
 0x5ab   : > { %v2003_v49 = vadd.f32 %v2002_v40, %v7178_v39 }
 0x5ac   : > { %v2004_v59 = vpop.f32.mrf.mxu0 }
 0x5ad   : > { %v2005_v21 = vadd.f32 %v2004_v59, %v1902_v55  ;;  %v1987_v59 = vadd.f32 %v1986_v7, %v6052_v31  ;;  %v4526_v7 = vld [vmem:[%s6884_s1] sm:$0xff] }
 0x5ae   : > { %v2006_v32 = vpop.f32.mrf.mxu0 }
 0x5af   : > { %v2007_v38 = vadd.f32 %v2006_v32, %v1902_v55  ;;  %v4525_v32 = vld [vmem:[%s6884_s1 + $0x28] sm:$0xff]  ;;  %v2028_v55 = vmax.f32 %v2003_v49, 0.0 }
 0x5b0   : > { %v2010_v30 = vpop.f32.mrf.mxu0  ;;  %3267 = vperm.xlu0 %4467, %v4525_v32  }
 0x5b1   : > { %v2011_v26 = vadd.f32 %v2010_v30, %v7177_v56  ;;  %v2030_v48 = vmax.f32 %v2007_v38, 0.0  ;;  %v2026_v30 = vmax.f32 %v1997_v23, 0.0  ;;  %v2022_v23 = vmax.f32 %v1987_v59, 0.0 }
 0x5b2   : > { %v2012_v6 = vpop.f32.mrf.mxu0 }
 0x5b3   : > { %v2013_v3 = vadd.f32 %v2012_v6, %v7177_v56  ;;  %v2001_v56 = vadd.f32 %v2000_v60, %v7178_v39  ;;  %v2031_v36 = vmax.f32 %v2011_v26, 0.0  ;;  %v2048_v6 = vpack.c.bf16 %v2030_v48, %v2028_v55  ;;  %v6119_v60 = vpop.permute.xlu0 %2096 }
 0x5b4   : > { %v2014_v2 = vpop.f32.mrf.mxu0 }
 0x5b5   : > { %v2015_v5 = vadd.f32 %v2014_v2, %v1912_v14  ;;  %v2032_v17 = vmax.f32 %v2013_v3, 0.0  ;;  %v2029_v3 = vmax.f32 %v2005_v21, 0.0  ;;  %v2027_v26 = vmax.f32 %v2001_v56, 0.0  ;;  %v7180_v2 = vld [vmem:[#allocation42_spill] sm:$0xff]  ;;  %v4490_v56 = vld [vmem:[%s6890_s7] sm:$0xff]  }
 0x5b6   : > { %v2016_v4 = vpop.f32.mrf.mxu0  ;;  %v1983_v49 = vadd.f32 %v6059_v0, %v7180_v2  ;;  %v2025_v21 = vmax.f32 %v1995_v54, 0.0  ;;  %v4527_v54 = vld [vmem:[%s4900_s29 + $0x18] sm:$0x77] }
 0x5b7   : > { %v2017_v22 = vadd.f32 %v2016_v4, %v1912_v14  ;;  %v2033_v27 = vmax.f32 %v2015_v5, 0.0  ;;  %v3486_v4 = vld [vmem:[%s6885_s2 + $0x38] sm:$0xff]  ;;  %v7179_v5 = vld [vmem:[#allocation41_spill] sm:$0xff]  ;;  %v2047_v19 = vpack.c.bf16 %v2029_v3, %v2027_v26  ;;  %v6130_v38 = vpop.permute.xlu0 %2086 }
 0x5b8   : > { %v1993_v14 = vadd.f32 %v1992_v15, %v7179_v5  ;;  %3524 = vperm.xlu0 %4467, %v3486_v4   ;;  %v1991_v39 = vadd.f32 %v1990_v45, %v7179_v5  ;;  %v1981_v45 = vadd.f32 %v6057_v46, %v7180_v2  ;;  %v2020_v0 = vmax.f32 %v1983_v49, 0.0  ;;  %v7193_v49 = vld [vmem:[#allocation82_spill] sm:$0xff] }
 0x5b9   : > { %v2034_v50 = vmax.f32 %v2017_v22, 0.0  ;;  %v2049_v22 = vpack.c.bf16 %v2033_v27, %v2031_v36  ;;  %v1985_v27 = vadd.f32 %v6064_v29, %v6052_v31  ;;  %v4491_v36 = vld [vmem:[%s6890_s7 + $0x8] sm:$0xff]  }
 0x5ba   : > { %v2023_v15 = vmax.f32 %v1991_v39, 0.0  ;;  %v2044_v31 = vpack.c.bf16 %v2022_v23, %v2020_v0  ;;  %v2019_v29 = vmax.f32 %v1981_v45, 0.0  ;;  %v7197_v45 = vld [vmem:[#allocation18_spill] sm:$0xff] }
 0x5bb   : > { %v2050_v40 = vpack.c.bf16 %v2034_v50, %v2032_v17  ;;  %v2024_v17 = vmax.f32 %v1993_v14, 0.0  ;;  %v2021_v13 = vmax.f32 %v1985_v27, 0.0  ;;  %v6137_v46 = vpop.permute.xlu0 %2076  ;;  %v7194_v27 = vld [vmem:[#allocation83_spill] sm:$0xff] }
 0x5bc   : > { %3242 = vperm.xlu0 %4467, %v4526_v7   ;;  %v2045_v50 = vpack.c.bf16 %v2025_v21, %v2023_v15 }
 0x5bd   : > { %2139 = vmatprep.subr.bf16.mxu1 %v2050_v40  ;;  %v2046_v48 = vpack.c.bf16 %v2026_v30, %v2024_v17  ;;  %v2043_v32 = vpack.c.bf16 %v2021_v13, %v2019_v29 }
 0x5be   : > { %2140 = vmatpush1.bf16.msra.mxu1 %v2049_v22 }
 0x5bf   : > { %2141 = vmatprep.subr.bf16.mxu1 %v2048_v6 }
 0x5c0   : > { %3499 = vperm.xlu0 %4467, %v5986_v18   ;;  %v6142_v18 = vpop.permute.xlu0 %2330 }
 0x5c2   : > { %2142 = vmatpush1.bf16.msra.mxu1 %v2047_v19 }
 0x5c3   : > { %2143 = vmatprep.subr.bf16.mxu1 %v2046_v48  ;;  %v7195_v48 = vld [vmem:[#allocation15_spill] sm:$0xff] }
 0x5c4   : > { %3494 = vperm.xlu0 %4467, %v5992_v51   ;;  %v6151_v51 = vpop.permute.xlu0 %2320 }
 0x5c6   : > { %2144 = vmatpush1.bf16.msra.mxu1 %v2045_v50 }
 0x5c7   : > { %2145 = vmatprep.subr.bf16.mxu1 %v2044_v31 }
 0x5c8   : > { %3620 = vperm.xlu0 %4467, %v5998_v24   ;;  %v4492_v24 = vld [vmem:[%s6890_s7 + $0x10] sm:$0xff]   ;;  %v6157_v4 = vpop.permute.xlu0 %2577 }
 0x5ca   : > { %2146 = vmatpush1.bf16.msra.mxu1 %v2043_v32 }
 0x5cc   : > { %3610 = vperm.xlu0 %4467, %v6004_v44   ;;  %v4493_v44 = vld [vmem:[%s6890_s7 + $0x18] sm:$0xff]  }
 0x5cd   : > { %4304 = vmatmul.mubr.msk.bf16.vlgmr.msra.gmra.mxu1 %vm801_vm0, %v4490_v56 }
 0x5ce   : > { %2173 = vmatprep.mubr.bf16.mxu1 %v7062_v8 }
 0x5d0   : > { %3600 = vperm.xlu0 %4467, %v6010_v62   ;;  %v6165_v62 = vpop.permute.xlu0 %2295 }
 0x5d4   : > { %3590 = vperm.xlu0 %4467, %v6016_v35   ;;  %v6171_v35 = vpop.permute.xlu0 %2552 }
 0x5d5   : > { %4305 = vmatmul.mubr.msk.bf16.gmra.mxu1 %vm801_vm0, %v4491_v36  ;;  %7181 = vst [vmem:[#allocation33_spill] sm:$0xff] %v6171_v35  ;;  %v7200_v36 = vld [vmem:[#allocation20_spill] sm:$0xff] }
 0x5d6   : > { %2183 = vmatprep.mubr.bf16.mxu1 %v7062_v8 }
 0x5d8   : > { %3805 = vperm.xlu0 %4467, %v6022_v58   ;;  %v6174_v58 = vpop.permute.xlu0 %2547 }
 0x5d9   : > { %7182 = vst [vmem:[#allocation34_spill] sm:$0xff] %v6174_v58  ;;  %v7240_v58 = vld [vmem:[#allocation43_spill] sm:$0xff] }
 0x5dc   : > { %3795 = vperm.xlu0 %4467, %v6028_v25   ;;  %v6178_v5 = vpop.permute.xlu0 %2673 }
 0x5dd   : > { %4306 = vmatmul.mubr.msk.bf16.gmra.mxu1 %vm801_vm0, %v4492_v24  ;;  %7183 = vst [vmem:[#allocation35_spill] sm:$0xff] %v6178_v5  ;;  %v7201_v24 = vld [vmem:[#allocation79_spill] sm:$0xff] }
 0x5de   : > { %2193 = vmatprep.mubr.bf16.mxu1 %v7062_v8 }
 0x5e0   : > { %3785 = vperm.xlu0 %4467, %v6034_v16   ;;  %v6181_v25 = vpop.permute.xlu0 %2663 }
 0x5e1   : > { %7184 = vst [vmem:[#allocation36_spill] sm:$0xff] %v6181_v25 }
 0x5e4   : > { %3775 = vperm.xlu0 %4467, %v6040_v34   ;;  %v6183_v14 = vpop.permute.xlu0 %2653 }
 0x5e5   : > { %4307 = vmatmul.mubr.msk.bf16.gmra.mxu1 %vm801_vm0, %v4493_v44  ;;  %7185 = vst [vmem:[#allocation37_spill] sm:$0xff] %v6183_v14  ;;  %v3303_v44 = vmul.f32 %v7201_v24, %v7200_v36 }
 0x5e6   : > { %2925 = vmatprep.mubr.bf16.mxu1 %v7062_v8 }
 0x5e8   : > { %3990 = vperm.xlu0 %4467, %v6080_v52   ;;  %v6185_v16 = vpop.permute.xlu0 %2643  ;;  %v7190_v52 = vld [vmem:[#allocation9_spill] sm:$0xff] }
 0x5e9   : > { %7186 = vst [vmem:[#allocation38_spill] sm:$0xff] %v6185_v16  ;;  %v3432_v3 = vrot.slane %v4527_v54, %v7190_v52 }
 0x5ec   : > { %3980 = vperm.xlu0 %4467, %v6089_v20   ;;  %v6187_v55 = vpop.permute.xlu0 %2858  ;;  %v7191_v20 = vld [vmem:[#allocation10_spill] sm:$0xff] }
 0x5ed   : > { %7187 = vst [vmem:[#allocation39_spill] sm:$0xff] %v6187_v55  ;;  %v3436_v22 = vrot.slane %v4527_v54, %v7191_v20  ;;  %v7202_v54 = vld [vmem:[#allocation80_spill] sm:$0xff] }
 0x5ef   : > { %v6202_v30 = vrot.slane %v3436_v22, %v7190_v52  ;;  %v3301_v22 = vmul.f32 %v7201_v24, %v5913_v9 }
 0x5f0   : > { %3970 = vperm.xlu0 %4467, %v6097_v37   ;;  %v6189_v40 = vpop.permute.xlu0 %2848  ;;  %v6199_v37 = vrot.slane %v3432_v3, %v7190_v52  ;;  %v3304_v3 = vmul.f32 %v7202_v54, %v7200_v36 }
 0x5f1   : > { %7188 = vst [vmem:[#allocation40_spill] sm:$0xff] %v6189_v40 }
 0x5f4   : > { %v6191_v34 = vpop.permute.xlu0 %2838 }
 0x5f5   : > { %7189 = vst [vmem:[#allocation41_spill] sm:$0xff] %v6191_v34 }
 0x5f8   : > { %v6196_v59 = vpop.permute.xlu0 %2828 }
 0x5f9   : > { %7192 = vst [vmem:[#allocation42_spill] sm:$0xff] %v6196_v59 }
 0x5fc   : > { %v3423_v6 = vpop.permute.xlu0 %3422 }
 0x5fd   : > { %v3459_v39 = vmul.f32 %v6199_v37, %v3423_v6  ;;  %v3460_v26 = vmul.f32 %v6202_v30, %v3423_v6  ;;  %v3302_v6 = vmul.f32 %v7202_v54, %v5913_v9 }
 0x5ff   : > { %v3475_v17 = vadd.f32 %v3459_v39, %v7193_v49  ;;  %v3476_v21 = vadd.f32 %v3460_v26, %v7194_v27  ;;  %v7203_v26 = vld [vmem:[#allocation81_spill] sm:$0xff] }
 0x600   : > { %v3415_v2 = vpop.permute.xlu0 %3414 }
 0x601   : > { %v3455_v19 = vmul.f32 %v6199_v37, %v3415_v2  ;;  %v3456_v23 = vmul.f32 %v6202_v30, %v3415_v2 }
 0x603   : > { %v6211_v7 = vadd.f32 %v3455_v19, %v7195_v48  ;;  %v6214_v15 = vadd.f32 %v3456_v23, %v7197_v45 }
 0x604   : > { %v3411_v0 = vpop.permute.xlu0 %3410 }
 0x605   : > { %7196 = vst [vmem:[#allocation9_spill] sm:$0xff] %v6211_v7  ;;  %7198 = vst [vmem:[#allocation10_spill] sm:$0xff] %v6214_v15  ;;  %v3453_v13 = vmul.f32 %v6199_v37, %v3411_v0  ;;  %v3454_v50 = vmul.f32 %v6202_v30, %v3411_v0 }
 0x607   : > { %v3469_v29 = vadd.f32 %v3453_v13, %v5816_v10  ;;  %v6220_v32 = vadd.f32 %v3454_v50, %v5818_v53 }
 0x608   : > { %v3345_v31 = vpop.permute.xlu0 %3344 }
 0x609   : > { %7199 = vst [vmem:[#allocation82_spill] sm:$0xff] %v6220_v32  ;;  %v3379_v9 = vmul.f32 %v5624_v61, %v3345_v31  ;;  %v3380_v50 = vmul.f32 %v7203_v26, %v3345_v31  ;;  %v7209_v31 = vld [vmem:[#allocation19_spill] sm:$0xff] }
 0x60a   : > { %v3540_v7 = vadd.f32 %v7209_v31, %v3476_v21  ;;  %v3451_v21 = vmul.f32 %v6199_v37, %v5907_v28 }
 0x60c   : > { %v3325_v56 = vpop.permute.xlu0 %3324  ;;  %v3556_v14 = vmax.f32 %v3540_v7, 0.0 }
 0x60d   : > { %v3369_v39 = vmul.f32 %v5624_v61, %v3325_v56  ;;  %v3370_v10 = vmul.f32 %v7203_v26, %v3325_v56 }
 0x60f   : > { %v3385_v53 = vadd.f32 %v3369_v39, %v3303_v44  ;;  %v3386_v49 = vadd.f32 %v3370_v10, %v3304_v3  ;;  %v7207_v3 = vld [vmem:[#allocation86_spill] sm:$0xff] }
 0x610   : > { %v3321_v2 = vpop.permute.xlu0 %3320  ;;  %v3461_v39 = vmul.f32 %v6199_v37, %v7207_v3 }
 0x611   : > { %v3367_v27 = vmul.f32 %v5624_v61, %v3321_v2  ;;  %v3368_v19 = vmul.f32 %v7203_v26, %v3321_v2 }
 0x613   : > { %v3383_v23 = vadd.f32 %v3367_v27, %v3301_v22  ;;  %v3384_v48 = vadd.f32 %v3368_v19, %v3302_v6  ;;  %v3462_v22 = vmul.f32 %v6202_v30, %v7207_v3  ;;  %v7208_v6 = vld [vmem:[#allocation87_spill] sm:$0xff] }
 0x614   : > { %v6234_v45 = vpop.permute.xlu0 %3043  ;;  %v3375_v10 = vmul.f32 %v5624_v61, %v7208_v6  ;;  %v3376_v2 = vmul.f32 %v7203_v26, %v7208_v6 }
 0x615   : > { %7204 = vst [vmem:[#allocation83_spill] sm:$0xff] %v6234_v45 }
 0x618   : > { %v6236_v0 = vpop.permute.xlu0 %3033 }
 0x619   : > { %7205 = vst [vmem:[#allocation15_spill] sm:$0xff] %v6236_v0  ;;  %v7210_v0 = vld [vmem:[#allocation14_spill] sm:$0xff] }
 0x61a   : > { %v3458_v32 = vmul.f32 %v6202_v30, %v7210_v0 }
 0x61c   : > { %v6238_v13 = vpop.permute.xlu0 %3023 }
 0x61d   : > { %7206 = vst [vmem:[#allocation18_spill] sm:$0xff] %v6238_v13  ;;  %v3539_v13 = vadd.f32 %v7209_v31, %v3475_v17 }
 0x620   : > { %v3278_v56 = vpop.permute.xlu0 %3277 }
 0x621   : > { %v3313_v36 = vmul.f32 %v7201_v24, %v3278_v56  ;;  %v3314_v44 = vmul.f32 %v7202_v54, %v3278_v56  ;;  %v3457_v56 = vmul.f32 %v6199_v37, %v7210_v0 }
 0x623   : > { %v3395_v27 = vadd.f32 %v3379_v9, %v3313_v36  ;;  %v3396_v19 = vadd.f32 %v3380_v50, %v3314_v44  ;;  %v3555_v36 = vmax.f32 %v3539_v13, 0.0 }
 0x625   : > { %v3477_v6 = vadd.f32 %v3461_v39, %v3395_v27  ;;  %v3478_v9 = vadd.f32 %v3462_v22, %v3396_v19 }
 0x62b   : > { %v3268_v45 = vpop.permute.xlu0 %3267 }
 0x62c   : > { %v3309_v15 = vmul.f32 %v7201_v24, %v3268_v45  ;;  %v3310_v3 = vmul.f32 %v7202_v54, %v3268_v45 }
 0x62e   : > { %v3391_v59 = vadd.f32 %v3375_v10, %v3309_v15  ;;  %v3392_v34 = vadd.f32 %v3376_v2, %v3310_v3  ;;  %v3452_v15 = vmul.f32 %v6202_v30, %v5907_v28  ;;  %v3946_v28 = vld [vmem:[%s6891_s8 + $0x8] sm:$0xff] }
 0x62f   : > { %3960 = vperm.xlu0 %4467, %v3946_v28  }
 0x630   : > { %v6260_v17 = vadd.f32 %v3457_v56, %v3391_v59  ;;  %v6262_v44 = vadd.f32 %v3458_v32, %v3392_v34  ;;  %v3449_v59 = vmul.f32 %v6199_v37, %v5919_v12  ;;  %v3450_v34 = vmul.f32 %v6202_v30, %v5919_v12 }
 0x631   : > { %v3467_v32 = vadd.f32 %v3451_v21, %v3385_v53  ;;  %v3468_v13 = vadd.f32 %v3452_v15, %v3386_v49  ;;  %v3448_v12 = vmul.f32 %v6202_v30, %v5917_v57  ;;  %v7221_v15 = vld [vmem:[#allocation6_spill] sm:$0xff] }
 0x632   : > { %7211 = vst [vmem:[#allocation20_spill] sm:$0xff] %v6260_v17  ;;  %7212 = vst [vmem:[#allocation79_spill] sm:$0xff] %v6262_v44  ;;  %v3465_v39 = vadd.f32 %v3449_v59, %v3383_v23 }
 0x633   : > { %v3525_v50 = vpop.permute.xlu0 %3524 }
 0x634   : > { %v3541_v55 = vadd.f32 %v3525_v50, %v3477_v6  ;;  %v3542_v40 = vadd.f32 %v3525_v50, %v3478_v9  ;;  %v2284_v50 = vld [vmem:[%s4900_s29 + $0x10] sm:$0x77]  ;;  %s4528_s29 = scalar_lea.vmem %s4194_s14, 512 }
 0x635   : > { %v2403_v59 = vrot.slane %v2284_v50, %v7221_v15  ;;  %p4529_p11 = scmp.ne.s32.totalorder %s4194_s14, %s4528_s29  ;;  %p4536_p1 = scmp.lt.s32.totalorder %s4534_s0, %s4528_s29 }
 0x636   : > { %v3557_v16 = vmax.f32 %v3541_v55, 0.0  ;;  %v3558_v0 = vmax.f32 %v3542_v40, 0.0  ;;  %v3365_v55 = vmul.f32 %v5624_v61, %v5915_v43  ;;  %v3533_v40 = vadd.f32 %v5921_v42, %v3469_v29 }
 0x637   : > { %v3243_v7 = vpop.permute.xlu0 %3242  ;;  %p4530_p12 = pnand %p4529_p11, %p4692_p5  ;;  %p4537_p2 = por %p4536_p1, %p4535_p0 }
 0x638   : > { %v6264_v5 = vpack.c.bf16 %v3557_v16, %v3555_v36  ;;  %v6266_v45 = vpack.c.bf16 %v3558_v0, %v3556_v14  ;;  %v3366_v16 = vmul.f32 %v7203_v26, %v5915_v43  ;;  %v3447_v14 = vmul.f32 %v6199_v37, %v5917_v57  ;;  %v2229_v37 = vld [vmem:[%s6893_s10] sm:$0x7] }
 0x639   : > { %v3299_v61 = vmul.f32 %v7201_v24, %v3243_v7  ;;  %v3300_v43 = vmul.f32 %v7202_v54, %v3243_v7  ;;  %v3466_v26 = vadd.f32 %v3450_v34, %v3384_v48  ;;  %v3549_v2 = vmax.f32 %v3533_v40, 0.0  ;;  %2232 = vperm.xlu0 %4467, %v2229_v37   ;;  %v7220_v0 = vld [vmem:[#allocation5_spill] sm:$0xff]  ;;  %v7224_v37 = vld [vmem:[#allocation51_spill] sm:$0xff]  ;;  %p4531_p13 = pneg %p4530_p12 }
 0x63a   : > { %7213 = vst [vmem:[#allocation80_spill] sm:$0xff] %v6264_v5  ;;  %7214 = vst [vmem:[#allocation81_spill] sm:$0xff] %v6266_v45  ;;  %v2337_v21 = vrot.slane %v2284_v50, %v7220_v0 }
 0x63b   : > { %v3381_v29 = vadd.f32 %v3365_v55, %v3299_v61  ;;  %v3382_v22 = vadd.f32 %v3366_v16, %v3300_v43  ;;  %v3500_v10 = vpop.permute.xlu0 %3499  ;;  %v7222_v55 = vld [vmem:[#allocation8_spill] sm:$0xff]  ;;  %v2485_v61 = vrot.slane %v2284_v50, %v7190_v52  ;;  %v2489_v43 = vrot.slane %v2284_v50, %v7191_v20  ;;  %p4538_p3 = pnand %p4537_p2, %p4531_p13 }
 0x63c   : > { %v3531_v57 = vadd.f32 %v3500_v10, %v3467_v32  ;;  %v6295_v30 = vadd.f32 %v3500_v10, %v3468_v13  ;;  %v2341_v16 = vrot.slane %v2284_v50, %v7222_v55  ;;  %v6320_v7 = vrot.slane %v2337_v21, %v7220_v0 }
 0x63d   : > { %v3463_v53 = vadd.f32 %v3447_v14, %v3381_v29  ;;  %v6293_v49 = vadd.f32 %v3448_v12, %v3382_v22  ;;  %v7223_v14 = vld [vmem:[#allocation7_spill] sm:$0xff]  ;;  %v6323_v32 = vrot.slane %v2403_v59, %v7221_v15  ;;  %v7225_v22 = vld [vmem:[#allocation52_spill] sm:$0xff] }
 0x63e   : > { %7216 = vst [vmem:[#allocation87_spill] sm:$0xff] %v6295_v30  ;;  %v3547_v24 = vmax.f32 %v3531_v57, 0.0  ;;  %v2407_v40 = vrot.slane %v2284_v50, %v7223_v14  ;;  %v7227_v57 = vld [vmem:[#allocation47_spill] sm:$0xff]  ;;  %v7228_v14 = vld [vmem:[#allocation50_spill] sm:$0xff] }
 0x63f   : > { %7215 = vst [vmem:[#allocation86_spill] sm:$0xff] %v6293_v49  ;;  %v3527_v54 = vadd.f32 %v5923_v41, %v3463_v53  ;;  %v3495_v23 = vpop.permute.xlu0 %3494  ;;  %v2426_v50 = vmul.f32 %v6323_v32, %v7225_v22  ;;  %v2422_v45 = vmul.f32 %v6323_v32, %v6100_v47 }
 0x640   : > { %v6298_v48 = vpack.c.bf16 %v3549_v2, %v3547_v24  ;;  %v3529_v27 = vadd.f32 %v3495_v23, %v3465_v39  ;;  %v6300_v19 = vadd.f32 %v3495_v23, %v3466_v26  ;;  %v6328_v39 = vrot.slane %v2341_v16, %v7220_v0  ;;  %v7226_v2 = vld [vmem:[#allocation46_spill] sm:$0xff] }
 0x641   : > { %v3543_v31 = vmax.f32 %v3527_v54, 0.0  ;;  %v6331_v12 = vrot.slane %v2407_v40, %v7221_v15  ;;  %v2364_v53 = vmul.f32 %v6320_v7, %v7226_v2  ;;  %v2430_v24 = vmul.f32 %v6323_v32, %v7227_v57 }
 0x642   : > { %7217 = vst [vmem:[#allocation19_spill] sm:$0xff] %v6298_v48  ;;  %7218 = vst [vmem:[#allocation14_spill] sm:$0xff] %v6300_v19  ;;  %v3545_v56 = vmax.f32 %v3529_v27, 0.0  ;;  %v2361_v29 = vmul.f32 %v6328_v39, %v7224_v37  ;;  %v2365_v23 = vmul.f32 %v6328_v39, %v7226_v2  ;;  %v6352_v27 = vrot.slane %v2485_v61, %v7190_v52 }
 0x643   : > { %v2427_v10 = vmul.f32 %v6331_v12, %v7225_v22  ;;  %v2431_v20 = vmul.f32 %v6331_v12, %v7227_v57  ;;  %v2446_v59 = vadd.f32 %v2430_v24, %v2364_v53  ;;  %v7229_v22 = vld [vmem:[#allocation57_spill] sm:$0xff]  ;;  %v7230_v57 = vld [vmem:[#allocation58_spill] sm:$0xff]  ;;  %v2420_v19 = vmul.f32 %v6323_v32, %v6105_v1 }
 0x644   : > { %v6302_v3 = vpack.c.bf16 %v3545_v56, %v3543_v31  ;;  %v6355_v31 = vrot.slane %v2489_v43, %v7190_v52  ;;  %v2360_v56 = vmul.f32 %v6320_v7, %v7224_v37  ;;  %v6367_v40 = vmul.f32 %v6352_v27, %v7228_v14 }
 0x645   : > { %v2443_v21 = vadd.f32 %v2427_v10, %v2361_v29  ;;  %v2447_v16 = vadd.f32 %v2431_v20, %v2365_v23  ;;  %v2512_v52 = vmul.f32 %v6352_v27, %v6061_v11  ;;  %v2508_v29 = vmul.f32 %v6352_v27, %v6072_v63  ;;  %v7231_v20 = vld [vmem:[#allocation53_spill] sm:$0xff] }
 0x646   : > { %7219 = vst [vmem:[#allocation88_spill] sm:$0xff] %v6302_v3  ;;  %v2509_v15 = vmul.f32 %v6355_v31, %v6072_v63  ;;  %v2513_v61 = vmul.f32 %v6355_v31, %v6061_v11  ;;  %v6375_v43 = vmul.f32 %v6355_v31, %v7228_v14  ;;  %v2442_v37 = vadd.f32 %v2426_v50, %v2360_v56  ;;  %v7232_v50 = vld [vmem:[#allocation54_spill] sm:$0xff] }
 0x647   : > { %v2358_v10 = vmul.f32 %v6320_v7, %v7229_v22  ;;  %v2359_v53 = vmul.f32 %v6328_v39, %v7229_v22  ;;  %v2424_v24 = vmul.f32 %v6323_v32, %v7230_v57  ;;  %v2425_v11 = vmul.f32 %v6331_v12, %v7230_v57 }
 0x648   : > { %v2525_v23 = vadd.f32 %v2509_v15, %v2443_v21  ;;  %v6389_v56 = vmul.f32 %v6323_v32, %v7231_v20  ;;  %v6393_v63 = vmul.f32 %v6331_v12, %v7231_v20  ;;  %v6397_v14 = vmul.f32 %v6352_v27, %v7232_v50  ;;  %v7233_v15 = vld [vmem:[#allocation56_spill] sm:$0xff] }
 0x649   : > { %v6401_v22 = vmul.f32 %v6355_v31, %v7232_v50  ;;  %v6403_v48 = vadd.f32 %v2512_v52, %v2446_v59  ;;  %v6405_v21 = vadd.f32 %v2513_v61, %v2447_v16  ;;  %v2356_v57 = vmul.f32 %v6320_v7, %v7233_v15 }
 0x64a   : > { %v2357_v20 = vmul.f32 %v6328_v39, %v7233_v15  ;;  %v6413_v5 = vmul.f32 %v6352_v27, %v6082_v33  ;;  %v2423_v50 = vmul.f32 %v6331_v12, %v6100_v47  ;;  %v2524_v59 = vadd.f32 %v2508_v29, %v2442_v37  ;;  %v7235_v15 = vld [vmem:[#allocation60_spill] sm:$0xff]  ;;  %v7236_v47 = vld [vmem:[#allocation62_spill] sm:$0xff] }
 0x64b   : > { %v6421_v16 = vmul.f32 %v6355_v31, %v6082_v33  ;;  %v6423_v61 = vadd.f32 %v2424_v24, %v2358_v10  ;;  %v6425_v41 = vadd.f32 %v2425_v11, %v2359_v53  ;;  %v6428_v49 = vadd.f32 %v7235_v15, %v2525_v23  ;;  %v7237_v10 = vld [vmem:[#allocation32_spill] sm:$0xff]  ;;  %v7238_v11 = vld [vmem:[#allocation59_spill] sm:$0xff] }
 0x64c   : > { %7234 = vst [vmem:[#allocation5_spill] sm:$0xff] %v6413_v5  ;;  %v2421_v30 = vmul.f32 %v6331_v12, %v6105_v1  ;;  %v2354_v37 = vmul.f32 %v6320_v7, %v7236_v47  ;;  %v2355_v33 = vmul.f32 %v6328_v39, %v7236_v47  ;;  %v2432_v53 = vmul.f32 %v6323_v32, %v7237_v10 }
 0x64d   : > { %v2433_v24 = vmul.f32 %v6331_v12, %v7237_v10  ;;  %v6444_v23 = vmul.f32 %v6352_v27, %v7238_v11  ;;  %v2367_v1 = vmul.f32 %v6328_v39, %v6142_v18  ;;  %v6450_v42 = vmul.f32 %v6355_v31, %v7238_v11 }
 0x64e   : > { %v6452_v44 = vadd.f32 %v2422_v45, %v2356_v57  ;;  %v6454_v47 = vadd.f32 %v2423_v50, %v2357_v20  ;;  %v6457_v17 = vadd.f32 %v7235_v15, %v2524_v59  ;;  %v6463_v5 = vadd.f32 %v2420_v19, %v2354_v37  ;;  %v7241_v50 = vld [vmem:[#allocation63_spill] sm:$0xff] }
 0x64f   : > { %7239 = vst [vmem:[#allocation6_spill] sm:$0xff] %v6444_v23  ;;  %v6465_v11 = vadd.f32 %v2421_v30, %v2355_v33  ;;  %v2366_v45 = vmul.f32 %v6320_v7, %v6142_v18  ;;  %v6472_v59 = vmul.f32 %v6323_v32, %v7241_v50  ;;  %v2449_v15 = vadd.f32 %v2433_v24, %v2367_v1  ;;  %v7243_v1 = vld [vmem:[#allocation45_spill] sm:$0xff] }
 0x650   : > { %v2363_v30 = vmul.f32 %v6328_v39, %v6151_v51 }
 0x651   : > { %v2448_v33 = vadd.f32 %v2432_v53, %v2366_v45  ;;  %v2531_v24 = vadd.f32 %v6375_v43, %v2449_v15  ;;  %v7245_v45 = vld [vmem:[#allocation49_spill] sm:$0xff] }
 0x68d   : > { %v6304_v6 = vpop.f32.mrf.mxu1 }
 0x68f   : > { %v6306_v9 = vpop.f32.mrf.mxu1 }
 0x691   : > { %v6309_v36 = vpop.f32.mrf.mxu1 }
 0x693   : > { %v6313_v34 = vpop.f32.mrf.mxu1 }
 0x695   : > { %v6317_v28 = vpop.f32.mrf.mxu1 }
 0x696   : > { %v2176_v15 = vadd.f32 %v6317_v28, %v7243_v1 }
 0x697   : > { %v6325_v13 = vpop.f32.mrf.mxu1 }
 0x699   : > { %v6335_v26 = vpop.f32.mrf.mxu1 }
 0x69b   : > { %v6345_v54 = vpop.f32.mrf.mxu1 }
 0x69d   : > { %v6361_v0 = vpop.f32.mrf.mxu1 }
 0x69f   : > { %v2187_v55 = vpop.f32.mrf.mxu1 }
 0x6a1   : > { %v2189_v2 = vpop.f32.mrf.mxu1 }
 0x6a2   : > { %v2190_v18 = vadd.f32 %v2189_v2, %v6130_v38 }
 0x6a3   : > { %v2191_v3 = vpop.f32.mrf.mxu1 }
 0x6a4   : > { %v2192_v8 = vadd.f32 %v2191_v3, %v6130_v38  ;;  %v7242_v3 = vld [vmem:[#allocation44_spill] sm:$0xff]  ;;  %v2178_v38 = vadd.f32 %v6325_v13, %v7243_v1 }
 0x6a5   : > { %v2195_v52 = vpop.f32.mrf.mxu1  ;;  %v2188_v10 = vadd.f32 %v2187_v55, %v7242_v3  ;;  %v2362_v55 = vmul.f32 %v6320_v7, %v6151_v51  ;;  %v2445_v51 = vadd.f32 %v6393_v63, %v2363_v30  ;;  %v7247_v63 = vld [vmem:[#allocation48_spill] sm:$0xff]  ;;  %v2170_v30 = vadd.f32 %v6309_v36, %v7245_v45 }
 0x6a6   : > { %v2196_v57 = vadd.f32 %v2195_v52, %v7240_v58  ;;  %v2215_v52 = vmax.f32 %v2192_v8, 0.0  ;;  %v2166_v36 = vadd.f32 %v6304_v6, %v7247_v63 }
 0x6a7   : > { %v2197_v29 = vpop.f32.mrf.mxu1  ;;  %v2213_v2 = vmax.f32 %v2188_v10, 0.0  ;;  %v2444_v10 = vadd.f32 %v6389_v56, %v2362_v55  ;;  %v7248_v56 = vld [vmem:[#allocation55_spill] sm:$0xff]  ;;  %v2527_v28 = vadd.f32 %v6401_v22, %v2445_v51 }
 0x6a8   : > { %v2198_v35 = vadd.f32 %v2197_v29, %v7240_v58  ;;  %v2182_v58 = vadd.f32 %v6345_v54, %v6137_v46  ;;  %v2214_v54 = vmax.f32 %v2190_v18, 0.0 }
 0x6a9   : > { %v2199_v25 = vpop.f32.mrf.mxu1  ;;  %v2226_v43 = vpack.c.bf16 %v2215_v52, %v2213_v2 }
 0x6aa   : > { %v2200_v23 = vadd.f32 %v2199_v25, %v6119_v60  ;;  %v2419_v25 = vmul.f32 %v6331_v12, %v7241_v50  ;;  %v2217_v32 = vmax.f32 %v2198_v35, 0.0  ;;  %v2216_v12 = vmax.f32 %v2196_v57, 0.0  ;;  %v7246_v50 = vld [vmem:[#allocation65_spill] sm:$0xff] }
 0x6ab   : > { %v2201_v20 = vpop.f32.mrf.mxu1  ;;  %v2180_v35 = vadd.f32 %v6335_v26, %v6137_v46  ;;  %v2211_v57 = vmax.f32 %v2182_v58, 0.0  ;;  %v2503_v13 = vmul.f32 %v6355_v31, %v7246_v50  ;;  %v2530_v46 = vadd.f32 %v6367_v40, %v2448_v33 }
 0x6ac   : > { %v2202_v29 = vadd.f32 %v2201_v20, %v6119_v60  ;;  %v2218_v19 = vmax.f32 %v2200_v23, 0.0  ;;  %v2186_v60 = vadd.f32 %v6361_v0, %v7242_v3  ;;  %v7244_v20 = vld [vmem:[#allocation64_spill] sm:$0xff]  ;;  %v2172_v0 = vadd.f32 %v6313_v34, %v7245_v45  ;;  %v7253_v45 = vld [vmem:[#allocation33_spill] sm:$0xff] }
 0x6ad   : > { %v2501_v8 = vmul.f32 %v6355_v31, %v7244_v20  ;;  %v2595_v26 = vadd.f32 %v6157_v4, %v2531_v24  ;;  %v2168_v34 = vadd.f32 %v6306_v9, %v7247_v63  ;;  %v2210_v31 = vmax.f32 %v2180_v35, 0.0  ;;  %v7249_v24 = vld [vmem:[#allocation61_spill] sm:$0xff] }
 0x6ae   : > { %v2219_v37 = vmax.f32 %v2202_v29, 0.0  ;;  %v2227_v53 = vpack.c.bf16 %v2218_v19, %v2216_v12  ;;  %v2212_v3 = vmax.f32 %v2186_v60, 0.0  ;;  %v2209_v29 = vmax.f32 %v2178_v38, 0.0  ;;  %v7250_v38 = vld [vmem:[#allocation5_spill] sm:$0xff] }
 0x6af   : > { %v2593_v19 = vadd.f32 %v7248_v56, %v6405_v21  ;;  %v2353_v40 = vmul.f32 %v6328_v39, %v6165_v62  ;;  %v2207_v58 = vmax.f32 %v2172_v0, 0.0  ;;  %v2523_v9 = vadd.f32 %v6421_v16, %v6425_v41 }
 0x6b0   : > { %v2228_v23 = vpack.c.bf16 %v2219_v37, %v2217_v32  ;;  %v2225_v18 = vpack.c.bf16 %v2214_v54, %v2212_v3  ;;  %v2224_v52 = vpack.c.bf16 %v2211_v57, %v2209_v29  ;;  %v2592_v32 = vadd.f32 %v7248_v56, %v6403_v48  ;;  %v7252_v54 = vld [vmem:[#allocation6_spill] sm:$0xff] }
 0x6b1   : > { %v2208_v37 = vmax.f32 %v2176_v15, 0.0  ;;  %v2526_v21 = vadd.f32 %v6397_v14, %v2444_v10  ;;  %v2594_v22 = vadd.f32 %v6157_v4, %v2530_v46  ;;  %v2611_v33 = vmax.f32 %v2595_v26, 0.0 }
 0x6b2   : > { %2246 = vmatprep.subr.bf16.mxu0 %v2228_v23  ;;  %v2205_v55 = vmax.f32 %v2168_v34, 0.0  ;;  %v2352_v39 = vmul.f32 %v6320_v7, %v6165_v62  ;;  %v2206_v60 = vmax.f32 %v2170_v30, 0.0  ;;  %v2609_v16 = vmax.f32 %v2593_v19, 0.0 }
 0x6b3   : > { %2247 = vmatpush1.bf16.msra.mxu0 %v2227_v53  ;;  %v2223_v41 = vpack.c.bf16 %v2210_v31, %v2208_v37  ;;  %v2435_v12 = vadd.f32 %v2419_v25, %v2353_v40  ;;  %v2521_v48 = vadd.f32 %v6450_v42, %v6454_v47  ;;  %v2591_v1 = vadd.f32 %v7249_v24, %v2527_v28  ;;  %v7251_v25 = vld [vmem:[#allocation66_spill] sm:$0xff]  ;;  %v4494_v37 = vld [vmem:[%s6886_s3] sm:$0xff]  }
 0x6b4   : > { %2248 = vmatprep.subr.bf16.mxu0 %v2226_v43  ;;  %v2222_v6 = vpack.c.bf16 %v2207_v58, %v2205_v55  ;;  %v2500_v14 = vmul.f32 %v6352_v27, %v7244_v20  ;;  %v2502_v4 = vmul.f32 %v6352_v27, %v7246_v50  ;;  %v2522_v2 = vadd.f32 %v7250_v38, %v6423_v61  ;;  %v2220_v43 = vld [vmem:[%s6892_s9] sm:$0x3]  ;;  %v6574_v55 = vpop.permute.xlu0 %3620 }
 0x6b5   : > { %v2204_v62 = vmax.f32 %v2166_v36, 0.0  ;;  %v2590_v7 = vadd.f32 %v7249_v24, %v2526_v21  ;;  %v2587_v23 = vadd.f32 %v7251_v25, %v2523_v9  ;;  %v2608_v35 = vmax.f32 %v2592_v32, 0.0  ;;  %v4495_v21 = vld [vmem:[%s6886_s3 + $0x8] sm:$0xff]  }
 0x6b6   : > { %v2610_v42 = vmax.f32 %v2594_v22, 0.0  ;;  %v2434_v47 = vadd.f32 %v6472_v59, %v2352_v39  ;;  %v2520_v20 = vadd.f32 %v7252_v54, %v6452_v44  ;;  %v2627_v51 = vpack.c.bf16 %v2611_v33, %v2609_v16  ;;  %v4496_v22 = vld [vmem:[%s6886_s3 + $0x10] sm:$0xff]   ;;  %v4497_v33 = vld [vmem:[%s6886_s3 + $0x18] sm:$0xff]  }
 0x6b7   : > { %2249 = vmatpush1.bf16.msra.mxu0 %v2225_v18  ;;  %v2221_v53 = vpack.c.bf16 %v2206_v60, %v2204_v62  ;;  %v2517_v27 = vadd.f32 %v2501_v8, %v2435_v12  ;;  %v2585_v0 = vadd.f32 %v7253_v45, %v2521_v48  ;;  %v2519_v61 = vadd.f32 %v2503_v13, %v6465_v11  ;;  %v7254_v13 = vld [vmem:[#allocation34_spill] sm:$0xff] }
 0x6b8   : > { %2250 = vmatprep.subr.bf16.mxu0 %v2224_v52  ;;  %v2607_v57 = vmax.f32 %v2591_v1, 0.0  ;;  %v2604_v50 = vmax.f32 %v6457_v17, 0.0  ;;  %v2606_v10 = vmax.f32 %v2590_v7, 0.0  ;;  %v2586_v59 = vadd.f32 %v7251_v25, %v2522_v2  ;;  %v7256_v17 = vld [vmem:[#allocation67_spill] sm:$0xff]  ;;  %v6576_v39 = vpop.permute.xlu0 %3610 }
 0x6b9   : > { %v2603_v15 = vmax.f32 %v2587_v23, 0.0  ;;  %v2626_v44 = vpack.c.bf16 %v2610_v42, %v2608_v35  ;;  %v2516_v3 = vadd.f32 %v2500_v14, %v2434_v47  ;;  %v2584_v8 = vadd.f32 %v7253_v45, %v2520_v20 }
 0x6ba   : > { %v2518_v46 = vadd.f32 %v2502_v4, %v6463_v5  ;;  %v2601_v11 = vmax.f32 %v2585_v0, 0.0  ;;  %v2583_v26 = vadd.f32 %v7254_v13, %v2519_v61  ;;  %v7255_v63 = vmax.f32 %v6428_v49, 0.0 }
 0x6bb   : > { %2251 = vmatpush1.bf16.msra.mxu0 %v2223_v41  ;;  %v2581_v29 = vadd.f32 %v7256_v17, %v2517_v27  ;;  %v7257_v30 = vmov 0   ;;  %v2602_v31 = vmax.f32 %v2586_v59, 0.0  ;;  %v2600_v18 = vmax.f32 %v2584_v8, 0.0  ;;  %v7259_v8 = vld [vmem:[#allocation68_spill] sm:$0xff] }
 0x6bc   : > { %2252 = vmatprep.subr.bf16.mxu0 %v2222_v6  ;;  %v2625_v34 = vpack.c.bf16 %v2607_v57, %v7255_v63  ;;  %v2580_v56 = vadd.f32 %v7256_v17, %v2516_v3  ;;  %v2582_v5 = vadd.f32 %v7254_v13, %v2518_v46  ;;  %v2624_v19 = vpack.c.bf16 %v2606_v10, %v2604_v50  ;;  %v6578_v60 = vpop.permute.xlu0 %3600 }
 0x6bd   : > { %v2599_v28 = vmax.f32 %v2583_v26, 0.0  ;;  %v2623_v40 = vpack.c.bf16 %v2603_v15, %v2601_v11  ;;  %v2597_v58 = vmax.f32 %v2581_v29, 0.0  ;;  %v2622_v49 = vpack.c.bf16 %v2602_v31, %v2600_v18  ;;  %v7260_v11 = vld [vmem:[#allocation35_spill] sm:$0xff] }
 0x6be   : > { %v2596_v52 = vmax.f32 %v2580_v56, 0.0  ;;  %v2598_v9 = vmax.f32 %v2582_v5, 0.0  ;;  %v7262_v56 = vld [vmem:[#allocation37_spill] sm:$0xff] }
 0x6bf   : > { %2253 = vmatpush1.bf16.msra.mxu0 %v2221_v53  ;;  %v2621_v32 = vpack.c.bf16 %v2599_v28, %v2597_v58 }
 0x6c0   : > { %2716 = vmatprep.subr.bf16.mxu0 %v2627_v51  ;;  %v2620_v36 = vpack.c.bf16 %v2598_v9, %v2596_v52  ;;  %v6580_v41 = vpop.permute.xlu0 %3590  ;;  %v7263_v52 = vld [vmem:[#allocation70_spill] sm:$0xff] }
 0x6c2   : > { %4308 = vmatmul.mubr.msk.bf16.vlgmr.msra.gmra.mxu0 %vm801_vm0, %v2220_v43 }
 0x6c3   : > { %2717 = vmatpush1.bf16.msra.mxu0 %v2626_v44  ;;  %2740 = vmatprep.mubr.bf16.mxu0 %v7257_v30  ;;  %v7258_v44 = vld [vmem:[#allocation36_spill] sm:$0xff] }
 0x6c4   : > { %2718 = vmatprep.subr.bf16.mxu0 %v2625_v34  ;;  %v6582_v16 = vpop.permute.xlu0 %3805  ;;  %v7261_v34 = vld [vmem:[#allocation69_spill] sm:$0xff] }
 0x6c7   : > { %2719 = vmatpush1.bf16.msra.mxu0 %v2624_v19 }
 0x6c8   : > { %2720 = vmatprep.subr.bf16.mxu0 %v2623_v40  ;;  %v6584_v12 = vpop.permute.xlu0 %3795 }
 0x6cb   : > { %2721 = vmatpush1.bf16.msra.mxu0 %v2622_v49 }
 0x6cc   : > { %2722 = vmatprep.subr.bf16.mxu0 %v2621_v32  ;;  %v6586_v48 = vpop.permute.xlu0 %3785 }
 0x6cf   : > { %2723 = vmatpush1.bf16.msra.mxu0 %v2620_v36 }
 0x6d0   : > { %v6588_v6 = vpop.permute.xlu0 %3775 }
 0x6d2   : > { %4313 = vmatmul.mubr.msk.bf16.vlgmr.msra.gmra.mxu0 %vm801_vm0, %v4494_v37 }
 0x6d3   : > { %2750 = vmatprep.mubr.bf16.mxu0 %v7257_v30 }
 0x6d4   : > { %v6590_v24 = vpop.permute.xlu0 %3990 }
 0x6d8   : > { %v6592_v1 = vpop.permute.xlu0 %3980 }
 0x6da   : > { %4314 = vmatmul.mubr.msk.bf16.gmra.mxu0 %vm801_vm0, %v4495_v21 }
 0x6db   : > { %2760 = vmatprep.mubr.bf16.mxu0 %v7257_v30 }
 0x6dc   : > { %v6594_v14 = vpop.permute.xlu0 %3970 }
 0x6e0   : > { %v6596_v4 = vpop.permute.xlu0 %3960 }
 0x6e2   : > { %4315 = vmatmul.mubr.msk.bf16.gmra.mxu0 %vm801_vm0, %v4496_v22 }
 0x6e3   : > { %2770 = vmatprep.mubr.bf16.mxu0 %v7257_v30 }
 0x6e4   : > { %v2233_v38 = vpop.permute.xlu0 %2232 }
 0x6ea   : > { %4316 = vmatmul.mubr.msk.bf16.gmra.mxu0 %vm801_vm0, %v4497_v33  ;;  %v7264_v33 = vld [vmem:[#allocation38_spill] sm:$0xff] }
 0x6eb   : > { %3110 = vmatprep.mubr.bf16.mxu0 %v7257_v30 }
 0x782   : > { %v2272_v2 = vpop.f32.mrf.mxu0 }
 0x783   : > { %v2273_v62 = vadd.f32 %v2272_v2, %v2233_v38 }
 0x784   : > { %v2274_v7 = vpop.f32.mrf.mxu0 }
 0x785   : > { %v2275_v25 = vadd.f32 %v2274_v7, %v2233_v38 }
 0x786   : > { %v2276_v23 = vpop.f32.mrf.mxu0 }
 0x787   : > { %v2281_v35 = vcombine.low %v2273_v62, %v2275_v25  ;;  %v7265_v23 = vld [vmem:[#allocation71_spill] sm:$0xff] }
 0x788   : > { %v2277_v42 = vpop.f32.mrf.mxu0 }
 0x789   : > { %2283 = vst [vmem:[%s5952_s25 + $0x8] sm:$0x77] %v2281_v35 }
 0x792   : > { %v2742_v47 = vpop.f32.mrf.mxu0 }
 0x794   : > { %v2744_v54 = vpop.f32.mrf.mxu0 }
 0x795   : > { %v2745_v35 = vadd.f32 %v2744_v54, %v7265_v23 }
 0x796   : > { %v2746_v20 = vpop.f32.mrf.mxu0 }
 0x798   : > { %v2748_v53 = vpop.f32.mrf.mxu0 }
 0x799   : > { %v2749_v38 = vadd.f32 %v2748_v53, %v7264_v33 }
 0x79a   : > { %v2752_v51 = vpop.f32.mrf.mxu0 }
 0x79b   : > { %v2753_v7 = vadd.f32 %v2752_v51, %v7263_v52 }
 0x79c   : > { %v2754_v27 = vpop.f32.mrf.mxu0 }
 0x79d   : > { %v2755_v9 = vadd.f32 %v2754_v27, %v7263_v52  ;;  %v2747_v27 = vadd.f32 %v2746_v20, %v7264_v33  ;;  %v2785_v53 = vmax.f32 %v2753_v7, 0.0  ;;  %v4498_v20 = vld [vmem:[%s6888_s5] sm:$0xff]  }
 0x79e   : > { %v2756_v45 = vpop.f32.mrf.mxu0  ;;  %v7269_v33 = vld [vmem:[#allocation73_spill] sm:$0xff] }
 0x79f   : > { %v2757_v37 = vadd.f32 %v2756_v45, %v7262_v56  ;;  %v2786_v42 = vmax.f32 %v2755_v9, 0.0  ;;  %v2784_v45 = vmax.f32 %v2749_v38, 0.0  ;;  %v7267_v9 = vld [vmem:[#allocation72_spill] sm:$0xff] }
 0x7a0   : > { %v2758_v0 = vpop.f32.mrf.mxu0 }
 0x7a1   : > { %v2759_v5 = vadd.f32 %v2758_v0, %v7262_v56  ;;  %v2787_v0 = vmax.f32 %v2757_v37, 0.0 }
 0x7a2   : > { %v2762_v61 = vpop.f32.mrf.mxu0 }
 0x7a3   : > { %v2763_v58 = vadd.f32 %v2762_v61, %v7261_v34  ;;  %v2788_v2 = vmax.f32 %v2759_v5, 0.0  ;;  %v2807_v51 = vpack.c.bf16 %v2787_v0, %v2785_v53 }
 0x7a4   : > { %v2764_v57 = vpop.f32.mrf.mxu0 }
 0x7a5   : > { %v2765_v17 = vadd.f32 %v2764_v57, %v7261_v34  ;;  %v2789_v25 = vmax.f32 %v2763_v58, 0.0  ;;  %v2808_v57 = vpack.c.bf16 %v2788_v2, %v2786_v42 }
 0x7a6   : > { %v2766_v43 = vpop.f32.mrf.mxu0 }
 0x7a7   : > { %v2767_v31 = vadd.f32 %v2766_v43, %v7258_v44  ;;  %v2790_v32 = vmax.f32 %v2765_v17, 0.0  ;;  %v2743_v43 = vadd.f32 %v2742_v47, %v7265_v23  ;;  %v4499_v47 = vld [vmem:[%s6888_s5 + $0x8] sm:$0xff]  }
 0x7a8   : > { %v2768_v50 = vpop.f32.mrf.mxu0 }
 0x7a9   : > { %v2769_v3 = vadd.f32 %v2768_v50, %v7258_v44  ;;  %v2791_v21 = vmax.f32 %v2767_v31, 0.0  ;;  %v2782_v50 = vmax.f32 %v2745_v35, 0.0  ;;  %v4500_v44 = vld [vmem:[%s6888_s5 + $0x10] sm:$0xff]  }
 0x7aa   : > { %v2772_v10 = vpop.f32.mrf.mxu0 }
 0x7ab   : > { %v2773_v26 = vadd.f32 %v2772_v10, %v7259_v8  ;;  %v2792_v19 = vmax.f32 %v2769_v3, 0.0  ;;  %v2809_v61 = vpack.c.bf16 %v2791_v21, %v2789_v25  ;;  %v2783_v10 = vmax.f32 %v2747_v27, 0.0  ;;  %v4501_v3 = vld [vmem:[%s6888_s5 + $0x18] sm:$0xff]   ;;  %v7270_v25 = vld [vmem:[#allocation41_spill] sm:$0xff] }
 0x7ac   : > { %v2774_v59 = vpop.f32.mrf.mxu0 }
 0x7ad   : > { %v2775_v46 = vadd.f32 %v2774_v59, %v7259_v8  ;;  %v2793_v49 = vmax.f32 %v2773_v26, 0.0  ;;  %v2810_v62 = vpack.c.bf16 %v2792_v19, %v2790_v32  ;;  %v2806_v59 = vpack.c.bf16 %v2784_v45, %v2782_v50  ;;  %v4123_v8 = vld [vmem:[%s6893_s10] sm:$0x7]  ;;  %v7271_v45 = vld [vmem:[#allocation74_spill] sm:$0xff] }
 0x7ae   : > { %v2776_v15 = vpop.f32.mrf.mxu0  ;;  %4126 = vperm.xlu0 %4467, %v4123_v8  }
 0x7af   : > { %v2777_v13 = vadd.f32 %v2776_v15, %v7260_v11  ;;  %v2794_v28 = vmax.f32 %v2775_v46, 0.0  ;;  %v2781_v15 = vmax.f32 %v2743_v43, 0.0  ;;  %v3176_v46 = vld [vmem:[%s6893_s10] sm:$0x7] }
 0x7b0   : > { %v2778_v63 = vpop.f32.mrf.mxu0  ;;  %3179 = vperm.xlu1 %4469, %v3176_v46  }
 0x7b1   : > { %v2779_v29 = vadd.f32 %v2778_v63, %v7260_v11  ;;  %v2795_v18 = vmax.f32 %v2777_v13, 0.0  ;;  %v2805_v54 = vpack.c.bf16 %v2783_v10, %v2781_v15 }
 0x7b3   : > { %v2796_v40 = vmax.f32 %v2779_v29, 0.0  ;;  %v2811_v22 = vpack.c.bf16 %v2795_v18, %v2793_v49  ;;  %v7266_v49 = vld [vmem:[#allocation40_spill] sm:$0xff] }
 0x7b5   : > { %v2812_v36 = vpack.c.bf16 %v2796_v40, %v2794_v28 }
 0x7b7   : > { %2901 = vmatprep.subr.bf16.mxu1 %v2812_v36  ;;  %v7268_v36 = vld [vmem:[#allocation39_spill] sm:$0xff] }
 0x7b8   : > { %2902 = vmatpush1.bf16.msra.mxu1 %v2811_v22 }
 0x7b9   : > { %2903 = vmatprep.subr.bf16.mxu1 %v2810_v62 }
 0x7bc   : > { %2904 = vmatpush1.bf16.msra.mxu1 %v2809_v61 }
 0x7bd   : > { %2905 = vmatprep.subr.bf16.mxu1 %v2808_v57 }
 0x7c0   : > { %2906 = vmatpush1.bf16.msra.mxu1 %v2807_v51 }
 0x7c1   : > { %2907 = vmatprep.subr.bf16.mxu1 %v2806_v59  ;;  %v7272_v59 = vld [vmem:[#allocation42_spill] sm:$0xff] }
 0x7c4   : > { %2908 = vmatpush1.bf16.msra.mxu1 %v2805_v54 }
 0x7c7   : > { %4321 = vmatmul.mubr.msk.bf16.vlgmr.msra.gmra.mxu1 %vm801_vm0, %v4498_v20 }
 0x7c8   : > { %2935 = vmatprep.mubr.bf16.mxu1 %v7257_v30 }
 0x7cf   : > { %4322 = vmatmul.mubr.msk.bf16.gmra.mxu1 %vm801_vm0, %v4499_v47 }
 0x7d0   : > { %2945 = vmatprep.mubr.bf16.mxu1 %v7257_v30 }
 0x7d7   : > { %4323 = vmatmul.mubr.msk.bf16.gmra.mxu1 %vm801_vm0, %v4500_v44 }
 0x7d8   : > { %2955 = vmatprep.mubr.bf16.mxu1 %v7257_v30 }
 0x7df   : > { %4324 = vmatmul.mubr.msk.bf16.gmra.mxu1 %vm801_vm0, %v4501_v3  ;;  %v7273_v3 = vld [vmem:[#allocation75_spill] sm:$0xff] }
 0x7e0   : > { %3217 = vmatprep.mubr.bf16.mxu1 %v7257_v30 }
 0x887   : > { %v2927_v11 = vpop.f32.mrf.mxu1 }
 0x889   : > { %v2929_v13 = vpop.f32.mrf.mxu1 }
 0x88a   : > { %v2930_v8 = vadd.f32 %v2929_v13, %v7273_v3 }
 0x88b   : > { %v2931_v26 = vpop.f32.mrf.mxu1 }
 0x88d   : > { %v2933_v63 = vpop.f32.mrf.mxu1 }
 0x88e   : > { %v2934_v15 = vadd.f32 %v2933_v63, %v7272_v59 }
 0x88f   : > { %v2937_v34 = vpop.f32.mrf.mxu1 }
 0x890   : > { %v2938_v47 = vadd.f32 %v2937_v34, %v7271_v45 }
 0x891   : > { %v2939_v17 = vpop.f32.mrf.mxu1 }
 0x892   : > { %v2940_v57 = vadd.f32 %v2939_v17, %v7271_v45  ;;  %v2932_v17 = vadd.f32 %v2931_v26, %v7272_v59  ;;  %v2970_v63 = vmax.f32 %v2938_v47, 0.0  ;;  %v4502_v26 = vld [vmem:[%s6890_s7] sm:$0xff]   ;;  %v7284_v59 = vld [vmem:[#allocation86_spill] sm:$0xff] }
 0x893   : > { %v2941_v29 = vpop.f32.mrf.mxu1 }
 0x894   : > { %v2942_v50 = vadd.f32 %v2941_v29, %v7270_v25  ;;  %v2971_v46 = vmax.f32 %v2940_v57, 0.0  ;;  %v2969_v29 = vmax.f32 %v2934_v15, 0.0  ;;  %v7282_v57 = vld [vmem:[#allocation87_spill] sm:$0xff]  ;;  %v7285_v15 = vld [vmem:[#allocation24_spill] sm:$0xff] }
 0x895   : > { %v2943_v31 = vpop.f32.mrf.mxu1 }
 0x896   : > { %v2944_v23 = vadd.f32 %v2943_v31, %v7270_v25  ;;  %v2972_v31 = vmax.f32 %v2942_v50, 0.0 }
 0x897   : > { %v2947_v18 = vpop.f32.mrf.mxu1 }
 0x898   : > { %v2948_v0 = vadd.f32 %v2947_v18, %v7269_v33  ;;  %v2973_v54 = vmax.f32 %v2944_v23, 0.0  ;;  %v2992_v34 = vpack.c.bf16 %v2972_v31, %v2970_v63 }
 0x899   : > { %v2949_v56 = vpop.f32.mrf.mxu1 }
 0x89a   : > { %v2950_v38 = vadd.f32 %v2949_v56, %v7269_v33  ;;  %v2974_v44 = vmax.f32 %v2948_v0, 0.0  ;;  %v2993_v56 = vpack.c.bf16 %v2973_v54, %v2971_v46  ;;  %v7278_v33 = vld [vmem:[#allocation10_spill] sm:$0xff]  ;;  %v3528_v54 = vadd.f32 %v7285_v15, %v7284_v59 }
 0x89b   : > { %v2951_v5 = vpop.f32.mrf.mxu1  ;;  %v7280_v0 = vld [vmem:[#allocation82_spill] sm:$0xff] }
 0x89c   : > { %v2952_v62 = vadd.f32 %v2951_v5, %v7266_v49  ;;  %v2975_v43 = vmax.f32 %v2950_v38, 0.0  ;;  %v2928_v5 = vadd.f32 %v2927_v11, %v7273_v3  ;;  %v4503_v11 = vld [vmem:[%s6890_s7 + $0x8] sm:$0xff]  }
 0x89d   : > { %v2953_v19 = vpop.f32.mrf.mxu1 }
 0x89e   : > { %v2954_v52 = vadd.f32 %v2953_v19, %v7266_v49  ;;  %v2976_v10 = vmax.f32 %v2952_v62, 0.0  ;;  %v2967_v19 = vmax.f32 %v2930_v8, 0.0  ;;  %v4504_v49 = vld [vmem:[%s6890_s7 + $0x10] sm:$0xff]  }
 0x89f   : > { %v2957_v28 = vpop.f32.mrf.mxu1 }
 0x8a0   : > { %v2958_v21 = vadd.f32 %v2957_v28, %v7267_v9  ;;  %v2977_v35 = vmax.f32 %v2954_v52, 0.0  ;;  %v2994_v18 = vpack.c.bf16 %v2976_v10, %v2974_v44  ;;  %v2968_v28 = vmax.f32 %v2932_v17, 0.0  ;;  %v4505_v52 = vld [vmem:[%s6890_s7 + $0x18] sm:$0xff]   ;;  %v7283_v10 = vld [vmem:[#allocation14_spill] sm:$0xff] }
 0x8a1   : > { %v2959_v40 = vpop.f32.mrf.mxu1 }
 0x8a2   : > { %v2960_v32 = vadd.f32 %v2959_v40, %v7267_v9  ;;  %v2978_v61 = vmax.f32 %v2958_v21, 0.0  ;;  %v2995_v20 = vpack.c.bf16 %v2977_v35, %v2975_v43  ;;  %v2991_v40 = vpack.c.bf16 %v2969_v29, %v2967_v19  ;;  %v7274_v9 = vld [vmem:[#allocation9_spill] sm:$0xff] }
 0x8a3   : > { %v2961_v58 = vpop.f32.mrf.mxu1  ;;  %v7277_v21 = vld [vmem:[#allocation21_spill] sm:$0xff]  ;;  %v3548_v43 = vmax.f32 %v7282_v57, 0.0 }
 0x8a4   : > { %v2962_v37 = vadd.f32 %v2961_v58, %v7268_v36  ;;  %v2979_v42 = vmax.f32 %v2960_v32, 0.0  ;;  %v2966_v58 = vmax.f32 %v2928_v5, 0.0  ;;  %v7275_v32 = vld [vmem:[#allocation23_spill] sm:$0xff] }
 0x8a5   : > { %v2963_v22 = vpop.f32.mrf.mxu1  ;;  %v3536_v38 = vadd.f32 %v7275_v32, %v7278_v33 }
 0x8a6   : > { %v2964_v2 = vadd.f32 %v2963_v22, %v7268_v36  ;;  %v2980_v7 = vmax.f32 %v2962_v37, 0.0  ;;  %v2990_v13 = vpack.c.bf16 %v2968_v28, %v2966_v58  ;;  %v3535_v36 = vadd.f32 %v7275_v32, %v7274_v9  ;;  %v7276_v37 = vld [vmem:[#allocation20_spill] sm:$0xff]  ;;  %v7286_v58 = vld [vmem:[#allocation15_spill] sm:$0xff] }
 0x8a7   : > { %v3537_v22 = vadd.f32 %v7277_v21, %v7276_v37  ;;  %v3552_v23 = vmax.f32 %v3536_v38, 0.0  ;;  %v7290_v38 = vld [vmem:[#allocation18_spill] sm:$0xff] }
 0x8a8   : > { %v2981_v27 = vmax.f32 %v2964_v2, 0.0  ;;  %v2996_v51 = vpack.c.bf16 %v2980_v7, %v2978_v61  ;;  %v3551_v2 = vmax.f32 %v3535_v36, 0.0  ;;  %v7279_v7 = vld [vmem:[#allocation79_spill] sm:$0xff]  ;;  %v7281_v61 = vld [vmem:[#allocation22_spill] sm:$0xff]  ;;  %v7289_v36 = vld [vmem:[#allocation77_spill] sm:$0xff] }
 0x8a9   : > { %v3553_v62 = vmax.f32 %v3537_v22, 0.0  ;;  %v3538_v25 = vadd.f32 %v7277_v21, %v7279_v7  ;;  %v3534_v45 = vadd.f32 %v7281_v61, %v7280_v0  ;;  %v7291_v0 = vld [vmem:[#allocation78_spill] sm:$0xff] }
 0x8aa   : > { %v2997_v53 = vpack.c.bf16 %v2981_v27, %v2979_v42 }
 0x8ab   : > { %v3554_v35 = vmax.f32 %v3538_v25, 0.0  ;;  %v6687_v27 = vpack.c.bf16 %v3553_v62, %v3551_v2 }
 0x8ac   : > { %3086 = vmatprep.subr.bf16.mxu0 %v2997_v53  ;;  %v3550_v53 = vmax.f32 %v3534_v45, 0.0 }
 0x8ad   : > { %3087 = vmatpush1.bf16.msra.mxu0 %v2996_v51  ;;  %v6685_v42 = vpack.c.bf16 %v3554_v35, %v3552_v23  ;;  %v3546_v51 = vmax.f32 %v7283_v10, 0.0 }
 0x8ae   : > { %3088 = vmatprep.subr.bf16.mxu0 %v2995_v20  ;;  %v6692_v50 = vpack.c.bf16 %v3550_v53, %v3548_v43  ;;  %v3544_v20 = vmax.f32 %v3528_v54, 0.0 }
 0x8b0   : > { %v6697_v47 = vpack.c.bf16 %v3546_v51, %v3544_v20  ;;  %v7292_v51 = vld [vmem:[#allocation85_spill] sm:$0xff] }
 0x8b1   : > { %3089 = vmatpush1.bf16.msra.mxu0 %v2994_v18 }
 0x8b2   : > { %3090 = vmatprep.subr.bf16.mxu0 %v2993_v56 }
 0x8b5   : > { %3091 = vmatpush1.bf16.msra.mxu0 %v2992_v34 }
 0x8b6   : > { %3092 = vmatprep.subr.bf16.mxu0 %v2991_v40 }
 0x8b9   : > { %3093 = vmatpush1.bf16.msra.mxu0 %v2990_v13 }
 0x8bc   : > { %4329 = vmatmul.mubr.msk.bf16.vlgmr.msra.gmra.mxu0 %vm801_vm0, %v4502_v26  ;;  %v7287_v26 = vld [vmem:[#allocation76_spill] sm:$0xff] }
 0x8bd   : > { %3120 = vmatprep.mubr.bf16.mxu0 %v7257_v30 }
 0x8c4   : > { %4330 = vmatmul.mubr.msk.bf16.gmra.mxu0 %vm801_vm0, %v4503_v11 }
 0x8c5   : > { %3130 = vmatprep.mubr.bf16.mxu0 %v7257_v30 }
 0x8cc   : > { %4331 = vmatmul.mubr.msk.bf16.gmra.mxu0 %vm801_vm0, %v4504_v49  ;;  %v7288_v49 = vld [vmem:[#allocation83_spill] sm:$0xff] }
 0x8cd   : > { %3140 = vmatprep.mubr.bf16.mxu0 %v7257_v30 }
 0x8d4   : > { %4332 = vmatmul.mubr.msk.bf16.gmra.mxu0 %vm801_vm0, %v4505_v52 }
 0x8d5   : > { %3872 = vmatprep.mubr.bf16.mxu0 %v7257_v30 }
 0x97c   : > { %v3112_v44 = vpop.f32.mrf.mxu0 }
 0x97e   : > { %v3114_v3 = vpop.f32.mrf.mxu0 }
 0x980   : > { %v3116_v8 = vpop.f32.mrf.mxu0 }
 0x982   : > { %v3118_v46 = vpop.f32.mrf.mxu0 }
 0x983   : > { %v3119_v59 = vadd.f32 %v3118_v46, %v7292_v51 }
 0x984   : > { %v3122_v17 = vpop.f32.mrf.mxu0 }
 0x985   : > { %v3123_v20 = vadd.f32 %v3122_v17, %v7291_v0 }
 0x986   : > { %v3124_v31 = vpop.f32.mrf.mxu0 }
 0x987   : > { %v3125_v61 = vadd.f32 %v3124_v31, %v7291_v0  ;;  %v3117_v31 = vadd.f32 %v3116_v8, %v7292_v51  ;;  %v3155_v46 = vmax.f32 %v3123_v20, 0.0  ;;  %v3167_v8 = vld [vmem:[%s6892_s9] sm:$0x3]  ;;  %v7298_v20 = vld [vmem:[#allocation11_spill] sm:$0xff] }
 0x988   : > { %v3126_v18 = vpop.f32.mrf.mxu0 }
 0x989   : > { %v3127_v43 = vadd.f32 %v3126_v18, %v7290_v38  ;;  %v3154_v18 = vmax.f32 %v3119_v59, 0.0 }
 0x98a   : > { %v3128_v29 = vpop.f32.mrf.mxu0 }
 0x98b   : > { %v3129_v2 = vadd.f32 %v3128_v29, %v7290_v38 }
 0x98c   : > { %v3132_v56 = vpop.f32.mrf.mxu0 }
 0x98d   : > { %v3133_v23 = vadd.f32 %v3132_v56, %v7289_v36  ;;  %v3158_v15 = vmax.f32 %v3129_v2, 0.0 }
 0x98e   : > { %v3134_v5 = vpop.f32.mrf.mxu0 }
 0x98f   : > { %v3135_v37 = vadd.f32 %v3134_v5, %v7289_v36  ;;  %v3159_v29 = vmax.f32 %v3133_v23, 0.0  ;;  %v7293_v5 = vld [vmem:[#allocation84_spill] sm:$0xff]  ;;  %v3180_v36 = vpop.permute.xlu1 %3179 }
 0x990   : > { %v3136_v63 = vpop.f32.mrf.mxu0  ;;  %v3115_v56 = vadd.f32 %v3114_v3, %v7293_v5 }
 0x991   : > { %v3137_v22 = vadd.f32 %v3136_v63, %v7286_v58  ;;  %v3160_v45 = vmax.f32 %v3135_v37, 0.0  ;;  %v3156_v63 = vmax.f32 %v3125_v61, 0.0 }
 0x992   : > { %v3138_v19 = vpop.f32.mrf.mxu0 }
 0x993   : > { %v3139_v13 = vadd.f32 %v3138_v19, %v7286_v58  ;;  %v3161_v53 = vmax.f32 %v3137_v22, 0.0  ;;  %v3157_v19 = vmax.f32 %v3127_v43, 0.0  ;;  %v3152_v58 = vmax.f32 %v3115_v56, 0.0 }
 0x994   : > { %v3142_v28 = vpop.f32.mrf.mxu0 }
 0x995   : > { %v3143_v9 = vadd.f32 %v3142_v28, %v7287_v26  ;;  %v3162_v62 = vmax.f32 %v3139_v13, 0.0  ;;  %v3172_v28 = vpack.c.bf16 %v3161_v53, %v3159_v29  ;;  %v3153_v13 = vmax.f32 %v3117_v31, 0.0  ;;  %v7299_v31 = vld [vmem:[#allocation25_spill] sm:$0xff] }
 0x996   : > { %v3144_v34 = vpop.f32.mrf.mxu0  ;;  %v3170_v17 = vpack.c.bf16 %v3157_v19, %v3155_v46 }
 0x997   : > { %v3145_v11 = vadd.f32 %v3144_v34, %v7287_v26  ;;  %v3163_v35 = vmax.f32 %v3143_v9, 0.0  ;;  %v3173_v54 = vpack.c.bf16 %v3162_v62, %v3160_v45  ;;  %v3171_v34 = vpack.c.bf16 %v3158_v15, %v3156_v63  ;;  %v4506_v9 = vld [vmem:[%s6886_s3] sm:$0xff]  }
 0x998   : > { %v3146_v40 = vpop.f32.mrf.mxu0  ;;  %v3169_v26 = vpack.c.bf16 %v3154_v18, %v3152_v58 }
 0x999   : > { %v3147_v52 = vadd.f32 %v3146_v40, %v7288_v49  ;;  %v3164_v7 = vmax.f32 %v3145_v11, 0.0  ;;  %v3113_v40 = vadd.f32 %v3112_v44, %v7293_v5  ;;  %v7295_v44 = vld [vmem:[#allocation80_spill] sm:$0xff] }
 0x99a   : > { %v3148_v32 = vpop.f32.mrf.mxu0 }
 0x99b   : > { %v3149_v21 = vadd.f32 %v3148_v32, %v7288_v49  ;;  %v3165_v33 = vmax.f32 %v3147_v52, 0.0  ;;  %v3151_v11 = vmax.f32 %v3113_v40, 0.0  ;;  %v7294_v49 = vld [vmem:[#allocation81_spill] sm:$0xff]  ;;  %v7296_v52 = vld [vmem:[#allocation19_spill] sm:$0xff]  ;;  %v7297_v32 = vld [vmem:[#allocation88_spill] sm:$0xff] }
 0x99d   : > { %v3166_v25 = vmax.f32 %v3149_v21, 0.0  ;;  %v3174_v10 = vpack.c.bf16 %v3165_v33, %v3163_v35  ;;  %v3168_v3 = vpack.c.bf16 %v3153_v13, %v3151_v11  ;;  %v7300_v11 = vld [vmem:[#allocation26_spill] sm:$0xff] }
 0x99f   : > { %v3175_v57 = vpack.c.bf16 %v3166_v25, %v3164_v7 }
 0x9a1   : > { %3193 = vmatprep.subr.bf16.mxu1 %v3175_v57 }
 0x9a2   : > { %3194 = vmatpush1.bf16.msra.mxu1 %v3174_v10 }
 0x9a3   : > { %3195 = vmatprep.subr.bf16.mxu1 %v3173_v54 }
 0x9a6   : > { %3196 = vmatpush1.bf16.msra.mxu1 %v3172_v28 }
 0x9a7   : > { %3197 = vmatprep.subr.bf16.mxu1 %v3171_v34 }
 0x9aa   : > { %3198 = vmatpush1.bf16.msra.mxu1 %v3170_v17 }
 0x9ab   : > { %3199 = vmatprep.subr.bf16.mxu1 %v3169_v26 }
 0x9ae   : > { %3200 = vmatpush1.bf16.msra.mxu1 %v3168_v3 }
 0x9af   : > { %3663 = vmatprep.subr.bf16.mxu1 %v7294_v49 }
 0x9b1   : > { %4333 = vmatmul.mubr.msk.bf16.vlgmr.msra.gmra.mxu1 %vm801_vm0, %v3167_v8 }
 0x9b2   : > { %3664 = vmatpush1.bf16.msra.mxu1 %v7295_v44  ;;  %3687 = vmatprep.mubr.bf16.mxu1 %v7257_v30 }
 0x9b3   : > { %3665 = vmatprep.subr.bf16.mxu1 %v6685_v42  ;;  %v4507_v42 = vld [vmem:[%s6886_s3 + $0x8] sm:$0xff]  }
 0x9b6   : > { %3666 = vmatpush1.bf16.msra.mxu1 %v6687_v27  ;;  %v4508_v27 = vld [vmem:[%s6886_s3 + $0x10] sm:$0xff]  }
 0x9b7   : > { %3667 = vmatprep.subr.bf16.mxu1 %v6692_v50  ;;  %v4509_v50 = vld [vmem:[%s6886_s3 + $0x18] sm:$0xff]  }
 0x9ba   : > { %3668 = vmatpush1.bf16.msra.mxu1 %v7296_v52 }
 0x9bb   : > { %3669 = vmatprep.subr.bf16.mxu1 %v6697_v47 }
 0x9be   : > { %3670 = vmatpush1.bf16.msra.mxu1 %v7297_v32 }
 0x9c1   : > { %4338 = vmatmul.mubr.msk.bf16.vlgmr.msra.gmra.mxu1 %vm801_vm0, %v4506_v9 }
 0x9c2   : > { %3697 = vmatprep.mubr.bf16.mxu1 %v7257_v30 }
 0x9c9   : > { %4339 = vmatmul.mubr.msk.bf16.gmra.mxu1 %vm801_vm0, %v4507_v42 }
 0x9ca   : > { %3707 = vmatprep.mubr.bf16.mxu1 %v7257_v30 }
 0x9d1   : > { %4340 = vmatmul.mubr.msk.bf16.gmra.mxu1 %vm801_vm0, %v4508_v27 }
 0x9d2   : > { %3717 = vmatprep.mubr.bf16.mxu1 %v7257_v30 }
 0x9d9   : > { %4341 = vmatmul.mubr.msk.bf16.gmra.mxu1 %vm801_vm0, %v4509_v50  ;;  %v7301_v50 = vld [vmem:[#allocation12_spill] sm:$0xff] }
 0x9da   : > { %4057 = vmatprep.mubr.bf16.mxu1 %v7257_v30 }
 0xa71   : > { %v3219_v47 = vpop.f32.mrf.mxu1 }
 0xa72   : > { %v3220_v21 = vadd.f32 %v3219_v47, %v3180_v36 }
 0xa73   : > { %v3221_v37 = vpop.f32.mrf.mxu1 }
 0xa74   : > { %v3222_v22 = vadd.f32 %v3221_v37, %v3180_v36 }
 0xa75   : > { %v3223_v33 = vpop.f32.mrf.mxu1 }
 0xa76   : > { %v3228_v38 = vcombine.low %v3220_v21, %v3222_v22 }
 0xa77   : > { %v3224_v2 = vpop.f32.mrf.mxu1 }
 0xa78   : > { %3230 = vst [vmem:[%s5952_s25 + $0x10] sm:$0x77] %v3228_v38 }
 0xa81   : > { %v3689_v62 = vpop.f32.mrf.mxu1 }
 0xa82   : > { %v3690_v38 = vadd.f32 %v3689_v62, %v7301_v50  ;;  %v4511_v62 = vld [vmem:[%s6888_s5 + $0x8] sm:$0xff]  }
 0xa83   : > { %v3691_v7 = vpop.f32.mrf.mxu1 }
 0xa84   : > { %v3692_v47 = vadd.f32 %v3691_v7, %v7301_v50 }
 0xa85   : > { %v3693_v25 = vpop.f32.mrf.mxu1 }
 0xa86   : > { %v3694_v37 = vadd.f32 %v3693_v25, %v6580_v41  ;;  %v4512_v25 = vld [vmem:[%s6888_s5 + $0x10] sm:$0xff]  }
 0xa87   : > { %v3695_v23 = vpop.f32.mrf.mxu1 }
 0xa89   : > { %v3699_v35 = vpop.f32.mrf.mxu1 }
 0xa8a   : > { %v3700_v42 = vadd.f32 %v3699_v35, %v7300_v11 }
 0xa8b   : > { %v3701_v0 = vpop.f32.mrf.mxu1 }
 0xa8c   : > { %v3702_v3 = vadd.f32 %v3701_v0, %v7300_v11  ;;  %v3732_v2 = vmax.f32 %v3700_v42, 0.0  ;;  %v3730_v0 = vmax.f32 %v3694_v37, 0.0 }
 0xa8d   : > { %v3703_v61 = vpop.f32.mrf.mxu1 }
 0xa8e   : > { %v3704_v44 = vadd.f32 %v3703_v61, %v6578_v60  ;;  %v3733_v36 = vmax.f32 %v3702_v3, 0.0 }
 0xa8f   : > { %v3705_v45 = vpop.f32.mrf.mxu1 }
 0xa90   : > { %v3706_v40 = vadd.f32 %v3705_v45, %v6578_v60  ;;  %v3734_v21 = vmax.f32 %v3704_v44, 0.0  ;;  %v3728_v45 = vmax.f32 %v3690_v38, 0.0 }
 0xa91   : > { %v3709_v57 = vpop.f32.mrf.mxu1 }
 0xa92   : > { %v3710_v17 = vadd.f32 %v3709_v57, %v7299_v31  ;;  %v3754_v35 = vpack.c.bf16 %v3734_v21, %v3732_v2  ;;  %v3752_v7 = vpack.c.bf16 %v3730_v0, %v3728_v45  ;;  %v4513_v57 = vld [vmem:[%s6888_s5 + $0x18] sm:$0xff]  }
 0xa93   : > { %v3711_v43 = vpop.f32.mrf.mxu1 }
 0xa94   : > { %v3712_v19 = vadd.f32 %v3711_v43, %v7299_v31  ;;  %v3736_v27 = vmax.f32 %v3710_v17, 0.0  ;;  %v7303_v17 = vld [vmem:[#allocation17_spill] sm:$0xff] }
 0xa95   : > { %v3713_v53 = vpop.f32.mrf.mxu1 }
 0xa96   : > { %v3714_v18 = vadd.f32 %v3713_v53, %v6576_v39  ;;  %v3737_v8 = vmax.f32 %v3712_v19, 0.0 }
 0xa97   : > { %v3715_v10 = vpop.f32.mrf.mxu1 }
 0xa98   : > { %v3716_v54 = vadd.f32 %v3715_v10, %v6576_v39  ;;  %v3738_v52 = vmax.f32 %v3714_v18, 0.0  ;;  %v3735_v39 = vmax.f32 %v3706_v40, 0.0 }
 0xa99   : > { %v3719_v51 = vpop.f32.mrf.mxu1 }
 0xa9a   : > { %v3720_v56 = vadd.f32 %v3719_v51, %v7298_v20  ;;  %v3739_v46 = vmax.f32 %v3716_v54, 0.0  ;;  %v3756_v22 = vpack.c.bf16 %v3738_v52, %v3736_v27  ;;  %v3755_v33 = vpack.c.bf16 %v3735_v39, %v3733_v36 }
 0xa9b   : > { %v3721_v59 = vpop.f32.mrf.mxu1 }
 0xa9c   : > { %v3722_v29 = vadd.f32 %v3721_v59, %v7298_v20  ;;  %v3740_v26 = vmax.f32 %v3720_v56, 0.0  ;;  %v3757_v32 = vpack.c.bf16 %v3739_v46, %v3737_v8 }
 0xa9d   : > { %v3723_v15 = vpop.f32.mrf.mxu1 }
 0xa9e   : > { %v3724_v5 = vadd.f32 %v3723_v15, %v6574_v55  ;;  %v3741_v58 = vmax.f32 %v3722_v29, 0.0 }
 0xa9f   : > { %v3725_v63 = vpop.f32.mrf.mxu1 }
 0xaa0   : > { %v3726_v28 = vadd.f32 %v3725_v63, %v6574_v55  ;;  %v3742_v34 = vmax.f32 %v3724_v5, 0.0  ;;  %v3696_v55 = vadd.f32 %v3695_v23, %v6580_v41  ;;  %v3729_v23 = vmax.f32 %v3692_v47, 0.0  ;;  %v4510_v41 = vld [vmem:[%s6888_s5] sm:$0xff]  }
 0xaa2   : > { %v3743_v13 = vmax.f32 %v3726_v28, 0.0  ;;  %v3758_v9 = vpack.c.bf16 %v3742_v34, %v3740_v26  ;;  %v3731_v60 = vmax.f32 %v3696_v55, 0.0  ;;  %v7302_v34 = vld [vmem:[#allocation13_spill] sm:$0xff] }
 0xaa4   : > { %v3759_v49 = vpack.c.bf16 %v3743_v13, %v3741_v58  ;;  %v3753_v61 = vpack.c.bf16 %v3731_v60, %v3729_v23 }
 0xaa6   : > { %3848 = vmatprep.subr.bf16.mxu0 %v3759_v49 }
 0xaa7   : > { %3849 = vmatpush1.bf16.msra.mxu0 %v3758_v9 }
 0xaa8   : > { %3850 = vmatprep.subr.bf16.mxu0 %v3757_v32  ;;  %v7304_v32 = vld [vmem:[#allocation27_spill] sm:$0xff] }
 0xaab   : > { %3851 = vmatpush1.bf16.msra.mxu0 %v3756_v22 }
 0xaac   : > { %3852 = vmatprep.subr.bf16.mxu0 %v3755_v33  ;;  %v7305_v33 = vld [vmem:[#allocation16_spill] sm:$0xff] }
 0xaaf   : > { %3853 = vmatpush1.bf16.msra.mxu0 %v3754_v35 }
 0xab0   : > { %3854 = vmatprep.subr.bf16.mxu0 %v3753_v61 }
 0xab3   : > { %3855 = vmatpush1.bf16.msra.mxu0 %v3752_v7 }
 0xab6   : > { %4346 = vmatmul.mubr.msk.bf16.vlgmr.msra.gmra.mxu0 %vm801_vm0, %v4510_v41 }
 0xab7   : > { %3882 = vmatprep.mubr.bf16.mxu0 %v7257_v30 }
 0xabe   : > { %4347 = vmatmul.mubr.msk.bf16.gmra.mxu0 %vm801_vm0, %v4511_v62 }
 0xabf   : > { %3892 = vmatprep.mubr.bf16.mxu0 %v7257_v30 }
 0xac6   : > { %4348 = vmatmul.mubr.msk.bf16.gmra.mxu0 %vm801_vm0, %v4512_v25 }
 0xac7   : > { %3902 = vmatprep.mubr.bf16.mxu0 %v7257_v30 }
 0xace   : > { %4349 = vmatmul.mubr.msk.bf16.gmra.mxu0 %vm801_vm0, %v4513_v57 }
 0xacf   : > { %4164 = vmatprep.mubr.bf16.mxu0 %v7257_v30 }
 0xb76   : > { %v3874_v43 = vpop.f32.mrf.mxu0 }
 0xb77   : > { %v3875_v45 = vadd.f32 %v3874_v43, %v7305_v33  ;;  %v4515_v43 = vld [vmem:[%s6890_s7 + $0x8] sm:$0xff]  }
 0xb78   : > { %v3876_v53 = vpop.f32.mrf.mxu0 }
 0xb79   : > { %v3877_v38 = vadd.f32 %v3876_v53, %v7305_v33 }
 0xb7a   : > { %v3878_v10 = vpop.f32.mrf.mxu0 }
 0xb7b   : > { %v3879_v23 = vadd.f32 %v3878_v10, %v6588_v6  ;;  %v3914_v41 = vmax.f32 %v3877_v38, 0.0  ;;  %v4516_v10 = vld [vmem:[%s6890_s7 + $0x10] sm:$0xff]  }
 0xb7c   : > { %v3880_v51 = vpop.f32.mrf.mxu0 }
 0xb7d   : > { %v3915_v62 = vmax.f32 %v3879_v23, 0.0 }
 0xb7e   : > { %v3884_v59 = vpop.f32.mrf.mxu0 }
 0xb7f   : > { %v3885_v22 = vadd.f32 %v3884_v59, %v7304_v32  ;;  %v4517_v59 = vld [vmem:[%s6890_s7 + $0x18] sm:$0xff]  }
 0xb80   : > { %v3886_v15 = vpop.f32.mrf.mxu0 }
 0xb81   : > { %v3887_v42 = vadd.f32 %v3886_v15, %v7304_v32  ;;  %v3917_v7 = vmax.f32 %v3885_v22, 0.0 }
 0xb82   : > { %v3888_v54 = vpop.f32.mrf.mxu0 }
 0xb83   : > { %v3889_v47 = vadd.f32 %v3888_v54, %v6586_v48  ;;  %v3918_v2 = vmax.f32 %v3887_v42, 0.0 }
 0xb84   : > { %v3890_v20 = vpop.f32.mrf.mxu0 }
 0xb85   : > { %v3891_v49 = vadd.f32 %v3890_v20, %v6586_v48  ;;  %v3919_v0 = vmax.f32 %v3889_v47, 0.0  ;;  %v7308_v47 = vld [vmem:[#allocation28_spill] sm:$0xff] }
 0xb86   : > { %v3894_v29 = vpop.f32.mrf.mxu0 }
 0xb87   : > { %v3895_v55 = vadd.f32 %v3894_v29, %v7303_v17  ;;  %v3939_v25 = vpack.c.bf16 %v3919_v0, %v3917_v7 }
 0xb88   : > { %v3896_v5 = vpop.f32.mrf.mxu0 }
 0xb89   : > { %v3897_v26 = vadd.f32 %v3896_v5, %v7303_v17  ;;  %v3921_v60 = vmax.f32 %v3895_v55, 0.0 }
 0xb8a   : > { %v3898_v56 = vpop.f32.mrf.mxu0 }
 0xb8b   : > { %v3899_v3 = vadd.f32 %v3898_v56, %v6584_v12  ;;  %v3922_v27 = vmax.f32 %v3897_v26, 0.0 }
 0xb8c   : > { %v3900_v63 = vpop.f32.mrf.mxu0 }
 0xb8d   : > { %v3901_v18 = vadd.f32 %v3900_v63, %v6584_v12  ;;  %v3923_v36 = vmax.f32 %v3899_v3, 0.0  ;;  %v3920_v12 = vmax.f32 %v3891_v49, 0.0 }
 0xb8e   : > { %v3904_v31 = vpop.f32.mrf.mxu0 }
 0xb8f   : > { %v3905_v58 = vadd.f32 %v3904_v31, %v7302_v34  ;;  %v3924_v44 = vmax.f32 %v3901_v18, 0.0  ;;  %v3941_v35 = vpack.c.bf16 %v3923_v36, %v3921_v60  ;;  %v3940_v61 = vpack.c.bf16 %v3920_v12, %v3918_v2  ;;  %v7309_v2 = vld [vmem:[#allocation29_spill] sm:$0xff] }
 0xb90   : > { %v3906_v19 = vpop.f32.mrf.mxu0 }
 0xb91   : > { %v3907_v40 = vadd.f32 %v3906_v19, %v7302_v34  ;;  %v3925_v39 = vmax.f32 %v3905_v58, 0.0  ;;  %v3942_v21 = vpack.c.bf16 %v3924_v44, %v3922_v27 }
 0xb92   : > { %v3908_v28 = vpop.f32.mrf.mxu0 }
 0xb93   : > { %v3909_v46 = vadd.f32 %v3908_v28, %v6582_v16  ;;  %v3926_v52 = vmax.f32 %v3907_v40, 0.0 }
 0xb94   : > { %v3910_v13 = vpop.f32.mrf.mxu0 }
 0xb95   : > { %v3911_v11 = vadd.f32 %v3910_v13, %v6582_v16  ;;  %v3927_v8 = vmax.f32 %v3909_v46, 0.0  ;;  %v3881_v16 = vadd.f32 %v3880_v51, %v6588_v6  ;;  %v3913_v51 = vmax.f32 %v3875_v45, 0.0  ;;  %v4514_v6 = vld [vmem:[%s6890_s7] sm:$0xff]   ;;  %v7306_v13 = vld [vmem:[#allocation30_spill] sm:$0xff] }
 0xb97   : > { %v3928_v9 = vmax.f32 %v3911_v11, 0.0  ;;  %v3943_v37 = vpack.c.bf16 %v3927_v8, %v3925_v39  ;;  %v3916_v48 = vmax.f32 %v3881_v16, 0.0  ;;  %v3937_v53 = vpack.c.bf16 %v3915_v62, %v3913_v51  ;;  %v7307_v8 = vld [vmem:[#allocation31_spill] sm:$0xff] }
 0xb99   : > { %v3944_v50 = vpack.c.bf16 %v3928_v9, %v3926_v52  ;;  %v3938_v57 = vpack.c.bf16 %v3916_v48, %v3914_v41 }
 0xb9b   : > { %4033 = vmatprep.subr.bf16.mxu1 %v3944_v50 }
 0xb9c   : > { %4034 = vmatpush1.bf16.msra.mxu1 %v3943_v37 }
 0xb9d   : > { %4035 = vmatprep.subr.bf16.mxu1 %v3942_v21 }
 0xba0   : > { %4036 = vmatpush1.bf16.msra.mxu1 %v3941_v35 }
 0xba1   : > { %4037 = vmatprep.subr.bf16.mxu1 %v3940_v61 }
 0xba4   : > { %4038 = vmatpush1.bf16.msra.mxu1 %v3939_v25 }
 0xba5   : > { %4039 = vmatprep.subr.bf16.mxu1 %v3938_v57 }
 0xba8   : > { %4040 = vmatpush1.bf16.msra.mxu1 %v3937_v53 }
 0xbab   : > { %4354 = vmatmul.mubr.msk.bf16.vlgmr.msra.gmra.mxu1 %vm801_vm0, %v4514_v6 }
 0xbac   : > { %4067 = vmatprep.mubr.bf16.mxu1 %v7257_v30 }
 0xbb3   : > { %4355 = vmatmul.mubr.msk.bf16.gmra.mxu1 %vm801_vm0, %v4515_v43 }
 0xbb4   : > { %4077 = vmatprep.mubr.bf16.mxu1 %v7257_v30 }
 0xbbb   : > { %4356 = vmatmul.mubr.msk.bf16.gmra.mxu1 %vm801_vm0, %v4516_v10  ;;  %v4127_v10 = vpop.permute.xlu0 %4126 }
 0xbbc   : > { %4087 = vmatprep.mubr.bf16.mxu1 %v7257_v30 }
 0xbc3   : > { %4357 = vmatmul.mubr.msk.bf16.gmra.mxu1 %vm801_vm0, %v4517_v59 }
 0xc6b   : > { %v4059_v15 = vpop.f32.mrf.mxu1 }
 0xc6c   : > { %v4060_v7 = vadd.f32 %v4059_v15, %v7309_v2 }
 0xc6d   : > { %v4061_v54 = vpop.f32.mrf.mxu1 }
 0xc6e   : > { %v4062_v23 = vadd.f32 %v4061_v54, %v7309_v2  ;;  %v4098_v53 = vmax.f32 %v4060_v7, 0.0 }
 0xc6f   : > { %v4063_v20 = vpop.f32.mrf.mxu1 }
 0xc70   : > { %v4064_v35 = vadd.f32 %v4063_v20, %v6596_v4  ;;  %v4099_v62 = vmax.f32 %v4062_v23, 0.0 }
 0xc71   : > { %v4065_v29 = vpop.f32.mrf.mxu1 }
 0xc72   : > { %v4100_v25 = vmax.f32 %v4064_v35, 0.0 }
 0xc73   : > { %v4069_v5 = vpop.f32.mrf.mxu1 }
 0xc74   : > { %v4070_v33 = vadd.f32 %v4069_v5, %v7308_v47  ;;  %v4115_v6 = vpack.c.bf16 %v4100_v25, %v4098_v53 }
 0xc75   : > { %v4071_v56 = vpop.f32.mrf.mxu1 }
 0xc76   : > { %v4072_v36 = vadd.f32 %v4071_v56, %v7308_v47  ;;  %v4102_v41 = vmax.f32 %v4070_v33, 0.0 }
 0xc77   : > { %v4073_v63 = vpop.f32.mrf.mxu1 }
 0xc78   : > { %v4074_v12 = vadd.f32 %v4073_v63, %v6594_v14  ;;  %v4103_v0 = vmax.f32 %v4072_v36, 0.0 }
 0xc79   : > { %v4075_v31 = vpop.f32.mrf.mxu1 }
 0xc7a   : > { %v4076_v55 = vadd.f32 %v4075_v31, %v6594_v14  ;;  %v4104_v48 = vmax.f32 %v4074_v12, 0.0 }
 0xc7b   : > { %v4079_v19 = vpop.f32.mrf.mxu1 }
 0xc7c   : > { %v4080_v27 = vadd.f32 %v4079_v19, %v7307_v8  ;;  %v4117_v57 = vpack.c.bf16 %v4104_v48, %v4102_v41 }
 0xc7d   : > { %v4081_v28 = vpop.f32.mrf.mxu1 }
 0xc7e   : > { %v4082_v49 = vadd.f32 %v4081_v28, %v7307_v8  ;;  %v4106_v38 = vmax.f32 %v4080_v27, 0.0 }
 0xc7f   : > { %v4083_v18 = vpop.f32.mrf.mxu1 }
 0xc80   : > { %v4084_v52 = vadd.f32 %v4083_v18, %v6592_v1  ;;  %v4107_v37 = vmax.f32 %v4082_v49, 0.0 }
 0xc81   : > { %v4085_v34 = vpop.f32.mrf.mxu1 }
 0xc82   : > { %v4086_v58 = vadd.f32 %v4085_v34, %v6592_v1  ;;  %v4108_v21 = vmax.f32 %v4084_v52, 0.0  ;;  %v4105_v1 = vmax.f32 %v4076_v55, 0.0 }
 0xc83   : > { %v4089_v40 = vpop.f32.mrf.mxu1 }
 0xc84   : > { %v4090_v11 = vadd.f32 %v4089_v40, %v7306_v13  ;;  %v4109_v39 = vmax.f32 %v4086_v58, 0.0  ;;  %v4119_v61 = vpack.c.bf16 %v4108_v21, %v4106_v38  ;;  %v4118_v45 = vpack.c.bf16 %v4105_v1, %v4103_v0 }
 0xc85   : > { %v4091_v30 = vpop.f32.mrf.mxu1 }
 0xc86   : > { %v4092_v17 = vadd.f32 %v4091_v30, %v7306_v13  ;;  %v4110_v50 = vmax.f32 %v4090_v11, 0.0  ;;  %v4120_v60 = vpack.c.bf16 %v4109_v39, %v4107_v37 }
 0xc87   : > { %v4093_v46 = vpop.f32.mrf.mxu1 }
 0xc88   : > { %v4094_v26 = vadd.f32 %v4093_v46, %v6590_v24  ;;  %v4111_v32 = vmax.f32 %v4092_v17, 0.0 }
 0xc89   : > { %v4095_v3 = vpop.f32.mrf.mxu1 }
 0xc8a   : > { %v4096_v44 = vadd.f32 %v4095_v3, %v6590_v24  ;;  %v4112_v9 = vmax.f32 %v4094_v26, 0.0  ;;  %v4066_v24 = vadd.f32 %v4065_v29, %v6596_v4  ;;  %v4114_v4 = vld [vmem:[%s6892_s9] sm:$0x3] }
 0xc8c   : > { %v4113_v42 = vmax.f32 %v4096_v44, 0.0  ;;  %v4121_v22 = vpack.c.bf16 %v4112_v9, %v4110_v50  ;;  %v4101_v14 = vmax.f32 %v4066_v24, 0.0 }
 0xc8e   : > { %v4122_v16 = vpack.c.bf16 %v4113_v42, %v4111_v32  ;;  %v4116_v51 = vpack.c.bf16 %v4101_v14, %v4099_v62 }
 0xc90   : > { %4140 = vmatprep.subr.bf16.mxu0 %v4122_v16 }
 0xc91   : > { %4141 = vmatpush1.bf16.msra.mxu0 %v4121_v22 }
 0xc92   : > { %4142 = vmatprep.subr.bf16.mxu0 %v4120_v60 }
 0xc95   : > { %4143 = vmatpush1.bf16.msra.mxu0 %v4119_v61 }
 0xc96   : > { %4144 = vmatprep.subr.bf16.mxu0 %v4118_v45 }
 0xc99   : > { %4145 = vmatpush1.bf16.msra.mxu0 %v4117_v57 }
 0xc9a   : > { %4146 = vmatprep.subr.bf16.mxu0 %v4116_v51 }
 0xc9d   : > { %4147 = vmatpush1.bf16.msra.mxu0 %v4115_v6 }
 0xca0   : > { %4358 = vmatmul.mubr.msk.bf16.vlgmr.msra.gmra.mxu0 %vm801_vm0, %v4114_v4 }
 0xd60   : > { %v4166_v43 = vpop.f32.mrf.mxu0 }
 0xd61   : > { %v4167_v15 = vadd.f32 %v4166_v43, %v4127_v10 }
 0xd62   : > { %v4168_v59 = vpop.f32.mrf.mxu0 }
 0xd63   : > { %v4169_v54 = vadd.f32 %v4168_v59, %v4127_v10 }
 0xd64   : > { %v4170_v20 = vpop.f32.mrf.mxu0 }
 0xd65   : > { %v4175_v29 = vcombine.low %v4167_v15, %v4169_v54 }
 0xd66   : > { %v4171_v5 = vpop.f32.mrf.mxu0 }
 0xd67   : > { %4177 = vst [vmem:[%s5952_s25 + $0x18] sm:$0x77] %v4175_v29 }
 0xd68   : > { %4541 = shalt.err (!%p4538_p3)
}
 0xd69   : > { %s4542_s25 = scalar_lea.hbm %s6845_s24, 512  ;;  %s4546_s15 = scalar_lea.hbm %s6894_s11, 1024 }
 0xd6a   : > { %p4543_p4 = scmp.ne.s32.totalorder %s6845_s24, %s4542_s25  ;;  %p4547_p9 = scmp.lt.s32.totalorder %s6845_s24, %s6894_s11 }
 0xd6b   : > { %p4548_p10 = scmp.lt.s32.totalorder %s4546_s15, %s4542_s25 }
 0xd6c   : > { %p4544_p7 = pnand %p4543_p4, %p4692_p5 }
 0xd6d   : > { %p4549_p11 = por %p4548_p10, %p4547_p9 }
 0xd6e   : > { %p4545_p8 = pneg %p4544_p7 }
 0xd70   : > { %p4550_p12 = pnand %p4549_p11, %p4545_p8 }
 0xd72   : > { %4553 = shalt.err (!%p4550_p12)
}
 0xd73   : > { %4365 = dma.vmem_to_hbm [thread:$0]  (%p4692_p5), %s4194_s14, 512, %s6845_s24, %s4179_s30  }
 0xd74 PF: > { %p4371_p13 = scmp.ge.s32.totalorder %s4588_s20, 2  ;;  %s4205_s0 = sand.u32 1, %s4576_s17  }
 0xd75   : > { %s4206_s29 = scalar_lea.sflag [#allocation3], %s4205_s0 }
 0xd76   : > { %p4368_p0 = pnand %p4371_p13, %p4696_p6 }
 0xd78   : > { %p4369_p1 = pneg %p4368_p0 }
 0xd7a   : > { %4571 = dma.done.wait (%p4369_p1), %s4206_s29, 512  }
 0xd7b   : > { %4573 = vsyncadd (%p4369_p1), %s4206_s29, 4294966784  ;;  %p21_p2 = scmp.ge.s32.totalorder %s4679_s23, 4   ;;  %s7310_s17 = smov %s4580_s18 }
 0xd7c   : > { %s7311_s18 = smov %s4584_s19  ;;  %s7312_s19 = smov %s4690_s26 }
 0xd7d   : > { %s7313_s20 = smov %s4679_s23  ;;  %23 = sbr.rel (!%p21_p2) target bundleno = 5 (0x5), region = 99 }
 0xd82   :  { %4211 = vsyncpa [#allocation3], 1 }
 0xd83   :  { %4213 = vsyncpa [#allocation3 + $0x1], 1 }

</bundles_post_ra>
